<compile_context>
chip_gen: v6e
topology: v6e:2x2x1
jax: 0.10.0
libtpu: 0.0.40
codegen_flags: <defaults>
</compile_context>

<pallas_src>
import math

import jax
import jax.numpy as jnp
from jax.experimental import pallas as pl
from jax.experimental.pallas import tpu as pltpu

# ----------------------------- config (matches the module) -------------------
BATCH = 2
N_VARS = 4            # enc_in (channels / variables)
SEQ_LEN = 32
PRED_LEN = 8
PATCH_LEN = 8
STRIDE = 8
D_MODEL = 32
N_HEADS = 4
D_HEAD = D_MODEL // N_HEADS
D_FF = 64
E_LAYERS = 2
ACTIVATION = "relu"   # args.activation ('relu' branch of EncoderLayer)

NUM_PATCH = (SEQ_LEN - PATCH_LEN) // STRIDE + 2   # ReplicationPad1d((0, stride)) -> 5
HEAD_NF = D_MODEL * NUM_PATCH
EPS = 1e-5
ATTN_SCALE = 1.0 / math.sqrt(D_HEAD)

BC = BATCH * N_VARS               # folded (batch, channel) rows = 8
TOKENS = NUM_PATCH * BC           # all tokens, p-major order: row = p*BC + bc
SLAB_LANES = 128
NEG_INF = -1e9

assert STRIDE == PATCH_LEN and SEQ_LEN % STRIDE == 0, "patching assumes stride == patch_len"


# --------------------------- packed-weight slab layout ------------------------
def _build_layout():
    """Static (row_offset, n_rows, n_cols) table for the single weight slab."""
    layout = {}
    r = 0

    def add(name, nrows, ncols):
        nonlocal r
        r = ((r + 7) // 8) * 8           # keep every entry sublane-aligned
        layout[name] = (r, nrows, ncols)
        r += nrows

    add("w_emb", PATCH_LEN, D_MODEL)
    add("pos", TOKENS, D_MODEL)          # positional embedding, pre-tiled to tokens
    for l in range(E_LAYERS):
        add(f"wqkv{l}", D_MODEL, 3 * D_MODEL)
        add(f"bqkv{l}", 1, 3 * D_MODEL)
        add(f"wo{l}", D_MODEL, D_MODEL)
        add(f"bo{l}", 1, D_MODEL)
        add(f"w1{l}", D_MODEL, D_FF)
        add(f"b1{l}", 1, D_FF)
        add(f"w2{l}", D_FF, D_MODEL)
        add(f"b2{l}", 1, D_MODEL)
        add(f"ln1g{l}", 1, D_MODEL)
        add(f"ln1b{l}", 1, D_MODEL)
        add(f"ln2g{l}", 1, D_MODEL)
        add(f"ln2b{l}", 1, D_MODEL)
    add("encg", 1, D_MODEL)
    add("encb", 1, D_MODEL)
    add("whead", NUM_PATCH * D_MODEL, PRED_LEN)   # row p*D + d  (kernel order)
    add("bhead", 1, PRED_LEN)
    total = ((r + 7) // 8) * 8
    return layout, total


LAYOUT, SLAB_ROWS = _build_layout()


def _w(ref, name):
    """Carve one weight out of the slab ref with a static slice."""
    r, n, c = LAYOUT[name]
    return ref[r:r + n, 0:c]


# ------------------------------- fused kernel --------------------------------
def _layernorm(x, g, b):
    mu = jnp.mean(x, axis=-1, keepdims=True)
    xc = x - mu
    var = jnp.mean(xc * xc, axis=-1, keepdims=True)
    return xc * jax.lax.rsqrt(var + EPS) * g + b


def patchtst_kernel(x_ref, mask_ref, w_ref, o_ref):
    """Single grid step == full batch (RevIN -> patches -> encoder -> head)."""
    f32 = jnp.float32

    # ---- RevIN: instance norm over time, per (batch, channel) row -----------
    x = x_ref[...].astype(f32)                              # [BC, SEQ_LEN]
    mean = jnp.mean(x, axis=-1, keepdims=True)              # [BC, 1]
    xc = x - mean
    var = jnp.mean(xc * xc, axis=-1, keepdims=True)
    std = jnp.sqrt(var + EPS)                               # [BC, 1]
    xn = xc / std                                           # [BC, SEQ_LEN]

    # ---- patching: ReplicationPad1d((0, stride)) + unfold, p-major tokens ---
    n_full = SEQ_LEN // STRIDE                              # patches fully inside seq
    blocks = [xn[:, p * STRIDE:p * STRIDE + PATCH_LEN] for p in range(n_full)]
    blocks.append(jnp.broadcast_to(xn[:, SEQ_LEN - 1:SEQ_LEN], (BC, PATCH_LEN)))
    patches = jnp.concatenate(blocks, axis=0)               # [TOKENS, PATCH_LEN]

    # ---- patch embedding (bias=False) + pre-tiled positional embedding ------
    h = jnp.dot(patches, _w(w_ref, "w_emb"),
                preferred_element_type=f32) + _w(w_ref, "pos")   # [TOKENS, D]

    mask = mask_ref[...]                                    # [TOKENS, TOKENS]

    # ---- transformer encoder --------------------------------------------------
    for l in range(E_LAYERS):
        qkv = jnp.dot(h, _w(w_ref, f"wqkv{l}"),
                      preferred_element_type=f32) + _w(w_ref, f"bqkv{l}")
        q = qkv[:, 0:D_MODEL]                # attention scale pre-folded into Q
        k = qkv[:, D_MODEL:2 * D_MODEL]
        v = qkv[:, 2 * D_MODEL:3 * D_MODEL]

        ctx = []
        for hh in range(N_HEADS):
            sl = slice(hh * D_HEAD, (hh + 1) * D_HEAD)
            s = jnp.einsum('td,sd->ts', q[:, sl], k[:, sl],
                           preferred_element_type=f32) + mask     # [T, T]
            s = s - jnp.max(s, axis=-1, keepdims=True)
            e = jnp.exp(s)
            p = e / jnp.sum(e, axis=-1, keepdims=True)            # exact softmax
            ctx.append(jnp.dot(p, v[:, sl], preferred_element_type=f32))
        attn = jnp.concatenate(ctx, axis=-1)                      # [T, D]
        attn = jnp.dot(attn, _w(w_ref, f"wo{l}"),
                       preferred_element_type=f32) + _w(w_ref, f"bo{l}")

        h = _layernorm(h + attn, _w(w_ref, f"ln1g{l}"), _w(w_ref, f"ln1b{l}"))
        y = jnp.dot(h, _w(w_ref, f"w1{l}"),
                    preferred_element_type=f32) + _w(w_ref, f"b1{l}")
        if ACTIVATION == "relu":
            y = jnp.maximum(y, 0.0)
        else:
            y = jax.nn.gelu(y)
        y = jnp.dot(y, _w(w_ref, f"w2{l}"),
                    preferred_element_type=f32) + _w(w_ref, f"b2{l}")
        h = _layernorm(h + y, _w(w_ref, f"ln2g{l}"), _w(w_ref, f"ln2b{l}"))

    # ---- encoder final LayerNorm --------------------------------------------
    h = _layernorm(h, _w(w_ref, "encg"), _w(w_ref, "encb"))        # [TOKENS, D]

    # ---- FlattenHead: 5 accumulating [BC, D] x [D, PRED] matmuls -------------
    rhead, _, _ = LAYOUT["whead"]
    dec = jnp.zeros((BC, PRED_LEN), f32)
    for p in range(NUM_PATCH):
        hp = h[p * BC:(p + 1) * BC, :]                             # [BC, D]
        wp = w_ref[rhead + p * D_MODEL: rhead + (p + 1) * D_MODEL, 0:PRED_LEN]
        dec = dec + jnp.dot(hp, wp, preferred_element_type=f32)
    dec = dec + _w(w_ref, "bhead")                                 # [BC, PRED]

    # ---- de-normalization -----------------------------------------------------
    dec = dec * std + mean
    o_ref[...] = dec.astype(o_ref.dtype)


# ------------------------------- parameters ----------------------------------
def positional_embedding(length, d_model):
    position = jnp.arange(length, dtype=jnp.float32)[:, None]
    div_term = jnp.exp(
        jnp.arange(0, d_model, 2, dtype=jnp.float32) * -(math.log(10000.0) / d_model)
    )
    pe = jnp.zeros((length, d_model), jnp.float32)
    pe = pe.at[:, 0::2].set(jnp.sin(position * div_term))
    pe = pe.at[:, 1::2].set(jnp.cos(position * div_term))
    return pe


def init_params(key):
    kit = iter(jax.random.split(key, 8 + 12 * E_LAYERS))

    def w(shape, scale=0.02):
        return jax.random.normal(next(kit), shape, jnp.float32) * scale

    wqkv, bqkv, wo, bo = [], [], [], []
    w1, b1, w2, b2 = [], [], [], []
    ln1g, ln1b, ln2g, ln2b = [], [], [], []
    for _ in range(E_LAYERS):
        wq, wk, wv = w((D_MODEL, D_MODEL)), w((D_MODEL, D_MODEL)), w((D_MODEL, D_MODEL))
        wqkv.append(jnp.concatenate([wq, wk, wv], axis=1))      # fused QKV weight
        bqkv.append(w((1, 3 * D_MODEL)))
        wo.append(w((D_MODEL, D_MODEL))); bo.append(w((1, D_MODEL)))
        w1.append(w((D_MODEL, D_FF)));    b1.append(w((1, D_FF)))    # conv1 (k=1)
        w2.append(w((D_FF, D_MODEL)));    b2.append(w((1, D_MODEL))) # conv2 (k=1)
        ln1g.append(jnp.ones((1, D_MODEL), jnp.float32))
        ln1b.append(jnp.zeros((1, D_MODEL), jnp.float32))
        ln2g.append(jnp.ones((1, D_MODEL), jnp.float32))
        ln2b.append(jnp.zeros((1, D_MODEL), jnp.float32))

    return {
        "w_val": w((PATCH_LEN, D_MODEL)),          # value_embedding (bias=False)
        "pos_emb": positional_embedding(NUM_PATCH, D_MODEL),
        "wqkv": jnp.stack(wqkv), "bqkv": jnp.stack(bqkv),
        "wo": jnp.stack(wo), "bo": jnp.stack(bo),
        "w1": jnp.stack(w1), "b1": jnp.stack(b1),
        "w2": jnp.stack(w2), "b2": jnp.stack(b2),
        "ln1_g": jnp.stack(ln1g), "ln1_b": jnp.stack(ln1b),
        "ln2_g": jnp.stack(ln2g), "ln2_b": jnp.stack(ln2b),
        "enc_norm_g": jnp.ones((1, D_MODEL), jnp.float32),
        "enc_norm_b": jnp.zeros((1, D_MODEL), jnp.float32),
        # torch FlattenHead layout: input index = d*NUM_PATCH + p
        "w_head": w((HEAD_NF, PRED_LEN)),
        "b_head": w((1, PRED_LEN)),
    }


# --------------------------- wrapper-side weight packing ----------------------
def pack_weights(params):
    """Pack every weight into one [SLAB_ROWS, 128] f32 slab (constant under jit)."""
    slab = jnp.zeros((SLAB_ROWS, SLAB_LANES), jnp.float32)

    def put(s, name, arr):
        r, n, c = LAYOUT[name]
        return s.at[r:r + n, :c].set(jnp.asarray(arr, jnp.float32).reshape(n, c))

    slab = put(slab, "w_emb", params["w_val"])
    # positional embedding pre-tiled to token rows (p-major: row = p*BC + bc)
    slab = put(slab, "pos", jnp.repeat(params["pos_emb"], BC, axis=0))

    # fold the attention scale into the Q columns of the fused QKV weight/bias
    scale_vec = jnp.concatenate([jnp.full((D_MODEL,), ATTN_SCALE, jnp.float32),
                                 jnp.ones((2 * D_MODEL,), jnp.float32)])
    for l in range(E_LAYERS):
        slab = put(slab, f"wqkv{l}", params["wqkv"][l] * scale_vec[None, :])
        slab = put(slab, f"bqkv{l}", params["bqkv"][l] * scale_vec[None, :])
        slab = put(slab, f"wo{l}", params["wo"][l])
        slab = put(slab, f"bo{l}", params["bo"][l])
        slab = put(slab, f"w1{l}", params["w1"][l])
        slab = put(slab, f"b1{l}", params["b1"][l])
        slab = put(slab, f"w2{l}", params["w2"][l])
        slab = put(slab, f"b2{l}", params["b2"][l])
        slab = put(slab, f"ln1g{l}", params["ln1_g"][l])
        slab = put(slab, f"ln1b{l}", params["ln1_b"][l])
        slab = put(slab, f"ln2g{l}", params["ln2_g"][l])
        slab = put(slab, f"ln2b{l}", params["ln2_b"][l])
    slab = put(slab, "encg", params["enc_norm_g"])
    slab = put(slab, "encb", params["enc_norm_b"])

    # re-layout head weight: torch flatten order d*P+p  ->  kernel order p*D+d
    whead_k = jnp.transpose(
        params["w_head"].reshape(D_MODEL, NUM_PATCH, PRED_LEN), (1, 0, 2)
    ).reshape(NUM_PATCH * D_MODEL, PRED_LEN)
    slab = put(slab, "whead", whead_k)
    slab = put(slab, "bhead", params["b_head"])
    return slab


def attention_mask():
    """(batch,channel)-block additive mask for p-major token order (constant)."""
    ids = jnp.arange(TOKENS, dtype=jnp.int32) % BC
    same = ids[:, None] == ids[None, :]
    return jnp.where(same, 0.0, NEG_INF).astype(jnp.float32)


# ------------------------------- model forward --------------------------------
def patchtst_forecast(params, x_enc):
    """x_enc: [B, SEQ_LEN, N_VARS] -> [B, PRED_LEN, N_VARS]."""
    B = x_enc.shape[0]
    assert B == BATCH
    # module's permute(0,2,1); fold batch and channel into one row axis
    x_rows = jnp.transpose(x_enc, (0, 2, 1)).reshape(BC, SEQ_LEN)

    wslab = pack_weights(params)        # constant-folded under jit
    mask = attention_mask()             # constant-folded under jit

    out = pl.pallas_call(
        patchtst_kernel,
        out_shape=jax.ShapeDtypeStruct((BC, PRED_LEN), x_enc.dtype),
        grid=(1,),
        in_specs=[
            pl.BlockSpec((BC, SEQ_LEN), lambda i: (0, 0)),
            pl.BlockSpec((TOKENS, TOKENS), lambda i: (0, 0)),
            pl.BlockSpec((SLAB_ROWS, SLAB_LANES), lambda i: (0, 0)),
        ],
        out_specs=pl.BlockSpec((BC, PRED_LEN), lambda i: (0, 0)),
        compiler_params=pltpu.CompilerParams(dimension_semantics=("arbitrary",)),
    )(x_rows, mask, wslab)

    dec = out.reshape(B, N_VARS, PRED_LEN)
    return jnp.transpose(dec, (0, 2, 1))                   # [B, PRED_LEN, C]


# --------------------------- pure-JAX reference (check) -----------------------
def _ln_ref(x, g, b):
    mu = jnp.mean(x, axis=-1, keepdims=True)
    var = jnp.mean((x - mu) ** 2, axis=-1, keepdims=True)
    return (x - mu) * jax.lax.rsqrt(var + EPS) * g + b


def reference_forward(params, x_enc):
    B = x_enc.shape[0]
    mean = jnp.mean(x_enc, axis=1, keepdims=True)
    xc = x_enc - mean
    std = jnp.sqrt(jnp.var(xc, axis=1, keepdims=True) + EPS)
    xn = xc / std
    x = jnp.transpose(xn, (0, 2, 1))
    x = jnp.concatenate([x, jnp.repeat(x[:, :, -1:], STRIDE, axis=-1)], axis=-1)
    idx = jnp.arange(NUM_PATCH)[:, None] * STRIDE + jnp.arange(PATCH_LEN)[None, :]
    tok = x[:, :, idx].reshape(B * N_VARS, NUM_PATCH, PATCH_LEN)
    h = tok @ params["w_val"] + params["pos_emb"][None]
    for l in range(E_LAYERS):
        qkv = h @ params["wqkv"][l] + params["bqkv"][l]
        q, k, v = (qkv[..., :D_MODEL], qkv[..., D_MODEL:2 * D_MODEL],
                   qkv[..., 2 * D_MODEL:])

        def sh(t):
            return t.reshape(B * N_VARS, NUM_PATCH, N_HEADS, D_HEAD).transpose(0, 2, 1, 3)

        s = jnp.einsum('bhqd,bhkd->bhqk', sh(q), sh(k)) * ATTN_SCALE
        a = jax.nn.softmax(s, axis=-1)
        ctx = jnp.einsum('bhqk,bhkd->bhqd', a, sh(v)).transpose(0, 2, 1, 3)
        ctx = ctx.reshape(B * N_VARS, NUM_PATCH, D_MODEL)
        h = _ln_ref(h + ctx @ params["wo"][l] + params["bo"][l],
                    params["ln1_g"][l], params["ln1_b"][l])
        y = h @ params["w1"][l] + params["b1"][l]
        y = jnp.maximum(y, 0.0) if ACTIVATION == "relu" else jax.nn.gelu(y)
        y = y @ params["w2"][l] + params["b2"][l]
        h = _ln_ref(h + y, params["ln2_g"][l], params["ln2_b"][l])
    h = _ln_ref(h, params["enc_norm_g"], params["enc_norm_b"])
    enc = h.reshape(B, N_VARS, NUM_PATCH, D_MODEL).transpose(0, 1, 3, 2)  # [B,C,D,P]
    flat = enc.reshape(B, N_VARS, HEAD_NF)
    dec = flat @ params["w_head"] + params["b_head"]                      # [B,C,PRED]
    dec = jnp.transpose(dec, (0, 2, 1))                                   # [B,PRED,C]
    return dec * std + mean


# ----------------------------------- main -------------------------------------
if __name__ == "__main__":
    key = jax.random.PRNGKey(0)
    pkey, xkey = jax.random.split(key)
    params = init_params(pkey)

    x_enc = jax.random.normal(xkey, (BATCH, SEQ_LEN, N_VARS), jnp.float32)
    # x_mark_enc / x_dec / x_mark_dec are unused by the PatchTST forecast path.

    fwd = jax.jit(lambda xe: patchtst_forecast(params, xe))
    out = jax.block_until_ready(fwd(x_enc))
    assert out.shape == (BATCH, PRED_LEN, N_VARS), out.shape
    assert bool(jnp.all(jnp.isfinite(out)))

    with jax.default_matmul_precision("float32"):
        ref = reference_forward(params, x_enc)
    max_err = float(jnp.max(jnp.abs(out - ref)))
    assert max_err < 2e-2, f"mismatch vs reference: max_abs_err={max_err}"

    print("KERNEL_OK")
</pallas_src>

<mosaic_0001>
module attributes {stable_mosaic.version = 11 : i64} {
  func.func @patchtst_kernel(%arg0: i32, %arg1: memref<8x32xf32, #tpu.memory_space<vmem>>, %arg2: memref<40x40xf32, #tpu.memory_space<vmem>>, %arg3: memref<680x128xf32, #tpu.memory_space<vmem>>, %arg4: memref<8x8xf32, #tpu.memory_space<vmem>>) attributes {dimension_semantics = [#tpu.dimension_semantics<arbitrary>], iteration_bounds = array<i64: 1>, scalar_prefetch = 0 : i64, scratch_operands = 0 : i64, tpu.core_type = #tpu.core_type<tc>, window_params = [{pipeline_mode = #tpu.pipeline_mode<synchronous>, transform_indices = @transform_0, window_bounds = array<i64: 8, 32>}, {pipeline_mode = #tpu.pipeline_mode<synchronous>, transform_indices = @transform_1, window_bounds = array<i64: 40, 40>}, {pipeline_mode = #tpu.pipeline_mode<synchronous>, transform_indices = @transform_2, window_bounds = array<i64: 680, 128>}, {pipeline_mode = #tpu.pipeline_mode<synchronous>, transform_indices = @transform_3, window_bounds = array<i64: 8, 8>}]} {
    %c0 = arith.constant 0 : index
    %c0_0 = arith.constant 0 : index
    %0 = vector.load %arg1[%c0, %c0_0] : memref<8x32xf32, #tpu.memory_space<vmem>>, vector<8x32xf32>
    %cst = arith.constant dense<0.000000e+00> : vector<8xf32>
    %1 = vector.multi_reduction <add>, %0, %cst [1] : vector<8x32xf32> to vector<8xf32>
    %2 = vector.shape_cast %1 : vector<8xf32> to vector<8x1xf32>
    %cst_1 = arith.constant 3.200000e+01 : f32
    %3 = vector.broadcast %cst_1 : f32 to vector<8x1xf32>
    %4 = arith.divf %2, %3 : vector<8x1xf32>
    %5 = vector.broadcast %4 : vector<8x1xf32> to vector<8x32xf32>
    %6 = arith.subf %0, %5 : vector<8x32xf32>
    %7 = arith.mulf %6, %6 : vector<8x32xf32>
    %cst_2 = arith.constant dense<0.000000e+00> : vector<8xf32>
    %8 = vector.multi_reduction <add>, %7, %cst_2 [1] : vector<8x32xf32> to vector<8xf32>
    %9 = vector.shape_cast %8 : vector<8xf32> to vector<8x1xf32>
    %cst_3 = arith.constant 3.200000e+01 : f32
    %10 = vector.broadcast %cst_3 : f32 to vector<8x1xf32>
    %11 = arith.divf %9, %10 : vector<8x1xf32>
    %cst_4 = arith.constant 9.99999974E-6 : f32
    %12 = vector.broadcast %cst_4 : f32 to vector<8x1xf32>
    %13 = arith.addf %11, %12 : vector<8x1xf32>
    %14 = math.sqrt %13 : vector<8x1xf32>
    %15 = vector.broadcast %14 : vector<8x1xf32> to vector<8x32xf32>
    %16 = arith.divf %6, %15 : vector<8x32xf32>
    %17 = vector.extract_strided_slice %16 {offsets = [0, 0], sizes = [8, 8], strides = [1, 1]} : vector<8x32xf32> to vector<8x8xf32>
    %18 = vector.extract_strided_slice %16 {offsets = [0, 8], sizes = [8, 8], strides = [1, 1]} : vector<8x32xf32> to vector<8x8xf32>
    %19 = vector.extract_strided_slice %16 {offsets = [0, 16], sizes = [8, 8], strides = [1, 1]} : vector<8x32xf32> to vector<8x8xf32>
    %20 = vector.extract_strided_slice %16 {offsets = [0, 24], sizes = [8, 8], strides = [1, 1]} : vector<8x32xf32> to vector<8x8xf32>
    %21 = vector.extract_strided_slice %16 {offsets = [0, 31], sizes = [8, 1], strides = [1, 1]} : vector<8x32xf32> to vector<8x1xf32>
    %22 = vector.shape_cast %21 : vector<8x1xf32> to vector<8x1xf32>
    %23 = vector.broadcast %22 : vector<8x1xf32> to vector<8x8xf32>
    %24 = tpu.concatenate %17, %18, %19, %20, %23 in 0 : vector<8x8xf32>, vector<8x8xf32>, vector<8x8xf32>, vector<8x8xf32>, vector<8x8xf32> -> vector<40x8xf32>
    %c0_5 = arith.constant 0 : index
    %c0_6 = arith.constant 0 : index
    %25 = vector.load %arg3[%c0_5, %c0_6] : memref<680x128xf32, #tpu.memory_space<vmem>>, vector<8x32xf32>
    %cst_7 = arith.constant dense<0.000000e+00> : vector<40x32xf32>
    %26 = tpu.matmul %24, %25, %cst_7 {dimension_numbers = #tpu.dot_dimension_numbers<[1], [0], [0], [1], [0, 0, 1, 1], [], []>} : vector<40x8xf32>, vector<8x32xf32>, vector<40x32xf32> -> vector<40x32xf32>
    %c8 = arith.constant 8 : index
    %c0_8 = arith.constant 0 : index
    %27 = vector.load %arg3[%c8, %c0_8] : memref<680x128xf32, #tpu.memory_space<vmem>>, vector<40x32xf32>
    %28 = arith.addf %26, %27 : vector<40x32xf32>
    %c0_9 = arith.constant 0 : index
    %c0_10 = arith.constant 0 : index
    %29 = vector.load %arg2[%c0_9, %c0_10] : memref<40x40xf32, #tpu.memory_space<vmem>>, vector<40x40xf32>
    %c48 = arith.constant 48 : index
    %c0_11 = arith.constant 0 : index
    %30 = vector.load %arg3[%c48, %c0_11] : memref<680x128xf32, #tpu.memory_space<vmem>>, vector<32x96xf32>
    %cst_12 = arith.constant dense<0.000000e+00> : vector<40x96xf32>
    %31 = tpu.matmul %28, %30, %cst_12 {dimension_numbers = #tpu.dot_dimension_numbers<[1], [0], [0], [1], [0, 0, 1, 1], [], []>} : vector<40x32xf32>, vector<32x96xf32>, vector<40x96xf32> -> vector<40x96xf32>
    %c80 = arith.constant 80 : index
    %c0_13 = arith.constant 0 : index
    %32 = vector.load %arg3[%c80, %c0_13] : memref<680x128xf32, #tpu.memory_space<vmem>>, vector<1x96xf32>
    %33 = vector.broadcast %32 : vector<1x96xf32> to vector<40x96xf32>
    %34 = arith.addf %31, %33 : vector<40x96xf32>
    %35 = vector.extract_strided_slice %34 {offsets = [0, 0], sizes = [40, 32], strides = [1, 1]} : vector<40x96xf32> to vector<40x32xf32>
    %36 = vector.extract_strided_slice %34 {offsets = [0, 32], sizes = [40, 32], strides = [1, 1]} : vector<40x96xf32> to vector<40x32xf32>
    %37 = vector.extract_strided_slice %34 {offsets = [0, 64], sizes = [40, 32], strides = [1, 1]} : vector<40x96xf32> to vector<40x32xf32>
    %38 = vector.extract_strided_slice %35 {offsets = [0, 0], sizes = [40, 8], strides = [1, 1]} : vector<40x32xf32> to vector<40x8xf32>
    %39 = vector.extract_strided_slice %36 {offsets = [0, 0], sizes = [40, 8], strides = [1, 1]} : vector<40x32xf32> to vector<40x8xf32>
    "tpu.trace_start"() <{level = 10 : i32, message = "td,sd->ts"}> : () -> ()
    %cst_14 = arith.constant dense<0.000000e+00> : vector<40x40xf32>
    %40 = tpu.matmul %38, %39, %cst_14 {dimension_numbers = #tpu.dot_dimension_numbers<[1], [1], [0], [0], [0, 0, 1, 0], [], []>} : vector<40x8xf32>, vector<40x8xf32>, vector<40x40xf32> -> vector<40x40xf32>
    "tpu.trace_stop"() : () -> ()
    %41 = arith.addf %40, %29 : vector<40x40xf32>
    %cst_15 = arith.constant dense<0xFF800000> : vector<40xf32>
    %42 = vector.multi_reduction <maximumf>, %41, %cst_15 [1] : vector<40x40xf32> to vector<40xf32>
    %43 = vector.shape_cast %42 : vector<40xf32> to vector<40x1xf32>
    %44 = vector.broadcast %43 : vector<40x1xf32> to vector<40x40xf32>
    %45 = arith.subf %41, %44 : vector<40x40xf32>
    %46 = math.exp %45 : vector<40x40xf32>
    %cst_16 = arith.constant dense<0.000000e+00> : vector<40xf32>
    %47 = vector.multi_reduction <add>, %46, %cst_16 [1] : vector<40x40xf32> to vector<40xf32>
    %48 = vector.shape_cast %47 : vector<40xf32> to vector<40x1xf32>
    %49 = vector.broadcast %48 : vector<40x1xf32> to vector<40x40xf32>
    %50 = arith.divf %46, %49 : vector<40x40xf32>
    %51 = vector.extract_strided_slice %37 {offsets = [0, 0], sizes = [40, 8], strides = [1, 1]} : vector<40x32xf32> to vector<40x8xf32>
    %cst_17 = arith.constant dense<0.000000e+00> : vector<40x8xf32>
    %52 = tpu.matmul %50, %51, %cst_17 {dimension_numbers = #tpu.dot_dimension_numbers<[1], [0], [0], [1], [0, 0, 1, 1], [], []>} : vector<40x40xf32>, vector<40x8xf32>, vector<40x8xf32> -> vector<40x8xf32>
    %53 = vector.extract_strided_slice %35 {offsets = [0, 8], sizes = [40, 8], strides = [1, 1]} : vector<40x32xf32> to vector<40x8xf32>
    %54 = vector.extract_strided_slice %36 {offsets = [0, 8], sizes = [40, 8], strides = [1, 1]} : vector<40x32xf32> to vector<40x8xf32>
    "tpu.trace_start"() <{level = 10 : i32, message = "td,sd->ts"}> : () -> ()
    %cst_18 = arith.constant dense<0.000000e+00> : vector<40x40xf32>
    %55 = tpu.matmul %53, %54, %cst_18 {dimension_numbers = #tpu.dot_dimension_numbers<[1], [1], [0], [0], [0, 0, 1, 0], [], []>} : vector<40x8xf32>, vector<40x8xf32>, vector<40x40xf32> -> vector<40x40xf32>
    "tpu.trace_stop"() : () -> ()
    %56 = arith.addf %55, %29 : vector<40x40xf32>
    %cst_19 = arith.constant dense<0xFF800000> : vector<40xf32>
    %57 = vector.multi_reduction <maximumf>, %56, %cst_19 [1] : vector<40x40xf32> to vector<40xf32>
    %58 = vector.shape_cast %57 : vector<40xf32> to vector<40x1xf32>
    %59 = vector.broadcast %58 : vector<40x1xf32> to vector<40x40xf32>
    %60 = arith.subf %56, %59 : vector<40x40xf32>
    %61 = math.exp %60 : vector<40x40xf32>
    %cst_20 = arith.constant dense<0.000000e+00> : vector<40xf32>
    %62 = vector.multi_reduction <add>, %61, %cst_20 [1] : vector<40x40xf32> to vector<40xf32>
    %63 = vector.shape_cast %62 : vector<40xf32> to vector<40x1xf32>
    %64 = vector.broadcast %63 : vector<40x1xf32> to vector<40x40xf32>
    %65 = arith.divf %61, %64 : vector<40x40xf32>
    %66 = vector.extract_strided_slice %37 {offsets = [0, 8], sizes = [40, 8], strides = [1, 1]} : vector<40x32xf32> to vector<40x8xf32>
    %cst_21 = arith.constant dense<0.000000e+00> : vector<40x8xf32>
    %67 = tpu.matmul %65, %66, %cst_21 {dimension_numbers = #tpu.dot_dimension_numbers<[1], [0], [0], [1], [0, 0, 1, 1], [], []>} : vector<40x40xf32>, vector<40x8xf32>, vector<40x8xf32> -> vector<40x8xf32>
    %68 = vector.extract_strided_slice %35 {offsets = [0, 16], sizes = [40, 8], strides = [1, 1]} : vector<40x32xf32> to vector<40x8xf32>
    %69 = vector.extract_strided_slice %36 {offsets = [0, 16], sizes = [40, 8], strides = [1, 1]} : vector<40x32xf32> to vector<40x8xf32>
    "tpu.trace_start"() <{level = 10 : i32, message = "td,sd->ts"}> : () -> ()
    %cst_22 = arith.constant dense<0.000000e+00> : vector<40x40xf32>
    %70 = tpu.matmul %68, %69, %cst_22 {dimension_numbers = #tpu.dot_dimension_numbers<[1], [1], [0], [0], [0, 0, 1, 0], [], []>} : vector<40x8xf32>, vector<40x8xf32>, vector<40x40xf32> -> vector<40x40xf32>
    "tpu.trace_stop"() : () -> ()
    %71 = arith.addf %70, %29 : vector<40x40xf32>
    %cst_23 = arith.constant dense<0xFF800000> : vector<40xf32>
    %72 = vector.multi_reduction <maximumf>, %71, %cst_23 [1] : vector<40x40xf32> to vector<40xf32>
    %73 = vector.shape_cast %72 : vector<40xf32> to vector<40x1xf32>
    %74 = vector.broadcast %73 : vector<40x1xf32> to vector<40x40xf32>
    %75 = arith.subf %71, %74 : vector<40x40xf32>
    %76 = math.exp %75 : vector<40x40xf32>
    %cst_24 = arith.constant dense<0.000000e+00> : vector<40xf32>
    %77 = vector.multi_reduction <add>, %76, %cst_24 [1] : vector<40x40xf32> to vector<40xf32>
    %78 = vector.shape_cast %77 : vector<40xf32> to vector<40x1xf32>
    %79 = vector.broadcast %78 : vector<40x1xf32> to vector<40x40xf32>
    %80 = arith.divf %76, %79 : vector<40x40xf32>
    %81 = vector.extract_strided_slice %37 {offsets = [0, 16], sizes = [40, 8], strides = [1, 1]} : vector<40x32xf32> to vector<40x8xf32>
    %cst_25 = arith.constant dense<0.000000e+00> : vector<40x8xf32>
    %82 = tpu.matmul %80, %81, %cst_25 {dimension_numbers = #tpu.dot_dimension_numbers<[1], [0], [0], [1], [0, 0, 1, 1], [], []>} : vector<40x40xf32>, vector<40x8xf32>, vector<40x8xf32> -> vector<40x8xf32>
    %83 = vector.extract_strided_slice %35 {offsets = [0, 24], sizes = [40, 8], strides = [1, 1]} : vector<40x32xf32> to vector<40x8xf32>
    %84 = vector.extract_strided_slice %36 {offsets = [0, 24], sizes = [40, 8], strides = [1, 1]} : vector<40x32xf32> to vector<40x8xf32>
    "tpu.trace_start"() <{level = 10 : i32, message = "td,sd->ts"}> : () -> ()
    %cst_26 = arith.constant dense<0.000000e+00> : vector<40x40xf32>
    %85 = tpu.matmul %83, %84, %cst_26 {dimension_numbers = #tpu.dot_dimension_numbers<[1], [1], [0], [0], [0, 0, 1, 0], [], []>} : vector<40x8xf32>, vector<40x8xf32>, vector<40x40xf32> -> vector<40x40xf32>
    "tpu.trace_stop"() : () -> ()
    %86 = arith.addf %85, %29 : vector<40x40xf32>
    %cst_27 = arith.constant dense<0xFF800000> : vector<40xf32>
    %87 = vector.multi_reduction <maximumf>, %86, %cst_27 [1] : vector<40x40xf32> to vector<40xf32>
    %88 = vector.shape_cast %87 : vector<40xf32> to vector<40x1xf32>
    %89 = vector.broadcast %88 : vector<40x1xf32> to vector<40x40xf32>
    %90 = arith.subf %86, %89 : vector<40x40xf32>
    %91 = math.exp %90 : vector<40x40xf32>
    %cst_28 = arith.constant dense<0.000000e+00> : vector<40xf32>
    %92 = vector.multi_reduction <add>, %91, %cst_28 [1] : vector<40x40xf32> to vector<40xf32>
    %93 = vector.shape_cast %92 : vector<40xf32> to vector<40x1xf32>
    %94 = vector.broadcast %93 : vector<40x1xf32> to vector<40x40xf32>
    %95 = arith.divf %91, %94 : vector<40x40xf32>
    %96 = vector.extract_strided_slice %37 {offsets = [0, 24], sizes = [40, 8], strides = [1, 1]} : vector<40x32xf32> to vector<40x8xf32>
    %cst_29 = arith.constant dense<0.000000e+00> : vector<40x8xf32>
    %97 = tpu.matmul %95, %96, %cst_29 {dimension_numbers = #tpu.dot_dimension_numbers<[1], [0], [0], [1], [0, 0, 1, 1], [], []>} : vector<40x40xf32>, vector<40x8xf32>, vector<40x8xf32> -> vector<40x8xf32>
    %98 = tpu.concatenate %52, %67, %82, %97 in 1 : vector<40x8xf32>, vector<40x8xf32>, vector<40x8xf32>, vector<40x8xf32> -> vector<40x32xf32>
    %c88 = arith.constant 88 : index
    %c0_30 = arith.constant 0 : index
    %99 = vector.load %arg3[%c88, %c0_30] : memref<680x128xf32, #tpu.memory_space<vmem>>, vector<32x32xf32>
    %cst_31 = arith.constant dense<0.000000e+00> : vector<40x32xf32>
    %100 = tpu.matmul %98, %99, %cst_31 {dimension_numbers = #tpu.dot_dimension_numbers<[1], [0], [0], [1], [0, 0, 1, 1], [], []>} : vector<40x32xf32>, vector<32x32xf32>, vector<40x32xf32> -> vector<40x32xf32>
    %c120 = arith.constant 120 : index
    %c0_32 = arith.constant 0 : index
    %101 = vector.load %arg3[%c120, %c0_32] : memref<680x128xf32, #tpu.memory_space<vmem>>, vector<1x32xf32>
    %102 = vector.broadcast %101 : vector<1x32xf32> to vector<40x32xf32>
    %103 = arith.addf %100, %102 : vector<40x32xf32>
    %104 = arith.addf %28, %103 : vector<40x32xf32>
    %c240 = arith.constant 240 : index
    %c0_33 = arith.constant 0 : index
    %105 = vector.load %arg3[%c240, %c0_33] : memref<680x128xf32, #tpu.memory_space<vmem>>, vector<1x32xf32>
    %c248 = arith.constant 248 : index
    %c0_34 = arith.constant 0 : index
    %106 = vector.load %arg3[%c248, %c0_34] : memref<680x128xf32, #tpu.memory_space<vmem>>, vector<1x32xf32>
    %cst_35 = arith.constant dense<0.000000e+00> : vector<40xf32>
    %107 = vector.multi_reduction <add>, %104, %cst_35 [1] : vector<40x32xf32> to vector<40xf32>
    %108 = vector.shape_cast %107 : vector<40xf32> to vector<40x1xf32>
    %cst_36 = arith.constant 3.200000e+01 : f32
    %109 = vector.broadcast %cst_36 : f32 to vector<40x1xf32>
    %110 = arith.divf %108, %109 : vector<40x1xf32>
    %111 = vector.broadcast %110 : vector<40x1xf32> to vector<40x32xf32>
    %112 = arith.subf %104, %111 : vector<40x32xf32>
    %113 = arith.mulf %112, %112 : vector<40x32xf32>
    %cst_37 = arith.constant dense<0.000000e+00> : vector<40xf32>
    %114 = vector.multi_reduction <add>, %113, %cst_37 [1] : vector<40x32xf32> to vector<40xf32>
    %115 = vector.shape_cast %114 : vector<40xf32> to vector<40x1xf32>
    %cst_38 = arith.constant 3.200000e+01 : f32
    %116 = vector.broadcast %cst_38 : f32 to vector<40x1xf32>
    %117 = arith.divf %115, %116 : vector<40x1xf32>
    %cst_39 = arith.constant 9.99999974E-6 : f32
    %118 = vector.broadcast %cst_39 : f32 to vector<40x1xf32>
    %119 = arith.addf %117, %118 : vector<40x1xf32>
    %120 = math.rsqrt %119 : vector<40x1xf32>
    %121 = vector.broadcast %120 : vector<40x1xf32> to vector<40x32xf32>
    %122 = arith.mulf %112, %121 : vector<40x32xf32>
    %123 = vector.broadcast %105 : vector<1x32xf32> to vector<40x32xf32>
    %124 = arith.mulf %122, %123 : vector<40x32xf32>
    %125 = vector.broadcast %106 : vector<1x32xf32> to vector<40x32xf32>
    %126 = arith.addf %124, %125 : vector<40x32xf32>
    %c128 = arith.constant 128 : index
    %c0_40 = arith.constant 0 : index
    %127 = vector.load %arg3[%c128, %c0_40] : memref<680x128xf32, #tpu.memory_space<vmem>>, vector<32x64xf32>
    %cst_41 = arith.constant dense<0.000000e+00> : vector<40x64xf32>
    %128 = tpu.matmul %126, %127, %cst_41 {dimension_numbers = #tpu.dot_dimension_numbers<[1], [0], [0], [1], [0, 0, 1, 1], [], []>} : vector<40x32xf32>, vector<32x64xf32>, vector<40x64xf32> -> vector<40x64xf32>
    %c160 = arith.constant 160 : index
    %c0_42 = arith.constant 0 : index
    %129 = vector.load %arg3[%c160, %c0_42] : memref<680x128xf32, #tpu.memory_space<vmem>>, vector<1x64xf32>
    %130 = vector.broadcast %129 : vector<1x64xf32> to vector<40x64xf32>
    %131 = arith.addf %128, %130 : vector<40x64xf32>
    %cst_43 = arith.constant 0.000000e+00 : f32
    %132 = vector.broadcast %cst_43 : f32 to vector<40x64xf32>
    %133 = arith.maximumf %131, %132 : vector<40x64xf32>
    %c168 = arith.constant 168 : index
    %c0_44 = arith.constant 0 : index
    %134 = vector.load %arg3[%c168, %c0_44] : memref<680x128xf32, #tpu.memory_space<vmem>>, vector<64x32xf32>
    %cst_45 = arith.constant dense<0.000000e+00> : vector<40x32xf32>
    %135 = tpu.matmul %133, %134, %cst_45 {dimension_numbers = #tpu.dot_dimension_numbers<[1], [0], [0], [1], [0, 0, 1, 1], [], []>} : vector<40x64xf32>, vector<64x32xf32>, vector<40x32xf32> -> vector<40x32xf32>
    %c232 = arith.constant 232 : index
    %c0_46 = arith.constant 0 : index
    %136 = vector.load %arg3[%c232, %c0_46] : memref<680x128xf32, #tpu.memory_space<vmem>>, vector<1x32xf32>
    %137 = vector.broadcast %136 : vector<1x32xf32> to vector<40x32xf32>
    %138 = arith.addf %135, %137 : vector<40x32xf32>
    %139 = arith.addf %126, %138 : vector<40x32xf32>
    %c256 = arith.constant 256 : index
    %c0_47 = arith.constant 0 : index
    %140 = vector.load %arg3[%c256, %c0_47] : memref<680x128xf32, #tpu.memory_space<vmem>>, vector<1x32xf32>
    %c264 = arith.constant 264 : index
    %c0_48 = arith.constant 0 : index
    %141 = vector.load %arg3[%c264, %c0_48] : memref<680x128xf32, #tpu.memory_space<vmem>>, vector<1x32xf32>
    %cst_49 = arith.constant dense<0.000000e+00> : vector<40xf32>
    %142 = vector.multi_reduction <add>, %139, %cst_49 [1] : vector<40x32xf32> to vector<40xf32>
    %143 = vector.shape_cast %142 : vector<40xf32> to vector<40x1xf32>
    %cst_50 = arith.constant 3.200000e+01 : f32
    %144 = vector.broadcast %cst_50 : f32 to vector<40x1xf32>
    %145 = arith.divf %143, %144 : vector<40x1xf32>
    %146 = vector.broadcast %145 : vector<40x1xf32> to vector<40x32xf32>
    %147 = arith.subf %139, %146 : vector<40x32xf32>
    %148 = arith.mulf %147, %147 : vector<40x32xf32>
    %cst_51 = arith.constant dense<0.000000e+00> : vector<40xf32>
    %149 = vector.multi_reduction <add>, %148, %cst_51 [1] : vector<40x32xf32> to vector<40xf32>
    %150 = vector.shape_cast %149 : vector<40xf32> to vector<40x1xf32>
    %cst_52 = arith.constant 3.200000e+01 : f32
    %151 = vector.broadcast %cst_52 : f32 to vector<40x1xf32>
    %152 = arith.divf %150, %151 : vector<40x1xf32>
    %cst_53 = arith.constant 9.99999974E-6 : f32
    %153 = vector.broadcast %cst_53 : f32 to vector<40x1xf32>
    %154 = arith.addf %152, %153 : vector<40x1xf32>
    %155 = math.rsqrt %154 : vector<40x1xf32>
    %156 = vector.broadcast %155 : vector<40x1xf32> to vector<40x32xf32>
    %157 = arith.mulf %147, %156 : vector<40x32xf32>
    %158 = vector.broadcast %140 : vector<1x32xf32> to vector<40x32xf32>
    %159 = arith.mulf %157, %158 : vector<40x32xf32>
    %160 = vector.broadcast %141 : vector<1x32xf32> to vector<40x32xf32>
    %161 = arith.addf %159, %160 : vector<40x32xf32>
    %c272 = arith.constant 272 : index
    %c0_54 = arith.constant 0 : index
    %162 = vector.load %arg3[%c272, %c0_54] : memref<680x128xf32, #tpu.memory_space<vmem>>, vector<32x96xf32>
    %cst_55 = arith.constant dense<0.000000e+00> : vector<40x96xf32>
    %163 = tpu.matmul %161, %162, %cst_55 {dimension_numbers = #tpu.dot_dimension_numbers<[1], [0], [0], [1], [0, 0, 1, 1], [], []>} : vector<40x32xf32>, vector<32x96xf32>, vector<40x96xf32> -> vector<40x96xf32>
    %c304 = arith.constant 304 : index
    %c0_56 = arith.constant 0 : index
    %164 = vector.load %arg3[%c304, %c0_56] : memref<680x128xf32, #tpu.memory_space<vmem>>, vector<1x96xf32>
    %165 = vector.broadcast %164 : vector<1x96xf32> to vector<40x96xf32>
    %166 = arith.addf %163, %165 : vector<40x96xf32>
    %167 = vector.extract_strided_slice %166 {offsets = [0, 0], sizes = [40, 32], strides = [1, 1]} : vector<40x96xf32> to vector<40x32xf32>
    %168 = vector.extract_strided_slice %166 {offsets = [0, 32], sizes = [40, 32], strides = [1, 1]} : vector<40x96xf32> to vector<40x32xf32>
    %169 = vector.extract_strided_slice %166 {offsets = [0, 64], sizes = [40, 32], strides = [1, 1]} : vector<40x96xf32> to vector<40x32xf32>
    %170 = vector.extract_strided_slice %167 {offsets = [0, 0], sizes = [40, 8], strides = [1, 1]} : vector<40x32xf32> to vector<40x8xf32>
    %171 = vector.extract_strided_slice %168 {offsets = [0, 0], sizes = [40, 8], strides = [1, 1]} : vector<40x32xf32> to vector<40x8xf32>
    "tpu.trace_start"() <{level = 10 : i32, message = "td,sd->ts"}> : () -> ()
    %cst_57 = arith.constant dense<0.000000e+00> : vector<40x40xf32>
    %172 = tpu.matmul %170, %171, %cst_57 {dimension_numbers = #tpu.dot_dimension_numbers<[1], [1], [0], [0], [0, 0, 1, 0], [], []>} : vector<40x8xf32>, vector<40x8xf32>, vector<40x40xf32> -> vector<40x40xf32>
    "tpu.trace_stop"() : () -> ()
    %173 = arith.addf %172, %29 : vector<40x40xf32>
    %cst_58 = arith.constant dense<0xFF800000> : vector<40xf32>
    %174 = vector.multi_reduction <maximumf>, %173, %cst_58 [1] : vector<40x40xf32> to vector<40xf32>
    %175 = vector.shape_cast %174 : vector<40xf32> to vector<40x1xf32>
    %176 = vector.broadcast %175 : vector<40x1xf32> to vector<40x40xf32>
    %177 = arith.subf %173, %176 : vector<40x40xf32>
    %178 = math.exp %177 : vector<40x40xf32>
    %cst_59 = arith.constant dense<0.000000e+00> : vector<40xf32>
    %179 = vector.multi_reduction <add>, %178, %cst_59 [1] : vector<40x40xf32> to vector<40xf32>
    %180 = vector.shape_cast %179 : vector<40xf32> to vector<40x1xf32>
    %181 = vector.broadcast %180 : vector<40x1xf32> to vector<40x40xf32>
    %182 = arith.divf %178, %181 : vector<40x40xf32>
    %183 = vector.extract_strided_slice %169 {offsets = [0, 0], sizes = [40, 8], strides = [1, 1]} : vector<40x32xf32> to vector<40x8xf32>
    %cst_60 = arith.constant dense<0.000000e+00> : vector<40x8xf32>
    %184 = tpu.matmul %182, %183, %cst_60 {dimension_numbers = #tpu.dot_dimension_numbers<[1], [0], [0], [1], [0, 0, 1, 1], [], []>} : vector<40x40xf32>, vector<40x8xf32>, vector<40x8xf32> -> vector<40x8xf32>
    %185 = vector.extract_strided_slice %167 {offsets = [0, 8], sizes = [40, 8], strides = [1, 1]} : vector<40x32xf32> to vector<40x8xf32>
    %186 = vector.extract_strided_slice %168 {offsets = [0, 8], sizes = [40, 8], strides = [1, 1]} : vector<40x32xf32> to vector<40x8xf32>
    "tpu.trace_start"() <{level = 10 : i32, message = "td,sd->ts"}> : () -> ()
    %cst_61 = arith.constant dense<0.000000e+00> : vector<40x40xf32>
    %187 = tpu.matmul %185, %186, %cst_61 {dimension_numbers = #tpu.dot_dimension_numbers<[1], [1], [0], [0], [0, 0, 1, 0], [], []>} : vector<40x8xf32>, vector<40x8xf32>, vector<40x40xf32> -> vector<40x40xf32>
    "tpu.trace_stop"() : () -> ()
    %188 = arith.addf %187, %29 : vector<40x40xf32>
    %cst_62 = arith.constant dense<0xFF800000> : vector<40xf32>
    %189 = vector.multi_reduction <maximumf>, %188, %cst_62 [1] : vector<40x40xf32> to vector<40xf32>
    %190 = vector.shape_cast %189 : vector<40xf32> to vector<40x1xf32>
    %191 = vector.broadcast %190 : vector<40x1xf32> to vector<40x40xf32>
    %192 = arith.subf %188, %191 : vector<40x40xf32>
    %193 = math.exp %192 : vector<40x40xf32>
    %cst_63 = arith.constant dense<0.000000e+00> : vector<40xf32>
    %194 = vector.multi_reduction <add>, %193, %cst_63 [1] : vector<40x40xf32> to vector<40xf32>
    %195 = vector.shape_cast %194 : vector<40xf32> to vector<40x1xf32>
    %196 = vector.broadcast %195 : vector<40x1xf32> to vector<40x40xf32>
    %197 = arith.divf %193, %196 : vector<40x40xf32>
    %198 = vector.extract_strided_slice %169 {offsets = [0, 8], sizes = [40, 8], strides = [1, 1]} : vector<40x32xf32> to vector<40x8xf32>
    %cst_64 = arith.constant dense<0.000000e+00> : vector<40x8xf32>
    %199 = tpu.matmul %197, %198, %cst_64 {dimension_numbers = #tpu.dot_dimension_numbers<[1], [0], [0], [1], [0, 0, 1, 1], [], []>} : vector<40x40xf32>, vector<40x8xf32>, vector<40x8xf32> -> vector<40x8xf32>
    %200 = vector.extract_strided_slice %167 {offsets = [0, 16], sizes = [40, 8], strides = [1, 1]} : vector<40x32xf32> to vector<40x8xf32>
    %201 = vector.extract_strided_slice %168 {offsets = [0, 16], sizes = [40, 8], strides = [1, 1]} : vector<40x32xf32> to vector<40x8xf32>
    "tpu.trace_start"() <{level = 10 : i32, message = "td,sd->ts"}> : () -> ()
    %cst_65 = arith.constant dense<0.000000e+00> : vector<40x40xf32>
    %202 = tpu.matmul %200, %201, %cst_65 {dimension_numbers = #tpu.dot_dimension_numbers<[1], [1], [0], [0], [0, 0, 1, 0], [], []>} : vector<40x8xf32>, vector<40x8xf32>, vector<40x40xf32> -> vector<40x40xf32>
    "tpu.trace_stop"() : () -> ()
    %203 = arith.addf %202, %29 : vector<40x40xf32>
    %cst_66 = arith.constant dense<0xFF800000> : vector<40xf32>
    %204 = vector.multi_reduction <maximumf>, %203, %cst_66 [1] : vector<40x40xf32> to vector<40xf32>
    %205 = vector.shape_cast %204 : vector<40xf32> to vector<40x1xf32>
    %206 = vector.broadcast %205 : vector<40x1xf32> to vector<40x40xf32>
    %207 = arith.subf %203, %206 : vector<40x40xf32>
    %208 = math.exp %207 : vector<40x40xf32>
    %cst_67 = arith.constant dense<0.000000e+00> : vector<40xf32>
    %209 = vector.multi_reduction <add>, %208, %cst_67 [1] : vector<40x40xf32> to vector<40xf32>
    %210 = vector.shape_cast %209 : vector<40xf32> to vector<40x1xf32>
    %211 = vector.broadcast %210 : vector<40x1xf32> to vector<40x40xf32>
    %212 = arith.divf %208, %211 : vector<40x40xf32>
    %213 = vector.extract_strided_slice %169 {offsets = [0, 16], sizes = [40, 8], strides = [1, 1]} : vector<40x32xf32> to vector<40x8xf32>
    %cst_68 = arith.constant dense<0.000000e+00> : vector<40x8xf32>
    %214 = tpu.matmul %212, %213, %cst_68 {dimension_numbers = #tpu.dot_dimension_numbers<[1], [0], [0], [1], [0, 0, 1, 1], [], []>} : vector<40x40xf32>, vector<40x8xf32>, vector<40x8xf32> -> vector<40x8xf32>
    %215 = vector.extract_strided_slice %167 {offsets = [0, 24], sizes = [40, 8], strides = [1, 1]} : vector<40x32xf32> to vector<40x8xf32>
    %216 = vector.extract_strided_slice %168 {offsets = [0, 24], sizes = [40, 8], strides = [1, 1]} : vector<40x32xf32> to vector<40x8xf32>
    "tpu.trace_start"() <{level = 10 : i32, message = "td,sd->ts"}> : () -> ()
    %cst_69 = arith.constant dense<0.000000e+00> : vector<40x40xf32>
    %217 = tpu.matmul %215, %216, %cst_69 {dimension_numbers = #tpu.dot_dimension_numbers<[1], [1], [0], [0], [0, 0, 1, 0], [], []>} : vector<40x8xf32>, vector<40x8xf32>, vector<40x40xf32> -> vector<40x40xf32>
    "tpu.trace_stop"() : () -> ()
    %218 = arith.addf %217, %29 : vector<40x40xf32>
    %cst_70 = arith.constant dense<0xFF800000> : vector<40xf32>
    %219 = vector.multi_reduction <maximumf>, %218, %cst_70 [1] : vector<40x40xf32> to vector<40xf32>
    %220 = vector.shape_cast %219 : vector<40xf32> to vector<40x1xf32>
    %221 = vector.broadcast %220 : vector<40x1xf32> to vector<40x40xf32>
    %222 = arith.subf %218, %221 : vector<40x40xf32>
    %223 = math.exp %222 : vector<40x40xf32>
    %cst_71 = arith.constant dense<0.000000e+00> : vector<40xf32>
    %224 = vector.multi_reduction <add>, %223, %cst_71 [1] : vector<40x40xf32> to vector<40xf32>
    %225 = vector.shape_cast %224 : vector<40xf32> to vector<40x1xf32>
    %226 = vector.broadcast %225 : vector<40x1xf32> to vector<40x40xf32>
    %227 = arith.divf %223, %226 : vector<40x40xf32>
    %228 = vector.extract_strided_slice %169 {offsets = [0, 24], sizes = [40, 8], strides = [1, 1]} : vector<40x32xf32> to vector<40x8xf32>
    %cst_72 = arith.constant dense<0.000000e+00> : vector<40x8xf32>
    %229 = tpu.matmul %227, %228, %cst_72 {dimension_numbers = #tpu.dot_dimension_numbers<[1], [0], [0], [1], [0, 0, 1, 1], [], []>} : vector<40x40xf32>, vector<40x8xf32>, vector<40x8xf32> -> vector<40x8xf32>
    %230 = tpu.concatenate %184, %199, %214, %229 in 1 : vector<40x8xf32>, vector<40x8xf32>, vector<40x8xf32>, vector<40x8xf32> -> vector<40x32xf32>
    %c312 = arith.constant 312 : index
    %c0_73 = arith.constant 0 : index
    %231 = vector.load %arg3[%c312, %c0_73] : memref<680x128xf32, #tpu.memory_space<vmem>>, vector<32x32xf32>
    %cst_74 = arith.constant dense<0.000000e+00> : vector<40x32xf32>
    %232 = tpu.matmul %230, %231, %cst_74 {dimension_numbers = #tpu.dot_dimension_numbers<[1], [0], [0], [1], [0, 0, 1, 1], [], []>} : vector<40x32xf32>, vector<32x32xf32>, vector<40x32xf32> -> vector<40x32xf32>
    %c344 = arith.constant 344 : index
    %c0_75 = arith.constant 0 : index
    %233 = vector.load %arg3[%c344, %c0_75] : memref<680x128xf32, #tpu.memory_space<vmem>>, vector<1x32xf32>
    %234 = vector.broadcast %233 : vector<1x32xf32> to vector<40x32xf32>
    %235 = arith.addf %232, %234 : vector<40x32xf32>
    %236 = arith.addf %161, %235 : vector<40x32xf32>
    %c464 = arith.constant 464 : index
    %c0_76 = arith.constant 0 : index
    %237 = vector.load %arg3[%c464, %c0_76] : memref<680x128xf32, #tpu.memory_space<vmem>>, vector<1x32xf32>
    %c472 = arith.constant 472 : index
    %c0_77 = arith.constant 0 : index
    %238 = vector.load %arg3[%c472, %c0_77] : memref<680x128xf32, #tpu.memory_space<vmem>>, vector<1x32xf32>
    %cst_78 = arith.constant dense<0.000000e+00> : vector<40xf32>
    %239 = vector.multi_reduction <add>, %236, %cst_78 [1] : vector<40x32xf32> to vector<40xf32>
    %240 = vector.shape_cast %239 : vector<40xf32> to vector<40x1xf32>
    %cst_79 = arith.constant 3.200000e+01 : f32
    %241 = vector.broadcast %cst_79 : f32 to vector<40x1xf32>
    %242 = arith.divf %240, %241 : vector<40x1xf32>
    %243 = vector.broadcast %242 : vector<40x1xf32> to vector<40x32xf32>
    %244 = arith.subf %236, %243 : vector<40x32xf32>
    %245 = arith.mulf %244, %244 : vector<40x32xf32>
    %cst_80 = arith.constant dense<0.000000e+00> : vector<40xf32>
    %246 = vector.multi_reduction <add>, %245, %cst_80 [1] : vector<40x32xf32> to vector<40xf32>
    %247 = vector.shape_cast %246 : vector<40xf32> to vector<40x1xf32>
    %cst_81 = arith.constant 3.200000e+01 : f32
    %248 = vector.broadcast %cst_81 : f32 to vector<40x1xf32>
    %249 = arith.divf %247, %248 : vector<40x1xf32>
    %cst_82 = arith.constant 9.99999974E-6 : f32
    %250 = vector.broadcast %cst_82 : f32 to vector<40x1xf32>
    %251 = arith.addf %249, %250 : vector<40x1xf32>
    %252 = math.rsqrt %251 : vector<40x1xf32>
    %253 = vector.broadcast %252 : vector<40x1xf32> to vector<40x32xf32>
    %254 = arith.mulf %244, %253 : vector<40x32xf32>
    %255 = vector.broadcast %237 : vector<1x32xf32> to vector<40x32xf32>
    %256 = arith.mulf %254, %255 : vector<40x32xf32>
    %257 = vector.broadcast %238 : vector<1x32xf32> to vector<40x32xf32>
    %258 = arith.addf %256, %257 : vector<40x32xf32>
    %c352 = arith.constant 352 : index
    %c0_83 = arith.constant 0 : index
    %259 = vector.load %arg3[%c352, %c0_83] : memref<680x128xf32, #tpu.memory_space<vmem>>, vector<32x64xf32>
    %cst_84 = arith.constant dense<0.000000e+00> : vector<40x64xf32>
    %260 = tpu.matmul %258, %259, %cst_84 {dimension_numbers = #tpu.dot_dimension_numbers<[1], [0], [0], [1], [0, 0, 1, 1], [], []>} : vector<40x32xf32>, vector<32x64xf32>, vector<40x64xf32> -> vector<40x64xf32>
    %c384 = arith.constant 384 : index
    %c0_85 = arith.constant 0 : index
    %261 = vector.load %arg3[%c384, %c0_85] : memref<680x128xf32, #tpu.memory_space<vmem>>, vector<1x64xf32>
    %262 = vector.broadcast %261 : vector<1x64xf32> to vector<40x64xf32>
    %263 = arith.addf %260, %262 : vector<40x64xf32>
    %cst_86 = arith.constant 0.000000e+00 : f32
    %264 = vector.broadcast %cst_86 : f32 to vector<40x64xf32>
    %265 = arith.maximumf %263, %264 : vector<40x64xf32>
    %c392 = arith.constant 392 : index
    %c0_87 = arith.constant 0 : index
    %266 = vector.load %arg3[%c392, %c0_87] : memref<680x128xf32, #tpu.memory_space<vmem>>, vector<64x32xf32>
    %cst_88 = arith.constant dense<0.000000e+00> : vector<40x32xf32>
    %267 = tpu.matmul %265, %266, %cst_88 {dimension_numbers = #tpu.dot_dimension_numbers<[1], [0], [0], [1], [0, 0, 1, 1], [], []>} : vector<40x64xf32>, vector<64x32xf32>, vector<40x32xf32> -> vector<40x32xf32>
    %c456 = arith.constant 456 : index
    %c0_89 = arith.constant 0 : index
    %268 = vector.load %arg3[%c456, %c0_89] : memref<680x128xf32, #tpu.memory_space<vmem>>, vector<1x32xf32>
    %269 = vector.broadcast %268 : vector<1x32xf32> to vector<40x32xf32>
    %270 = arith.addf %267, %269 : vector<40x32xf32>
    %271 = arith.addf %258, %270 : vector<40x32xf32>
    %c480 = arith.constant 480 : index
    %c0_90 = arith.constant 0 : index
    %272 = vector.load %arg3[%c480, %c0_90] : memref<680x128xf32, #tpu.memory_space<vmem>>, vector<1x32xf32>
    %c488 = arith.constant 488 : index
    %c0_91 = arith.constant 0 : index
    %273 = vector.load %arg3[%c488, %c0_91] : memref<680x128xf32, #tpu.memory_space<vmem>>, vector<1x32xf32>
    %cst_92 = arith.constant dense<0.000000e+00> : vector<40xf32>
    %274 = vector.multi_reduction <add>, %271, %cst_92 [1] : vector<40x32xf32> to vector<40xf32>
    %275 = vector.shape_cast %274 : vector<40xf32> to vector<40x1xf32>
    %cst_93 = arith.constant 3.200000e+01 : f32
    %276 = vector.broadcast %cst_93 : f32 to vector<40x1xf32>
    %277 = arith.divf %275, %276 : vector<40x1xf32>
    %278 = vector.broadcast %277 : vector<40x1xf32> to vector<40x32xf32>
    %279 = arith.subf %271, %278 : vector<40x32xf32>
    %280 = arith.mulf %279, %279 : vector<40x32xf32>
    %cst_94 = arith.constant dense<0.000000e+00> : vector<40xf32>
    %281 = vector.multi_reduction <add>, %280, %cst_94 [1] : vector<40x32xf32> to vector<40xf32>
    %282 = vector.shape_cast %281 : vector<40xf32> to vector<40x1xf32>
    %cst_95 = arith.constant 3.200000e+01 : f32
    %283 = vector.broadcast %cst_95 : f32 to vector<40x1xf32>
    %284 = arith.divf %282, %283 : vector<40x1xf32>
    %cst_96 = arith.constant 9.99999974E-6 : f32
    %285 = vector.broadcast %cst_96 : f32 to vector<40x1xf32>
    %286 = arith.addf %284, %285 : vector<40x1xf32>
    %287 = math.rsqrt %286 : vector<40x1xf32>
    %288 = vector.broadcast %287 : vector<40x1xf32> to vector<40x32xf32>
    %289 = arith.mulf %279, %288 : vector<40x32xf32>
    %290 = vector.broadcast %272 : vector<1x32xf32> to vector<40x32xf32>
    %291 = arith.mulf %289, %290 : vector<40x32xf32>
    %292 = vector.broadcast %273 : vector<1x32xf32> to vector<40x32xf32>
    %293 = arith.addf %291, %292 : vector<40x32xf32>
    %c496 = arith.constant 496 : index
    %c0_97 = arith.constant 0 : index
    %294 = vector.load %arg3[%c496, %c0_97] : memref<680x128xf32, #tpu.memory_space<vmem>>, vector<1x32xf32>
    %c504 = arith.constant 504 : index
    %c0_98 = arith.constant 0 : index
    %295 = vector.load %arg3[%c504, %c0_98] : memref<680x128xf32, #tpu.memory_space<vmem>>, vector<1x32xf32>
    %cst_99 = arith.constant dense<0.000000e+00> : vector<40xf32>
    %296 = vector.multi_reduction <add>, %293, %cst_99 [1] : vector<40x32xf32> to vector<40xf32>
    %297 = vector.shape_cast %296 : vector<40xf32> to vector<40x1xf32>
    %cst_100 = arith.constant 3.200000e+01 : f32
    %298 = vector.broadcast %cst_100 : f32 to vector<40x1xf32>
    %299 = arith.divf %297, %298 : vector<40x1xf32>
    %300 = vector.broadcast %299 : vector<40x1xf32> to vector<40x32xf32>
    %301 = arith.subf %293, %300 : vector<40x32xf32>
    %302 = arith.mulf %301, %301 : vector<40x32xf32>
    %cst_101 = arith.constant dense<0.000000e+00> : vector<40xf32>
    %303 = vector.multi_reduction <add>, %302, %cst_101 [1] : vector<40x32xf32> to vector<40xf32>
    %304 = vector.shape_cast %303 : vector<40xf32> to vector<40x1xf32>
    %cst_102 = arith.constant 3.200000e+01 : f32
    %305 = vector.broadcast %cst_102 : f32 to vector<40x1xf32>
    %306 = arith.divf %304, %305 : vector<40x1xf32>
    %cst_103 = arith.constant 9.99999974E-6 : f32
    %307 = vector.broadcast %cst_103 : f32 to vector<40x1xf32>
    %308 = arith.addf %306, %307 : vector<40x1xf32>
    %309 = math.rsqrt %308 : vector<40x1xf32>
    %310 = vector.broadcast %309 : vector<40x1xf32> to vector<40x32xf32>
    %311 = arith.mulf %301, %310 : vector<40x32xf32>
    %312 = vector.broadcast %294 : vector<1x32xf32> to vector<40x32xf32>
    %313 = arith.mulf %311, %312 : vector<40x32xf32>
    %314 = vector.broadcast %295 : vector<1x32xf32> to vector<40x32xf32>
    %315 = arith.addf %313, %314 : vector<40x32xf32>
    %cst_104 = arith.constant 0.000000e+00 : f32
    %316 = vector.broadcast %cst_104 : f32 to vector<8x8xf32>
    %317 = vector.extract_strided_slice %315 {offsets = [0, 0], sizes = [8, 32], strides = [1, 1]} : vector<40x32xf32> to vector<8x32xf32>
    %c512 = arith.constant 512 : index
    %c0_105 = arith.constant 0 : index
    %318 = vector.load %arg3[%c512, %c0_105] : memref<680x128xf32, #tpu.memory_space<vmem>>, vector<32x8xf32>
    %cst_106 = arith.constant dense<0.000000e+00> : vector<8x8xf32>
    %319 = tpu.matmul %317, %318, %cst_106 {dimension_numbers = #tpu.dot_dimension_numbers<[1], [0], [0], [1], [0, 0, 1, 1], [], []>} : vector<8x32xf32>, vector<32x8xf32>, vector<8x8xf32> -> vector<8x8xf32>
    %320 = arith.addf %316, %319 : vector<8x8xf32>
    %321 = vector.extract_strided_slice %315 {offsets = [8, 0], sizes = [8, 32], strides = [1, 1]} : vector<40x32xf32> to vector<8x32xf32>
    %c544 = arith.constant 544 : index
    %c0_107 = arith.constant 0 : index
    %322 = vector.load %arg3[%c544, %c0_107] : memref<680x128xf32, #tpu.memory_space<vmem>>, vector<32x8xf32>
    %cst_108 = arith.constant dense<0.000000e+00> : vector<8x8xf32>
    %323 = tpu.matmul %321, %322, %cst_108 {dimension_numbers = #tpu.dot_dimension_numbers<[1], [0], [0], [1], [0, 0, 1, 1], [], []>} : vector<8x32xf32>, vector<32x8xf32>, vector<8x8xf32> -> vector<8x8xf32>
    %324 = arith.addf %320, %323 : vector<8x8xf32>
    %325 = vector.extract_strided_slice %315 {offsets = [16, 0], sizes = [8, 32], strides = [1, 1]} : vector<40x32xf32> to vector<8x32xf32>
    %c576 = arith.constant 576 : index
    %c0_109 = arith.constant 0 : index
    %326 = vector.load %arg3[%c576, %c0_109] : memref<680x128xf32, #tpu.memory_space<vmem>>, vector<32x8xf32>
    %cst_110 = arith.constant dense<0.000000e+00> : vector<8x8xf32>
    %327 = tpu.matmul %325, %326, %cst_110 {dimension_numbers = #tpu.dot_dimension_numbers<[1], [0], [0], [1], [0, 0, 1, 1], [], []>} : vector<8x32xf32>, vector<32x8xf32>, vector<8x8xf32> -> vector<8x8xf32>
    %328 = arith.addf %324, %327 : vector<8x8xf32>
    %329 = vector.extract_strided_slice %315 {offsets = [24, 0], sizes = [8, 32], strides = [1, 1]} : vector<40x32xf32> to vector<8x32xf32>
    %c608 = arith.constant 608 : index
    %c0_111 = arith.constant 0 : index
    %330 = vector.load %arg3[%c608, %c0_111] : memref<680x128xf32, #tpu.memory_space<vmem>>, vector<32x8xf32>
    %cst_112 = arith.constant dense<0.000000e+00> : vector<8x8xf32>
    %331 = tpu.matmul %329, %330, %cst_112 {dimension_numbers = #tpu.dot_dimension_numbers<[1], [0], [0], [1], [0, 0, 1, 1], [], []>} : vector<8x32xf32>, vector<32x8xf32>, vector<8x8xf32> -> vector<8x8xf32>
    %332 = arith.addf %328, %331 : vector<8x8xf32>
    %333 = vector.extract_strided_slice %315 {offsets = [32, 0], sizes = [8, 32], strides = [1, 1]} : vector<40x32xf32> to vector<8x32xf32>
    %c640 = arith.constant 640 : index
    %c0_113 = arith.constant 0 : index
    %334 = vector.load %arg3[%c640, %c0_113] : memref<680x128xf32, #tpu.memory_space<vmem>>, vector<32x8xf32>
    %cst_114 = arith.constant dense<0.000000e+00> : vector<8x8xf32>
    %335 = tpu.matmul %333, %334, %cst_114 {dimension_numbers = #tpu.dot_dimension_numbers<[1], [0], [0], [1], [0, 0, 1, 1], [], []>} : vector<8x32xf32>, vector<32x8xf32>, vector<8x8xf32> -> vector<8x8xf32>
    %336 = arith.addf %332, %335 : vector<8x8xf32>
    %c672 = arith.constant 672 : index
    %c0_115 = arith.constant 0 : index
    %337 = vector.load %arg3[%c672, %c0_115] : memref<680x128xf32, #tpu.memory_space<vmem>>, vector<1x8xf32>
    %338 = vector.broadcast %337 : vector<1x8xf32> to vector<8x8xf32>
    %339 = arith.addf %336, %338 : vector<8x8xf32>
    %340 = vector.broadcast %14 : vector<8x1xf32> to vector<8x8xf32>
    %341 = arith.mulf %339, %340 : vector<8x8xf32>
    %342 = vector.broadcast %4 : vector<8x1xf32> to vector<8x8xf32>
    %343 = arith.addf %341, %342 : vector<8x8xf32>
    %c0_116 = arith.constant 0 : index
    %c0_117 = arith.constant 0 : index
    %344 = vector.load %arg4[%c0_116, %c0_117] : memref<8x8xf32, #tpu.memory_space<vmem>>, vector<8x8xf32>
    tpu.vector_store %arg4[%c0_116, %c0_117], %343 {strides = array<i32>} : memref<8x8xf32, #tpu.memory_space<vmem>>, vector<8x8xf32>,
    return
  }
  func.func @transform_0(%arg0: i32) -> (i32, i32) {
    %c0_i32 = arith.constant 0 : i32
    %c0_i32_0 = arith.constant 0 : i32
    %c0_i32_1 = arith.constant 0 : i32
    return %c0_i32, %c0_i32_0 : i32, i32
  }
  func.func @transform_1(%arg0: i32) -> (i32, i32) {
    %c0_i32 = arith.constant 0 : i32
    %c0_i32_0 = arith.constant 0 : i32
    %c0_i32_1 = arith.constant 0 : i32
    return %c0_i32, %c0_i32_0 : i32, i32
  }
  func.func @transform_2(%arg0: i32) -> (i32, i32) {
    %c0_i32 = arith.constant 0 : i32
    %c0_i32_0 = arith.constant 0 : i32
    %c0_i32_1 = arith.constant 0 : i32
    return %c0_i32, %c0_i32_0 : i32, i32
  }
  func.func @transform_3(%arg0: i32) -> (i32, i32) {
    %c0_i32 = arith.constant 0 : i32
    %c0_i32_0 = arith.constant 0 : i32
    %c0_i32_1 = arith.constant 0 : i32
    return %c0_i32, %c0_i32_0 : i32, i32
  }
}

</mosaic_0001>

<bundles_post_ra>
// kernel: _lambda_.1
= control target key start
LH: loop header
LB: loop body
LE: loop exit
PB: predicated region body
PF: predicated region fallthrough
CT: control target
= control target key end

     0   :  { %vm16_vm0 = vcmask 261120   ;;  %s7910_s0 = inlined_call_operand.vmem [shape: f32[8,32], index: 0, kind: input, shape index: {}]   ;;  %s7911_s1 = inlined_call_operand.vmem [shape: f32[40,40], index: 1, kind: input, shape index: {}]   ;;  %s7912_s2 = inlined_call_operand.vmem [shape: f32[680,128], index: 2, kind: input, shape index: {}]   ;;  %s7913_s3 = inlined_call_operand.hbm [shape: f32[8,8], index: 3, kind: output, shape index: {}]  }
   0x1   :  { %v15_v0 = vld [vmem:[%s7910_s0] sm:$0xff] }
   0x2   :  { %8 = vsyncpa [#allocation3], 0  ;;  %v17_v1 = vsel %vm16_vm0, %v15_v0, 0.0  ;;  %v48_v7 = vld [vmem:[%s7912_s2] sm:$0xff]  ;;  %v5922_v8 = vmov 0.0   ;;  %vm5923_vm1 = vmmov 0  }
   0x3   :  { %18 = vadd.xlane.f32.xlu0 %v17_v1  ;;  %4990 = vmatprep.subr.mxu0 %v5922_v8  ;;  %v5924_v9 = vmov 31   ;;  %vm54_vm4 = vcmask 64512   ;;  %v163_v20 = vld [vmem:[%s7912_s2 + $0x48] sm:$0xff]  ;;  %s5925_s17 = smov 120   ;;  %v162_v21 = vld [vmem:[%s7912_s2 + $0x40] sm:$0xff]  ;;  %s5926_s20 = smov 112  }
   0x4   :  { %4992 = vmatprep.mubr.msk.f32.mxu0 %vm5923_vm1, %v5922_v8  ;;  %4991 = vmatpush3.msra.mxu0 %v48_v7  ;;  %s5927_s21 = smov 104   ;;  %v161_v22 = vld [vmem:[%s7912_s2 + $0x38] sm:$0xff]  ;;  %v160_v23 = vld [vmem:[%s7912_s2 + $0x30] sm:$0xff]  ;;  %v49_v28 = vld [vmem:[%s7912_s2 + $0x8] sm:$0xff]  ;;  %s5928_s11 = smov 96   ;;  %vm399_vm5 = vcmask 326656  }
   0x5   :  { %5680 = vset.pattern.permute.xlu0 %v5924_v9  ;;  %5007 = vmatprep.subr.mxu1 %v5922_v8  ;;  %v50_v32 = vld [vmem:[%s7912_s2 + $0x10] sm:$0xff]  ;;  %v51_v36 = vld [vmem:[%s7912_s2 + $0x18] sm:$0xff]  ;;  %v52_v40 = vld [vmem:[%s7912_s2 + $0x20] sm:$0xff]  ;;  %s5929_s12 = smov 88   ;;  %s5930_s13 = smov 64   ;;  %vm1555_vm6 = vcmask 130048  }
   0x6   :  { %5015 = vmatprep.mubr.msk.f32.mxu1 %vm5923_vm1, %v5922_v8  ;;  %5030 = vmatprep.subr.mxu0 %v5922_v8  ;;  %v53_v44 = vld [vmem:[%s7912_s2 + $0x28] sm:$0xff]  ;;  %v4535_v48 = vld [vmem:[%s7912_s2 + $0x50] ss:$0 sm:$0xff]  ;;  %s5931_s14 = smov 80   ;;  %s5932_s15 = smov 56   ;;  %vm1561_vm7 = vcmask 195584  }
   0x7   :  { %5008 = vmatpush3.msra.mxu1 %v163_v20  ;;  %s5933_s0 = smov 48   ;;  %s5934_s16 = smov 72   ;;  %vm1903_vm8 = vcmask 523264  }
   0x8   :  { %5009 = vmatprep.subr.mxu1 %v5922_v8  ;;  %s5935_s30 = smov 40   ;;  %s5936_s4 = smov 8  }
   0x9   :  { %5010 = vmatpush3.msra.mxu1 %v162_v21  ;;  %s5937_s7 = smov 16   ;;  %s5938_s23 = smov 24  }
   0xa   :  { %5011 = vmatprep.subr.mxu1 %v5922_v8  ;;  %s5939_s9 = smov [#allocation2]  }
   0xb   :  { %5012 = vmatpush3.msra.mxu1 %v161_v22  ;;  %s4522_s10 = sshll.u32 %s5939_s9, 4  ;;  %s4523_s10 = int_to_ptr.vmem [resolvable:$true] %s4522_s10 }
   0xc   :  { %5013 = vmatprep.subr.mxu1 %v5922_v8  ;;  %s5900_s18 = scalar_lea.vmem %s4523_s10, 128  ;;  %p5905_p1 = scmp.lt.s32.totalorder %s4523_s10, %s4523_s10 }
   0xd   :  { %5014 = vmatpush3.msra.mxu1 %v160_v23  ;;  %p5901_p0 = scmp.ne.s32.totalorder %s4523_s10, %s5900_s18  ;;  %p5906_p2 = scmp.lt.s32.totalorder %s5900_s18, %s5900_s18 }
   0xe   :  { %5055 = vmatprep.subr.mxu1 %v5922_v8 }
   0xf   :  { %p5907_p3 = por %p5906_p2, %p5905_p1 }
  0x11   :  { %p5908_p4 = pnand %p5907_p3, %p5901_p0 }
  0x8c   :  { %v19_v2 = vpop.xlane.xlu0 %18 }
  0x8d   :  { %v5964_v3 = vmul.f32 0.03125, %v19_v2 }
  0x8f   :  { %v22_v4 = vsub.f32 %v15_v0, %v5964_v3 }
  0x91   :  { %v23_v5 = vmul.f32 %v22_v4, %v22_v4 }
  0x93   :  { %v24_v6 = vsel %vm16_vm0, %v23_v5, 0.0 }
  0x94   :  { %25 = vadd.xlane.f32.xlu0 %v24_v6 }
 0x11d   :  { %v26_v10 = vpop.xlane.xlu0 %25 }
 0x11e   :  { %v27_v11 = vmul.f32 0.03125, %v26_v10 }
 0x120   :  { %v28_v12 = vadd.f32 1e-05, %v27_v11 }
 0x122   :  { %5681 = vrsqrt.f32 %v28_v12  ;;  %vm31_vm2 = vcmp.eq.f32.partialorder %v28_v12, inf  ;;  %v34_v15 = vand.u32 2147483648, %v28_v12  ;;  %vm33_vm3 = vcmp.eq.f32.partialorder %v28_v12, 0.0 }
 0x12f   :  { %v5682_v13 = vpop.eup %5681 }
 0x130   :  { %v30_v14 = vmul.f32 %v5682_v13, %v28_v12 }
 0x132   :  { %v32_v16 = vsel %vm31_vm2, %v28_v12, %v30_v14 }
 0x133   :  { %v5978_v17 = vsel %vm33_vm3, %v34_v15, %v32_v16 }
 0x134   :  { %5683 = vrcp.f32 %v5978_v17 }
 0x141   :  { %v5684_v18 = vpop.eup %5683 }
 0x142   :  { %v37_v19 = vmul.f32 %v5684_v18, %v22_v4 }
 0x144   :  { %40 = vperm.xlu0 %5680, %v37_v19   ;;  %42 = vrot.lane.b32.xlu1 %v37_v19, %s5925_s17 }
 0x145   :  { %4993 = vmatmul.mubr.msk.f32.vlgmr.msra.gmra.mxu0 %vm54_vm4, %v37_v19 }
 0x146   :  { %4995 = vmatprep.mubr.msk.f32.mxu0 %vm5923_vm1, %v5922_v8 }
 0x148   :  { %44 = vrot.lane.b32.xlu1 %v37_v19, %s5926_s20 }
 0x14c   :  { %46 = vrot.lane.b32.xlu1 %v37_v19, %s5927_s21 }
 0x1b6   :  { %v43_v24 = vpop.permute.xlu1 %42 }
 0x1b7   :  { %4996 = vmatmul.mubr.msk.f32.gmra.mxu0 %vm54_vm4, %v43_v24 }
 0x1b8   :  { %4998 = vmatprep.mubr.msk.f32.mxu0 %vm5923_vm1, %v5922_v8 }
 0x1ba   :  { %v45_v25 = vpop.permute.xlu1 %44 }
 0x1bb   :  { %4999 = vmatmul.mubr.msk.f32.gmra.mxu0 %vm54_vm4, %v45_v25 }
 0x1bc   :  { %5001 = vmatprep.mubr.msk.f32.mxu0 %vm5923_vm1, %v5922_v8 }
 0x1be   :  { %v47_v26 = vpop.permute.xlu1 %46 }
 0x1bf   :  { %5002 = vmatmul.mubr.msk.f32.gmra.mxu0 %vm54_vm4, %v47_v26  ;;  %v41_v27 = vpop.permute.xlu0 %40 }
 0x1c0   :  { %5004 = vmatprep.mubr.msk.f32.mxu0 %vm5923_vm1, %v5922_v8 }
 0x1c3   :  { %5005 = vmatmul.mubr.msk.f32.gmra.mxu0 %vm54_vm4, %v41_v27 }
 0x1c4   :  { %5040 = vmatprep.mubr.msk.f32.mxu0 %vm5923_vm1, %v5922_v8 }
 0x205   :  { %v131_v29 = vpop.f32.mrf.mxu0 }
 0x206   :  { %v6018_v30 = vadd.f32 %v131_v29, %v49_v28 }
 0x207   :  { %v4994_v31 = vpop.f32.mrf.mxu0 }
 0x208   :  { %5016 = vmatmul.mubr.msk.f32.vlgmr.msra.gmra.mxu1 %vm16_vm0, %v6018_v30 }
 0x209   :  { %5018 = vmatprep.mubr.msk.f32.mxu1 %vm5923_vm1, %v5922_v8 }
 0x277   :  { %v136_v33 = vpop.f32.mrf.mxu0 }
 0x278   :  { %v6027_v34 = vadd.f32 %v136_v33, %v50_v32 }
 0x279   :  { %v4997_v35 = vpop.f32.mrf.mxu0 }
 0x27a   :  { %5019 = vmatmul.mubr.msk.f32.gmra.mxu1 %vm16_vm0, %v6027_v34 }
 0x27b   :  { %v141_v37 = vpop.f32.mrf.mxu0  ;;  %5021 = vmatprep.mubr.msk.f32.mxu1 %vm5923_vm1, %v5922_v8 }
 0x27c   :  { %v6036_v38 = vadd.f32 %v141_v37, %v51_v36 }
 0x27d   :  { %v5000_v39 = vpop.f32.mrf.mxu0 }
 0x27e   :  { %5022 = vmatmul.mubr.msk.f32.gmra.mxu1 %vm16_vm0, %v6036_v38 }
 0x27f   :  { %v146_v41 = vpop.f32.mrf.mxu0  ;;  %5024 = vmatprep.mubr.msk.f32.mxu1 %vm5923_vm1, %v5922_v8 }
 0x280   :  { %v6045_v42 = vadd.f32 %v146_v41, %v52_v40 }
 0x281   :  { %v5003_v43 = vpop.f32.mrf.mxu0 }
 0x282   :  { %5025 = vmatmul.mubr.msk.f32.gmra.mxu1 %vm16_vm0, %v6045_v42 }
 0x283   :  { %v151_v45 = vpop.f32.mrf.mxu0  ;;  %5027 = vmatprep.mubr.msk.f32.mxu1 %vm5923_vm1, %v5922_v8 }
 0x284   :  { %v6054_v46 = vadd.f32 %v151_v45, %v53_v44 }
 0x285   :  { %v5006_v47 = vpop.f32.mrf.mxu0 }
 0x286   :  { %5028 = vmatmul.mubr.msk.f32.gmra.mxu1 %vm16_vm0, %v6054_v46 }
 0x287   :  { %5065 = vmatprep.mubr.msk.f32.mxu1 %vm5923_vm1, %v5922_v8 }
 0x2c8   :  { %v250_v49 = vpop.f32.mrf.mxu1 }
 0x2c9   :  { %v6063_v50 = vadd.f32 %v4535_v48, %v250_v49 }
 0x2ca   :  { %v5017_v51 = vpop.f32.mrf.mxu1 }
 0x2cb   :  { %575 = vrot.lane.b32.xlu0 %v6063_v50, %s5925_s17  ;;  %v6288_v51 = vld [vmem:[%s7911_s1] sm:$0xff] }
 0x33a   :  { %v255_v52 = vpop.f32.mrf.mxu1 }
 0x33b   :  { %v6067_v53 = vadd.f32 %v4535_v48, %v255_v52 }
 0x33c   :  { %v5020_v54 = vpop.f32.mrf.mxu1 }
 0x33d   :  { %577 = vrot.lane.b32.xlu0 %v6067_v53, %s5925_s17  ;;  %v576_v6 = vpop.permute.xlu0 %575 }
 0x33e   :  { %v260_v55 = vpop.f32.mrf.mxu1 }
 0x33f   :  { %v6071_v56 = vadd.f32 %v4535_v48, %v260_v55 }
 0x340   :  { %v5023_v57 = vpop.f32.mrf.mxu1 }
 0x341   :  { %579 = vrot.lane.b32.xlu0 %v6071_v56, %s5925_s17  ;;  %v6296_v57 = vld [vmem:[%s7911_s1 + $0x8] sm:$0xff] }
 0x342   :  { %v265_v58 = vpop.f32.mrf.mxu1 }
 0x343   :  { %v6075_v59 = vadd.f32 %v4535_v48, %v265_v58 }
 0x344   :  { %v5026_v60 = vpop.f32.mrf.mxu1 }
 0x345   :  { %581 = vrot.lane.b32.xlu0 %v6075_v59, %s5925_s17 }
 0x346   :  { %v270_v61 = vpop.f32.mrf.mxu1 }
 0x347   :  { %v6079_v62 = vadd.f32 %v4535_v48, %v270_v61 }
 0x348   :  { %v5029_v63 = vpop.f32.mrf.mxu1 }
 0x349   :  { %583 = vrot.lane.b32.xlu0 %v6079_v62, %s5925_s17  ;;  %287 = vrot.lane.b32.xlu1 %v6079_v62, %s5928_s11 }
 0x34d   :  { %880 = vrot.lane.b32.xlu0 %v6063_v50, %s5926_s20  ;;  %285 = vrot.lane.b32.xlu1 %v6075_v59, %s5928_s11 }
 0x351   :  { %882 = vrot.lane.b32.xlu0 %v6067_v53, %s5926_s20  ;;  %283 = vrot.lane.b32.xlu1 %v6071_v56, %s5928_s11 }
 0x355   :  { %884 = vrot.lane.b32.xlu0 %v6071_v56, %s5926_s20  ;;  %281 = vrot.lane.b32.xlu1 %v6067_v53, %s5928_s11 }
 0x359   :  { %886 = vrot.lane.b32.xlu0 %v6075_v59, %s5926_s20  ;;  %279 = vrot.lane.b32.xlu1 %v6063_v50, %s5928_s11 }
 0x35d   :  { %888 = vrot.lane.b32.xlu0 %v6079_v62, %s5926_s20  ;;  %593 = vrot.lane.b32.xlu1 %v6079_v62, %s5929_s12 }
 0x361   :  { %1185 = vrot.lane.b32.xlu0 %v6063_v50, %s5927_s21  ;;  %591 = vrot.lane.b32.xlu1 %v6075_v59, %s5929_s12 }
 0x365   :  { %1189 = vrot.lane.b32.xlu0 %v6071_v56, %s5927_s21  ;;  %589 = vrot.lane.b32.xlu1 %v6071_v56, %s5929_s12 }
 0x369   :  { %1193 = vrot.lane.b32.xlu0 %v6079_v62, %s5927_s21  ;;  %587 = vrot.lane.b32.xlu1 %v6067_v53, %s5929_s12 }
 0x36d   :  { %461 = vrot.lane.b32.xlu0 %v6075_v59, %s5930_s13  ;;  %585 = vrot.lane.b32.xlu1 %v6063_v50, %s5929_s12 }
 0x371   :  { %457 = vrot.lane.b32.xlu0 %v6067_v53, %s5930_s13  ;;  %898 = vrot.lane.b32.xlu1 %v6079_v62, %s5931_s14 }
 0x375   :  { %455 = vrot.lane.b32.xlu0 %v6063_v50, %s5930_s13  ;;  %896 = vrot.lane.b32.xlu1 %v6075_v59, %s5931_s14 }
 0x379   :  { %766 = vrot.lane.b32.xlu0 %v6075_v59, %s5932_s15  ;;  %894 = vrot.lane.b32.xlu1 %v6071_v56, %s5931_s14 }
 0x37d   :  { %762 = vrot.lane.b32.xlu0 %v6067_v53, %s5932_s15  ;;  %892 = vrot.lane.b32.xlu1 %v6067_v53, %s5931_s14 }
 0x381   :  { %760 = vrot.lane.b32.xlu0 %v6063_v50, %s5932_s15  ;;  %890 = vrot.lane.b32.xlu1 %v6063_v50, %s5931_s14 }
 0x385   :  { %1071 = vrot.lane.b32.xlu0 %v6075_v59, %s5933_s0  ;;  %1203 = vrot.lane.b32.xlu1 %v6079_v62, %s5934_s16 }
 0x389   :  { %1067 = vrot.lane.b32.xlu0 %v6067_v53, %s5933_s0  ;;  %1201 = vrot.lane.b32.xlu1 %v6075_v59, %s5934_s16 }
 0x38d   :  { %1199 = vrot.lane.b32.xlu1 %v6071_v56, %s5934_s16 }
 0x391   :  { %1197 = vrot.lane.b32.xlu1 %v6067_v53, %s5934_s16 }
 0x395   :  { %1195 = vrot.lane.b32.xlu1 %v6063_v50, %s5934_s16 }
 0x399   :  { %1187 = vrot.lane.b32.xlu1 %v6067_v53, %s5927_s21 }
 0x39d   :  { %1191 = vrot.lane.b32.xlu1 %v6075_v59, %s5927_s21 }
 0x3a1   :  { %459 = vrot.lane.b32.xlu1 %v6071_v56, %s5930_s13 }
 0x3a5   :  { %764 = vrot.lane.b32.xlu1 %v6071_v56, %s5932_s15 }
 0x3a9   :  { %1069 = vrot.lane.b32.xlu1 %v6071_v56, %s5933_s0 }
 0x3ad   :  { %463 = vrot.lane.b32.xlu1 %v6079_v62, %s5930_s13 }
 0x3af   :  { %v578_v9 = vpop.permute.xlu0 %577 }
 0x3b1   :  { %768 = vrot.lane.b32.xlu1 %v6079_v62, %s5932_s15 }
 0x3b3   :  { %v580_v12 = vpop.permute.xlu0 %579 }
 0x3b5   :  { %1073 = vrot.lane.b32.xlu1 %v6079_v62, %s5933_s0 }
 0x3b7   :  { %v582_v14 = vpop.permute.xlu0 %581 }
 0x3bb   :  { %v288_v0 = vpop.permute.xlu1 %287  ;;  %v584_v18 = vpop.permute.xlu0 %583 }
 0x3bc   :  { %5031 = vmatpush3.xpose.msk.msra.mxu0 %vm54_vm4, %v288_v0  ;;  %v6306_v0 = vld [vmem:[%s7911_s1 + $0x10] sm:$0xff] }
 0x3bd   :  { %5032 = vmatprep.subr.mxu0 %v5922_v8 }
 0x3bf   :  { %v286_v1 = vpop.permute.xlu1 %285  ;;  %v881_v20 = vpop.permute.xlu0 %880 }
 0x3c0   :  { %5033 = vmatpush3.xpose.msk.msra.mxu0 %vm54_vm4, %v286_v1 }
 0x3c1   :  { %5034 = vmatprep.subr.mxu0 %v5922_v8 }
 0x3c3   :  { %v284_v2 = vpop.permute.xlu1 %283  ;;  %v883_v23 = vpop.permute.xlu0 %882 }
 0x3c4   :  { %5035 = vmatpush3.xpose.msk.msra.mxu0 %vm54_vm4, %v284_v2 }
 0x3c5   :  { %5036 = vmatprep.subr.mxu0 %v5922_v8 }
 0x3c7   :  { %v282_v4 = vpop.permute.xlu1 %281  ;;  %v885_v25 = vpop.permute.xlu0 %884 }
 0x3c8   :  { %5037 = vmatpush3.xpose.msk.msra.mxu0 %vm54_vm4, %v282_v4 }
 0x3c9   :  { %5038 = vmatprep.subr.mxu0 %v5922_v8 }
 0x3cb   :  { %v280_v5 = vpop.permute.xlu1 %279  ;;  %v887_v28 = vpop.permute.xlu0 %886 }
 0x3cc   :  { %5039 = vmatpush3.xpose.msk.msra.mxu0 %vm54_vm4, %v280_v5 }
 0x3cd   :  { %5080 = vmatprep.subr.mxu0 %v5922_v8 }
 0x3cf   :  { %5041 = vmatmul.mubr.msk.f32.vlgmr.msra.gmra.mxu0 %vm54_vm4, %v6063_v50  ;;  %v594_v7 = vpop.permute.xlu1 %593  ;;  %v889_v31 = vpop.permute.xlu0 %888 }
 0x3d0   :  { %5081 = vmatpush3.xpose.msk.msra.mxu0 %vm54_vm4, %v594_v7  ;;  %5043 = vmatprep.mubr.msk.f32.mxu0 %vm5923_vm1, %v5922_v8 }
 0x3d1   :  { %5082 = vmatprep.subr.mxu0 %v5922_v8 }
 0x3d3   :  { %5044 = vmatmul.mubr.msk.f32.gmra.mxu0 %vm54_vm4, %v6067_v53  ;;  %v592_v10 = vpop.permute.xlu1 %591  ;;  %v1186_v35 = vpop.permute.xlu0 %1185 }
 0x3d4   :  { %5083 = vmatpush3.xpose.msk.msra.mxu0 %vm54_vm4, %v592_v10  ;;  %5046 = vmatprep.mubr.msk.f32.mxu0 %vm5923_vm1, %v5922_v8 }
 0x3d5   :  { %5084 = vmatprep.subr.mxu0 %v5922_v8 }
 0x3d7   :  { %5047 = vmatmul.mubr.msk.f32.gmra.mxu0 %vm54_vm4, %v6071_v56  ;;  %v590_v11 = vpop.permute.xlu1 %589  ;;  %v1190_v37 = vpop.permute.xlu0 %1189 }
 0x3d8   :  { %5085 = vmatpush3.xpose.msk.msra.mxu0 %vm54_vm4, %v590_v11  ;;  %5049 = vmatprep.mubr.msk.f32.mxu0 %vm5923_vm1, %v5922_v8 }
 0x3d9   :  { %5086 = vmatprep.subr.mxu0 %v5922_v8 }
 0x3db   :  { %5050 = vmatmul.mubr.msk.f32.gmra.mxu0 %vm54_vm4, %v6075_v59  ;;  %v588_v13 = vpop.permute.xlu1 %587  ;;  %v1194_v41 = vpop.permute.xlu0 %1193 }
 0x3dc   :  { %5087 = vmatpush3.xpose.msk.msra.mxu0 %vm54_vm4, %v588_v13  ;;  %5052 = vmatprep.mubr.msk.f32.mxu0 %vm5923_vm1, %v5922_v8 }
 0x3dd   :  { %5088 = vmatprep.subr.mxu0 %v5922_v8 }
 0x3df   :  { %5053 = vmatmul.mubr.msk.f32.gmra.mxu0 %vm54_vm4, %v6079_v62  ;;  %v586_v15 = vpop.permute.xlu1 %585  ;;  %v462_v44 = vpop.permute.xlu0 %461 }
 0x3e0   :  { %5089 = vmatpush3.xpose.msk.msra.mxu0 %vm54_vm4, %v586_v15  ;;  %5090 = vmatprep.mubr.msk.f32.mxu0 %vm5923_vm1, %v5922_v8 }
 0x3e1   :  { %5130 = vmatprep.subr.mxu0 %v5922_v8 }
 0x3e3   :  { %5091 = vmatmul.mubr.msk.f32.vlgmr.msra.gmra.mxu0 %vm54_vm4, %v576_v6  ;;  %v899_v16 = vpop.permute.xlu1 %898  ;;  %v458_v48 = vpop.permute.xlu0 %457  ;;  %v6316_v6 = vld [vmem:[%s7911_s1 + $0x18] sm:$0xff] }
 0x3e4   :  { %5131 = vmatpush3.xpose.msk.msra.mxu0 %vm54_vm4, %v899_v16  ;;  %5093 = vmatprep.mubr.msk.f32.mxu0 %vm5923_vm1, %v5922_v8 }
 0x3e5   :  { %5132 = vmatprep.subr.mxu0 %v5922_v8 }
 0x3e7   :  { %5094 = vmatmul.mubr.msk.f32.gmra.mxu0 %vm54_vm4, %v578_v9  ;;  %v897_v19 = vpop.permute.xlu1 %896  ;;  %v456_v49 = vpop.permute.xlu0 %455 }
 0x3e8   :  { %5133 = vmatpush3.xpose.msk.msra.mxu0 %vm54_vm4, %v897_v19  ;;  %5096 = vmatprep.mubr.msk.f32.mxu0 %vm5923_vm1, %v5922_v8 }
 0x3e9   :  { %5134 = vmatprep.subr.mxu0 %v5922_v8 }
 0x3eb   :  { %5097 = vmatmul.mubr.msk.f32.gmra.mxu0 %vm54_vm4, %v580_v12  ;;  %v895_v21 = vpop.permute.xlu1 %894  ;;  %v6326_v12 = vld [vmem:[%s7911_s1 + $0x20] sm:$0xff] }
 0x3ec   :  { %5135 = vmatpush3.xpose.msk.msra.mxu0 %vm54_vm4, %v895_v21  ;;  %5099 = vmatprep.mubr.msk.f32.mxu0 %vm5923_vm1, %v5922_v8 }
 0x3ed   :  { %5136 = vmatprep.subr.mxu0 %v5922_v8 }
 0x3ef   :  { %5100 = vmatmul.mubr.msk.f32.gmra.mxu0 %vm54_vm4, %v582_v14  ;;  %v893_v22 = vpop.permute.xlu1 %892 }
 0x3f0   :  { %5137 = vmatpush3.xpose.msk.msra.mxu0 %vm54_vm4, %v893_v22  ;;  %5102 = vmatprep.mubr.msk.f32.mxu0 %vm5923_vm1, %v5922_v8 }
 0x3f1   :  { %5138 = vmatprep.subr.mxu0 %v5922_v8 }
 0x3f3   :  { %5103 = vmatmul.mubr.msk.f32.gmra.mxu0 %vm54_vm4, %v584_v18  ;;  %v891_v24 = vpop.permute.xlu1 %890 }
 0x3f4   :  { %5139 = vmatpush3.xpose.msk.msra.mxu0 %vm54_vm4, %v891_v24  ;;  %5140 = vmatprep.mubr.msk.f32.mxu0 %vm5923_vm1, %v5922_v8 }
 0x3f5   :  { %5180 = vmatprep.subr.mxu0 %v5922_v8 }
 0x3f7   :  { %5141 = vmatmul.mubr.msk.f32.vlgmr.msra.gmra.mxu0 %vm54_vm4, %v881_v20  ;;  %v1204_v26 = vpop.permute.xlu1 %1203 }
 0x3f8   :  { %5181 = vmatpush3.xpose.msk.msra.mxu0 %vm54_vm4, %v1204_v26  ;;  %5143 = vmatprep.mubr.msk.f32.mxu0 %vm5923_vm1, %v5922_v8 }
 0x3f9   :  { %5182 = vmatprep.subr.mxu0 %v5922_v8 }
 0x3fb   :  { %5144 = vmatmul.mubr.msk.f32.gmra.mxu0 %vm54_vm4, %v883_v23  ;;  %v1202_v27 = vpop.permute.xlu1 %1201 }
 0x3fc   :  { %5183 = vmatpush3.xpose.msk.msra.mxu0 %vm54_vm4, %v1202_v27  ;;  %5146 = vmatprep.mubr.msk.f32.mxu0 %vm5923_vm1, %v5922_v8 }
 0x3fd   :  { %5184 = vmatprep.subr.mxu0 %v5922_v8 }
 0x3ff   :  { %5147 = vmatmul.mubr.msk.f32.gmra.mxu0 %vm54_vm4, %v885_v25  ;;  %v1200_v29 = vpop.permute.xlu1 %1199 }
 0x400   :  { %5185 = vmatpush3.xpose.msk.msra.mxu0 %vm54_vm4, %v1200_v29  ;;  %5149 = vmatprep.mubr.msk.f32.mxu0 %vm5923_vm1, %v5922_v8 }
 0x401   :  { %5186 = vmatprep.subr.mxu0 %v5922_v8 }
 0x403   :  { %5150 = vmatmul.mubr.msk.f32.gmra.mxu0 %vm54_vm4, %v887_v28  ;;  %v1198_v32 = vpop.permute.xlu1 %1197 }
 0x404   :  { %5187 = vmatpush3.xpose.msk.msra.mxu0 %vm54_vm4, %v1198_v32  ;;  %5152 = vmatprep.mubr.msk.f32.mxu0 %vm5923_vm1, %v5922_v8 }
 0x405   :  { %5188 = vmatprep.subr.mxu0 %v5922_v8 }
 0x407   :  { %5153 = vmatmul.mubr.msk.f32.gmra.mxu0 %vm54_vm4, %v889_v31  ;;  %v1196_v33 = vpop.permute.xlu1 %1195 }
 0x408   :  { %5189 = vmatpush3.xpose.msk.msra.mxu0 %vm54_vm4, %v1196_v33  ;;  %5190 = vmatprep.mubr.msk.f32.mxu0 %vm5923_vm1, %v5922_v8 }
 0x409   :  { %5230 = vmatprep.subr.mxu0 %v5922_v8 }
 0x40b   :  { %5191 = vmatmul.mubr.msk.f32.vlgmr.msra.gmra.mxu0 %vm54_vm4, %v1186_v35  ;;  %v1188_v36 = vpop.permute.xlu1 %1187 }
 0x40c   :  { %5193 = vmatprep.mubr.msk.f32.mxu0 %vm5923_vm1, %v5922_v8 }
 0x40f   :  { %5194 = vmatmul.mubr.msk.f32.gmra.mxu0 %vm54_vm4, %v1188_v36  ;;  %v1192_v39 = vpop.permute.xlu1 %1191 }
 0x410   :  { %5196 = vmatprep.mubr.msk.f32.mxu0 %vm5923_vm1, %v5922_v8 }
 0x413   :  { %5197 = vmatmul.mubr.msk.f32.gmra.mxu0 %vm54_vm4, %v1190_v37  ;;  %v460_v40 = vpop.permute.xlu1 %459 }
 0x414   :  { %5199 = vmatprep.mubr.msk.f32.mxu0 %vm5923_vm1, %v5922_v8 }
 0x417   :  { %5200 = vmatmul.mubr.msk.f32.gmra.mxu0 %vm54_vm4, %v1192_v39  ;;  %v6271_v43 = vpop.permute.xlu1 %764 }
 0x418   :  { %5202 = vmatprep.mubr.msk.f32.mxu0 %vm5923_vm1, %v5922_v8 }
 0x41b   :  { %5203 = vmatmul.mubr.msk.f32.gmra.mxu0 %vm54_vm4, %v1194_v41  ;;  %v6276_v45 = vpop.permute.xlu1 %1069 }
 0x41c   :  { %5238 = vmatprep.mubr.msk.f32.mxu0 %vm5923_vm1, %v5922_v8 }
 0x41f   :  { %v464_v47 = vpop.permute.xlu1 %463 }
 0x420   :  { %5056 = vmatpush3.msra.mxu1 %v464_v47 }
 0x421   :  { %5057 = vmatprep.subr.mxu1 %v5922_v8 }
 0x422   :  { %5058 = vmatpush3.msra.mxu1 %v462_v44 }
 0x423   :  { %5059 = vmatprep.subr.mxu1 %v5922_v8 }
 0x424   :  { %5060 = vmatpush3.msra.mxu1 %v460_v40 }
 0x425   :  { %5061 = vmatprep.subr.mxu1 %v5922_v8 }
 0x426   :  { %5062 = vmatpush3.msra.mxu1 %v458_v48 }
 0x427   :  { %5063 = vmatprep.subr.mxu1 %v5922_v8 }
 0x428   :  { %5064 = vmatpush3.msra.mxu1 %v456_v49 }
 0x429   :  { %5105 = vmatprep.subr.mxu1 %v5922_v8 }
 0x48f   :  { %v375_v52 = vpop.f32.mrf.mxu0 }
 0x490   :  { %v6291_v54 = vadd.f32 %v375_v52, %v6288_v51 }
 0x491   :  { %v5042_v55 = vpop.f32.mrf.mxu0 }
 0x492   :  { %v400_v58 = vsel %vm399_vm5, %v6291_v54, -inf }
 0x493   :  { %401 = vmax.xlane.f32.xlu1 %v400_v58  ;;  %v380_v60 = vpop.f32.mrf.mxu0 }
 0x494   :  { %v6301_v61 = vadd.f32 %v380_v60, %v6296_v57 }
 0x495   :  { %v5045_v63 = vpop.f32.mrf.mxu0 }
 0x496   :  { %v403_v1 = vsel %vm399_vm5, %v6301_v61, -inf }
 0x497   :  { %404 = vmax.xlane.f32.xlu0 %v403_v1  ;;  %v385_v2 = vpop.f32.mrf.mxu0 }
 0x498   :  { %v6311_v4 = vadd.f32 %v385_v2, %v6306_v0 }
 0x499   :  { %v5048_v5 = vpop.f32.mrf.mxu0 }
 0x49a   :  { %v406_v7 = vsel %vm399_vm5, %v6311_v4, -inf }
 0x49b   :  { %407 = vmax.xlane.f32.xlu0 %v406_v7  ;;  %v390_v9 = vpop.f32.mrf.mxu0 }
 0x49c   :  { %v6321_v10 = vadd.f32 %v390_v9, %v6316_v6 }
 0x49d   :  { %v5051_v11 = vpop.f32.mrf.mxu0 }
 0x49e   :  { %v409_v13 = vsel %vm399_vm5, %v6321_v10, -inf }
 0x49f   :  { %410 = vmax.xlane.f32.xlu1 %v409_v13  ;;  %v395_v14 = vpop.f32.mrf.mxu0 }
 0x4a0   :  { %v6331_v15 = vadd.f32 %v395_v14, %v6326_v12 }
 0x4a1   :  { %v5054_v16 = vpop.f32.mrf.mxu0 }
 0x4a2   :  { %v412_v18 = vsel %vm399_vm5, %v6331_v15, -inf }
 0x4a3   :  { %413 = vmax.xlane.f32.xlu0 %v412_v18  ;;  %v681_v19 = vpop.f32.mrf.mxu0 }
 0x4a4   :  { %v6336_v20 = vadd.f32 %v681_v19, %v6288_v51 }
 0x4a5   :  { %v5092_v21 = vpop.f32.mrf.mxu0 }
 0x4a6   :  { %v705_v22 = vsel %vm399_vm5, %v6336_v20, -inf }
 0x4a7   :  { %706 = vmax.xlane.f32.xlu1 %v705_v22  ;;  %v686_v23 = vpop.f32.mrf.mxu0 }
 0x4a8   :  { %v6341_v24 = vadd.f32 %v686_v23, %v6296_v57 }
 0x4a9   :  { %v5095_v25 = vpop.f32.mrf.mxu0 }
 0x4aa   :  { %v708_v26 = vsel %vm399_vm5, %v6341_v24, -inf }
 0x4ab   :  { %709 = vmax.xlane.f32.xlu0 %v708_v26  ;;  %v691_v27 = vpop.f32.mrf.mxu0 }
 0x4ac   :  { %v6346_v28 = vadd.f32 %v691_v27, %v6306_v0 }
 0x4ad   :  { %v5098_v29 = vpop.f32.mrf.mxu0 }
 0x4ae   :  { %v711_v31 = vsel %vm399_vm5, %v6346_v28, -inf }
 0x4af   :  { %712 = vmax.xlane.f32.xlu1 %v711_v31  ;;  %v696_v32 = vpop.f32.mrf.mxu0 }
 0x4b0   :  { %v6351_v33 = vadd.f32 %v696_v32, %v6316_v6 }
 0x4b1   :  { %v5101_v35 = vpop.f32.mrf.mxu0 }
 0x4b2   :  { %v714_v36 = vsel %vm399_vm5, %v6351_v33, -inf }
 0x4b3   :  { %715 = vmax.xlane.f32.xlu0 %v714_v36  ;;  %v701_v37 = vpop.f32.mrf.mxu0 }
 0x4b4   :  { %v6356_v39 = vadd.f32 %v701_v37, %v6326_v12 }
 0x4b5   :  { %v5104_v40 = vpop.f32.mrf.mxu0 }
 0x4b6   :  { %v717_v41 = vsel %vm399_vm5, %v6356_v39, -inf }
 0x4b7   :  { %718 = vmax.xlane.f32.xlu1 %v717_v41  ;;  %v986_v44 = vpop.f32.mrf.mxu0 }
 0x4b8   :  { %v6361_v47 = vadd.f32 %v986_v44, %v6288_v51 }
 0x4b9   :  { %v5142_v48 = vpop.f32.mrf.mxu0 }
 0x4ba   :  { %v1010_v49 = vsel %vm399_vm5, %v6361_v47, -inf }
 0x4bb   :  { %1011 = vmax.xlane.f32.xlu0 %v1010_v49  ;;  %v991_v52 = vpop.f32.mrf.mxu0 }
 0x4bc   :  { %v6370_v23 = vadd.f32 %v991_v52, %v6296_v57  ;;  %v6420_v52 = vpop.permute.xlu1 %768 }
 0x4bd   :  { %v5145_v55 = vpop.f32.mrf.mxu0 }
 0x4be   :  { %v1013_v26 = vsel %vm399_vm5, %v6370_v23, -inf }
 0x4bf   :  { %v996_v58 = vpop.f32.mrf.mxu0 }
 0x4c0   :  { %v6373_v25 = vadd.f32 %v996_v58, %v6306_v0  ;;  %v6424_v58 = vpop.permute.xlu1 %1073 }
 0x4c1   :  { %v5148_v60 = vpop.f32.mrf.mxu0 }
 0x4c2   :  { %v1016_v31 = vsel %vm399_vm5, %v6373_v25, -inf }
 0x4c3   :  { %v1001_v63 = vpop.f32.mrf.mxu0 }
 0x4c5   :  { %v5151_v1 = vpop.f32.mrf.mxu0 }
 0x4c7   :  { %v1006_v2 = vpop.f32.mrf.mxu0 }
 0x4c8   :  { %1378 = vrot.lane.b32.xlu1 %v6079_v62, %s5935_s30  ;;  %v6376_v62 = vadd.f32 %v1001_v63, %v6316_v6  ;;  %v6381_v27 = vadd.f32 %v1006_v2, %v6326_v12 }
 0x4c9   :  { %v5154_v5 = vpop.f32.mrf.mxu0 }
 0x4ca   :  { %v1019_v32 = vsel %vm399_vm5, %v6376_v62, -inf  ;;  %v1022_v37 = vsel %vm399_vm5, %v6381_v27, -inf }
 0x4cb   :  { %v1291_v7 = vpop.f32.mrf.mxu0 }
 0x4cc   :  { %v6384_v29 = vadd.f32 %v1291_v7, %v6288_v51 }
 0x4cd   :  { %v5192_v9 = vpop.f32.mrf.mxu0 }
 0x4ce   :  { %v1315_v51 = vsel %vm399_vm5, %v6384_v29, -inf }
 0x4cf   :  { %v1296_v11 = vpop.f32.mrf.mxu0 }
 0x4d0   :  { %v6391_v35 = vadd.f32 %v1296_v11, %v6296_v57 }
 0x4d1   :  { %1065 = vrot.lane.b32.xlu0 %v6063_v50, %s5933_s0  ;;  %v5195_v13 = vpop.f32.mrf.mxu0 }
 0x4d2   :  { %v1318_v57 = vsel %vm399_vm5, %v6391_v35, -inf }
 0x4d3   :  { %v1301_v14 = vpop.f32.mrf.mxu0 }
 0x4d4   :  { %v6394_v36 = vadd.f32 %v1301_v14, %v6306_v0 }
 0x4d5   :  { %v5198_v16 = vpop.f32.mrf.mxu0 }
 0x4d6   :  { %v1321_v0 = vsel %vm399_vm5, %v6394_v36, -inf }
 0x4d7   :  { %v1306_v18 = vpop.f32.mrf.mxu0 }
 0x4d8   :  { %v6401_v40 = vadd.f32 %v1306_v18, %v6316_v6  ;;  %v6414_v6 = vpop.permute.xlu0 %766 }
 0x4d9   :  { %v5201_v19 = vpop.f32.mrf.mxu0 }
 0x4da   :  { %v1324_v44 = vsel %vm399_vm5, %v6401_v40, -inf }
 0x4db   :  { %v1311_v21 = vpop.f32.mrf.mxu0 }
 0x4dc   :  { %v6404_v41 = vadd.f32 %v1311_v21, %v6326_v12  ;;  %v6416_v12 = vpop.permute.xlu0 %762 }
 0x4dd   :  { %v5204_v22 = vpop.f32.mrf.mxu0 }
 0x4de   :  { %v1327_v48 = vsel %vm399_vm5, %v6404_v41, -inf }
 0x4e0   :  { %v6418_v49 = vpop.permute.xlu0 %760 }
 0x4e4   :  { %v6422_v55 = vpop.permute.xlu0 %1071 }
 0x4e8   :  { %v6426_v60 = vpop.permute.xlu0 %1067 }
 0x4ec   :  { %1014 = vmax.xlane.f32.xlu1 %v1013_v26 }
 0x4f0   :  { %1017 = vmax.xlane.f32.xlu0 %v1016_v31  ;;  %1020 = vmax.xlane.f32.xlu1 %v1019_v32 }
 0x4f4   :  { %1023 = vmax.xlane.f32.xlu0 %v1022_v37  ;;  %1316 = vmax.xlane.f32.xlu1 %v1315_v51 }
 0x4f8   :  { %1319 = vmax.xlane.f32.xlu0 %v1318_v57  ;;  %1322 = vmax.xlane.f32.xlu1 %v1321_v0 }
 0x4fc   :  { %1325 = vmax.xlane.f32.xlu0 %v1324_v44  ;;  %1328 = vmax.xlane.f32.xlu1 %v1327_v48 }
 0x51c   :  { %v402_v63 = vpop.xlane.xlu1 %401 }
 0x51d   :  { %v415_v1 = vsub.f32 %v6291_v54, %v402_v63 }
 0x51f   :  { %v420_v2 = vmul.f32 1.442695, %v415_v1 }
 0x520   :  { %v405_v5 = vpop.xlane.xlu0 %404 }
 0x521   :  { %5685 = vpow2.f32 %v420_v2  ;;  %v416_v7 = vsub.f32 %v6301_v61, %v405_v5 }
 0x523   :  { %v422_v9 = vmul.f32 1.442695, %v416_v7 }
 0x524   :  { %v408_v11 = vpop.xlane.xlu0 %407 }
 0x525   :  { %5687 = vpow2.f32 %v422_v9  ;;  %v417_v13 = vsub.f32 %v6311_v4, %v408_v11 }
 0x527   :  { %v424_v14 = vmul.f32 1.442695, %v417_v13 }
 0x528   :  { %v411_v16 = vpop.xlane.xlu1 %410 }
 0x529   :  { %5689 = vpow2.f32 %v424_v14  ;;  %v418_v18 = vsub.f32 %v6321_v10, %v411_v16 }
 0x52b   :  { %v426_v19 = vmul.f32 1.442695, %v418_v18 }
 0x52c   :  { %v414_v21 = vpop.xlane.xlu0 %413 }
 0x52d   :  { %5691 = vpow2.f32 %v426_v19  ;;  %v419_v54 = vsub.f32 %v6331_v15, %v414_v21 }
 0x52e   :  { %v6433_v22 = vpop.eup %5685 }
 0x52f   :  { %v428_v26 = vmul.f32 1.442695, %v419_v54  ;;  %v430_v61 = vsel %vm399_vm5, %v6433_v22, 0.0 }
 0x530   :  { %v707_v31 = vpop.xlane.xlu1 %706  ;;  %431 = vadd.xlane.f32.xlu0 %v430_v61 }
 0x531   :  { %5693 = vpow2.f32 %v428_v26  ;;  %v720_v4 = vsub.f32 %v6336_v20, %v707_v31 }
 0x532   :  { %v6438_v32 = vpop.eup %5687 }
 0x533   :  { %v725_v37 = vmul.f32 1.442695, %v720_v4  ;;  %v433_v10 = vsel %vm399_vm5, %v6438_v32, 0.0 }
 0x534   :  { %v710_v51 = vpop.xlane.xlu0 %709  ;;  %434 = vadd.xlane.f32.xlu1 %v433_v10 }
 0x535   :  { %5695 = vpow2.f32 %v725_v37  ;;  %v721_v15 = vsub.f32 %v6341_v24, %v710_v51 }
 0x536   :  { %v6443_v57 = vpop.eup %5689 }
 0x537   :  { %v727_v0 = vmul.f32 1.442695, %v721_v15  ;;  %v436_v44 = vsel %vm399_vm5, %v6443_v57, 0.0 }
 0x538   :  { %v713_v48 = vpop.xlane.xlu1 %712  ;;  %437 = vadd.xlane.f32.xlu0 %v436_v44 }
 0x539   :  { %5697 = vpow2.f32 %v727_v0  ;;  %v722_v20 = vsub.f32 %v6346_v28, %v713_v48 }
 0x53a   :  { %v6448_v63 = vpop.eup %5691 }
 0x53b   :  { %v729_v1 = vmul.f32 1.442695, %v722_v20  ;;  %v439_v2 = vsel %vm399_vm5, %v6448_v63, 0.0 }
 0x53c   :  { %v716_v5 = vpop.xlane.xlu0 %715  ;;  %440 = vadd.xlane.f32.xlu1 %v439_v2 }
 0x53d   :  { %5699 = vpow2.f32 %v729_v1  ;;  %v723_v24 = vsub.f32 %v6351_v33, %v716_v5 }
 0x53e   :  { %v6453_v7 = vpop.eup %5693 }
 0x53f   :  { %v731_v9 = vmul.f32 1.442695, %v723_v24  ;;  %v442_v11 = vsel %vm399_vm5, %v6453_v7, 0.0 }
 0x540   :  { %v719_v13 = vpop.xlane.xlu1 %718  ;;  %443 = vadd.xlane.f32.xlu0 %v442_v11 }
 0x541   :  { %5701 = vpow2.f32 %v731_v9  ;;  %v724_v28 = vsub.f32 %v6356_v39, %v719_v13 }
 0x542   :  { %v6458_v14 = vpop.eup %5695 }
 0x543   :  { %v733_v16 = vmul.f32 1.442695, %v724_v28  ;;  %v735_v18 = vsel %vm399_vm5, %v6458_v14, 0.0 }
 0x544   :  { %v1012_v19 = vpop.xlane.xlu0 %1011  ;;  %736 = vadd.xlane.f32.xlu0 %v735_v18  ;;  %v6487_v15 = vpop.permute.xlu1 %1378 }
 0x545   :  { %5703 = vpow2.f32 %v733_v16  ;;  %v1025_v33 = vsub.f32 %v6361_v47, %v1012_v19 }
 0x546   :  { %v6463_v21 = vpop.eup %5697 }
 0x547   :  { %v1030_v54 = vmul.f32 1.442695, %v1025_v33  ;;  %v738_v26 = vsel %vm399_vm5, %v6463_v21, 0.0 }
 0x548   :  { %739 = vadd.xlane.f32.xlu1 %v738_v26  ;;  %v6489_v0 = vpop.permute.xlu0 %1065 }
 0x549   :  { %5705 = vpow2.f32 %v1030_v54 }
 0x54a   :  { %v6467_v39 = vpop.eup %5699 }
 0x54b   :  { %v741_v61 = vsel %vm399_vm5, %v6467_v39, 0.0 }
 0x54c   :  { %742 = vadd.xlane.f32.xlu0 %v741_v61 }
 0x54e   :  { %v6471_v31 = vpop.eup %5701 }
 0x54f   :  { %v744_v4 = vsel %vm399_vm5, %v6471_v31, 0.0 }
 0x550   :  { %745 = vadd.xlane.f32.xlu1 %v744_v4 }
 0x552   :  { %v6475_v47 = vpop.eup %5703 }
 0x553   :  { %v747_v37 = vsel %vm399_vm5, %v6475_v47, 0.0 }
 0x554   :  { %748 = vadd.xlane.f32.xlu1 %v747_v37 }
 0x556   :  { %v6479_v10 = vpop.eup %5705 }
 0x557   :  { %v1040_v51 = vsel %vm399_vm5, %v6479_v10, 0.0 }
 0x558   :  { %1041 = vadd.xlane.f32.xlu0 %v1040_v51 }
 0x565   :  { %1374 = vrot.lane.b32.xlu1 %v6071_v56, %s5935_s30 }
 0x56e   :  { %1376 = vrot.lane.b32.xlu0 %v6075_v59, %s5935_s30 }
 0x575   :  { %v1015_v44 = vpop.xlane.xlu1 %1014 }
 0x576   :  { %v1026_v48 = vsub.f32 %v6370_v23, %v1015_v44 }
 0x578   :  { %v1032_v20 = vmul.f32 1.442695, %v1026_v48 }
 0x579   :  { %v1018_v1 = vpop.xlane.xlu0 %1017  ;;  %v1021_v2 = vpop.xlane.xlu1 %1020 }
 0x57a   :  { %5707 = vpow2.f32 %v1032_v20  ;;  %v1027_v5 = vsub.f32 %v6373_v25, %v1018_v1  ;;  %v1028_v24 = vsub.f32 %v6376_v62, %v1021_v2 }
 0x57c   :  { %v1034_v9 = vmul.f32 1.442695, %v1027_v5  ;;  %v1036_v56 = vmul.f32 1.442695, %v1028_v24 }
 0x57d   :  { %v1024_v11 = vpop.xlane.xlu0 %1023  ;;  %v1317_v13 = vpop.xlane.xlu1 %1316 }
 0x57e   :  { %5709 = vpow2.f32 %v1034_v9  ;;  %v1029_v59 = vsub.f32 %v6381_v27, %v1024_v11  ;;  %v1330_v28 = vsub.f32 %v6384_v29, %v1317_v13 }
 0x57f   :  { %5711 = vpow2.f32 %v1036_v56 }
 0x580   :  { %v1038_v16 = vmul.f32 1.442695, %v1029_v59  ;;  %v1335_v23 = vmul.f32 1.442695, %v1330_v28 }
 0x581   :  { %v1320_v18 = vpop.xlane.xlu0 %1319  ;;  %v1323_v19 = vpop.xlane.xlu1 %1322 }
 0x582   :  { %5713 = vpow2.f32 %v1038_v16  ;;  %v1331_v33 = vsub.f32 %v6391_v35, %v1320_v18  ;;  %v1332_v25 = vsub.f32 %v6394_v36, %v1323_v19 }
 0x583   :  { %5715 = vpow2.f32 %v1335_v23 }
 0x584   :  { %v1337_v62 = vmul.f32 1.442695, %v1331_v33  ;;  %v1339_v54 = vmul.f32 1.442695, %v1332_v25 }
 0x585   :  { %v1326_v26 = vpop.xlane.xlu0 %1325  ;;  %v1329_v61 = vpop.xlane.xlu1 %1328 }
 0x586   :  { %5717 = vpow2.f32 %v1337_v62  ;;  %v1333_v27 = vsub.f32 %v6401_v40, %v1326_v26  ;;  %v1334_v29 = vsub.f32 %v6404_v41, %v1329_v61 }
 0x587   :  { %v6500_v4 = vpop.eup %5707  ;;  %5719 = vpow2.f32 %v1339_v54 }
 0x588   :  { %v1341_v37 = vmul.f32 1.442695, %v1333_v27  ;;  %v1043_v51 = vsel %vm399_vm5, %v6500_v4, 0.0  ;;  %v1343_v35 = vmul.f32 1.442695, %v1334_v29 }
 0x589   :  { %1044 = vadd.xlane.f32.xlu1 %v1043_v51 }
 0x58a   :  { %5721 = vpow2.f32 %v1341_v37 }
 0x58b   :  { %v6504_v36 = vpop.eup %5709  ;;  %5723 = vpow2.f32 %v1343_v35 }
 0x58c   :  { %v6506_v44 = vpop.eup %5711  ;;  %v1046_v48 = vsel %vm399_vm5, %v6504_v36, 0.0 }
 0x58d   :  { %1047 = vadd.xlane.f32.xlu0 %v1046_v48  ;;  %v1049_v40 = vsel %vm399_vm5, %v6506_v44, 0.0 }
 0x58e   :  { %1050 = vadd.xlane.f32.xlu1 %v1049_v40 }
 0x58f   :  { %v6512_v41 = vpop.eup %5713 }
 0x590   :  { %v6514_v20 = vpop.eup %5715  ;;  %v1052_v1 = vsel %vm399_vm5, %v6512_v41, 0.0 }
 0x591   :  { %v1345_v2 = vsel %vm399_vm5, %v6514_v20, 0.0 }
 0x592   :  { %1346 = vadd.xlane.f32.xlu0 %v1345_v2  ;;  %1053 = vadd.xlane.f32.xlu1 %v1052_v1 }
 0x593   :  { %v6520_v5 = vpop.eup %5717 }
 0x594   :  { %v6522_v24 = vpop.eup %5719  ;;  %v1348_v9 = vsel %vm399_vm5, %v6520_v5, 0.0 }
 0x595   :  { %v1351_v56 = vsel %vm399_vm5, %v6522_v24, 0.0 }
 0x596   :  { %1352 = vadd.xlane.f32.xlu0 %v1351_v56  ;;  %1349 = vadd.xlane.f32.xlu1 %v1348_v9 }
 0x597   :  { %v6528_v11 = vpop.eup %5721 }
 0x598   :  { %v1354_v13 = vsel %vm399_vm5, %v6528_v11, 0.0  ;;  %v6532_v59 = vpop.eup %5723 }
 0x599   :  { %v1357_v28 = vsel %vm399_vm5, %v6532_v59, 0.0 }
 0x59a   :  { %1355 = vadd.xlane.f32.xlu1 %v1354_v13 }
 0x59e   :  { %1358 = vadd.xlane.f32.xlu1 %v1357_v28 }
 0x5ac   :  { %1370 = vrot.lane.b32.xlu0 %v6063_v50, %s5935_s30 }
 0x5af   :  { %1372 = vrot.lane.b32.xlu1 %v6067_v53, %s5935_s30 }
 0x5b9   :  { %v432_v16 = vpop.xlane.xlu0 %431 }
 0x5ba   :  { %5725 = vrcp.f32 %v432_v16 }
 0x5bd   :  { %v435_v23 = vpop.xlane.xlu1 %434 }
 0x5be   :  { %5727 = vrcp.f32 %v435_v23 }
 0x5c1   :  { %v438_v18 = vpop.xlane.xlu0 %437 }
 0x5c2   :  { %5729 = vrcp.f32 %v438_v18 }
 0x5c5   :  { %v441_v19 = vpop.xlane.xlu1 %440 }
 0x5c6   :  { %5731 = vrcp.f32 %v441_v19 }
 0x5c7   :  { %v5726_v33 = vpop.eup %5725 }
 0x5c8   :  { %v446_v25 = vmul.f32 %v5726_v33, %v6433_v22 }
 0x5c9   :  { %v444_v62 = vpop.xlane.xlu0 %443 }
 0x5ca   :  { %5733 = vrcp.f32 %v444_v62  ;;  %5066 = vmatmul.mubr.msk.f32.vlgmr.msra.gmra.mxu1 %vm399_vm5, %v446_v25 }
 0x5cb   :  { %v5728_v54 = vpop.eup %5727  ;;  %5106 = vmatpush3.msra.mxu1 %v6420_v52  ;;  %5068 = vmatprep.mubr.msk.f32.mxu1 %vm5923_vm1, %v5922_v8 }
 0x5cc   :  { %5107 = vmatprep.subr.mxu1 %v5922_v8  ;;  %v448_v50 = vmul.f32 %v5728_v54, %v6438_v32 }
 0x5cd   :  { %5108 = vmatpush3.msra.mxu1 %v6414_v6  ;;  %v737_v53 = vpop.xlane.xlu0 %736 }
 0x5ce   :  { %5109 = vmatprep.subr.mxu1 %v5922_v8  ;;  %5735 = vrcp.f32 %v737_v53  ;;  %5069 = vmatmul.mubr.msk.f32.gmra.mxu1 %vm399_vm5, %v448_v50 }
 0x5cf   :  { %v5730_v22 = vpop.eup %5729  ;;  %5110 = vmatpush3.msra.mxu1 %v6271_v43  ;;  %5071 = vmatprep.mubr.msk.f32.mxu1 %vm5923_vm1, %v5922_v8 }
 0x5d0   :  { %5111 = vmatprep.subr.mxu1 %v5922_v8  ;;  %v450_v52 = vmul.f32 %v5730_v22, %v6443_v57 }
 0x5d1   :  { %5112 = vmatpush3.msra.mxu1 %v6416_v12  ;;  %v740_v32 = vpop.xlane.xlu1 %739 }
 0x5d2   :  { %5113 = vmatprep.subr.mxu1 %v5922_v8  ;;  %5737 = vrcp.f32 %v740_v32  ;;  %5072 = vmatmul.mubr.msk.f32.gmra.mxu1 %vm399_vm5, %v450_v52 }
 0x5d3   :  { %v5732_v6 = vpop.eup %5731  ;;  %5114 = vmatpush3.msra.mxu1 %v6418_v49  ;;  %5074 = vmatprep.mubr.msk.f32.mxu1 %vm5923_vm1, %v5922_v8 }
 0x5d4   :  { %v452_v43 = vmul.f32 %v5732_v6, %v6448_v63  ;;  %5155 = vmatprep.subr.mxu1 %v5922_v8 }
 0x5d5   :  { %v743_v26 = vpop.xlane.xlu0 %742 }
 0x5d6   :  { %5739 = vrcp.f32 %v743_v26  ;;  %5075 = vmatmul.mubr.msk.f32.gmra.mxu1 %vm399_vm5, %v452_v43 }
 0x5d7   :  { %v5734_v12 = vpop.eup %5733  ;;  %5077 = vmatprep.mubr.msk.f32.mxu1 %vm5923_vm1, %v5922_v8 }
 0x5d8   :  { %v454_v57 = vmul.f32 %v5734_v12, %v6453_v7 }
 0x5d9   :  { %v746_v61 = vpop.xlane.xlu1 %745 }
 0x5da   :  { %5741 = vrcp.f32 %v746_v61  ;;  %5078 = vmatmul.mubr.msk.f32.gmra.mxu1 %vm399_vm5, %v454_v57 }
 0x5db   :  { %v5736_v49 = vpop.eup %5735  ;;  %5115 = vmatprep.mubr.msk.f32.mxu1 %vm5923_vm1, %v5922_v8 }
 0x5dc   :  { %v751_v63 = vmul.f32 %v5736_v49, %v6458_v14 }
 0x5dd   :  { %v749_v27 = vpop.xlane.xlu1 %748 }
 0x5de   :  { %5743 = vrcp.f32 %v749_v27  ;;  %5116 = vmatmul.mubr.msk.f32.vlgmr.msra.gmra.mxu1 %vm399_vm5, %v751_v63 }
 0x5df   :  { %v5738_v29 = vpop.eup %5737  ;;  %5156 = vmatpush3.msra.mxu1 %v6424_v58  ;;  %5118 = vmatprep.mubr.msk.f32.mxu1 %vm5923_vm1, %v5922_v8 }
 0x5e0   :  { %5157 = vmatprep.subr.mxu1 %v5922_v8  ;;  %v753_v7 = vmul.f32 %v5738_v29, %v6463_v21 }
 0x5e1   :  { %5158 = vmatpush3.msra.mxu1 %v6422_v55  ;;  %v1042_v37 = vpop.xlane.xlu0 %1041 }
 0x5e2   :  { %5745 = vrcp.f32 %v1042_v37  ;;  %5159 = vmatprep.subr.mxu1 %v5922_v8  ;;  %5119 = vmatmul.mubr.msk.f32.gmra.mxu1 %vm399_vm5, %v753_v7  ;;  %v1570_v7 = vld [vmem:[%s7912_s2 + $0x70] sm:$0xff] }
 0x5e3   :  { %v5740_v14 = vpop.eup %5739  ;;  %5160 = vmatpush3.msra.mxu1 %v6276_v45  ;;  %5121 = vmatprep.mubr.msk.f32.mxu1 %vm5923_vm1, %v5922_v8 }
 0x5e4   :  { %5161 = vmatprep.subr.mxu1 %v5922_v8  ;;  %v755_v58 = vmul.f32 %v5740_v14, %v6467_v39  ;;  %5231 = vmatpush3.msra.mxu0 %v1570_v7 }
 0x5e5   :  { %5162 = vmatpush3.msra.mxu1 %v6426_v60  ;;  %5232 = vmatprep.subr.mxu0 %v5922_v8 }
 0x5e6   :  { %5163 = vmatprep.subr.mxu1 %v5922_v8  ;;  %5122 = vmatmul.mubr.msk.f32.gmra.mxu1 %vm399_vm5, %v755_v58 }
 0x5e7   :  { %v5742_v55 = vpop.eup %5741  ;;  %5164 = vmatpush3.msra.mxu1 %v6489_v0  ;;  %5124 = vmatprep.mubr.msk.f32.mxu1 %vm5923_vm1, %v5922_v8 }
 0x5e8   :  { %v757_v45 = vmul.f32 %v5742_v55, %v6471_v31  ;;  %5205 = vmatprep.subr.mxu1 %v5922_v8  ;;  %v1377_v31 = vpop.permute.xlu0 %1376 }
 0x5ea   :  { %5125 = vmatmul.mubr.msk.f32.gmra.mxu1 %vm399_vm5, %v757_v45 }
 0x5eb   :  { %v5744_v21 = vpop.eup %5743  ;;  %5127 = vmatprep.mubr.msk.f32.mxu1 %vm5923_vm1, %v5922_v8 }
 0x5ec   :  { %v759_v60 = vmul.f32 %v5744_v21, %v6475_v47  ;;  %v1375_v47 = vpop.permute.xlu1 %1374 }
 0x5ee   :  { %5128 = vmatmul.mubr.msk.f32.gmra.mxu1 %vm399_vm5, %v759_v60 }
 0x5ef   :  { %v5746_v39 = vpop.eup %5745  ;;  %5165 = vmatprep.mubr.msk.f32.mxu1 %vm5923_vm1, %v5922_v8 }
 0x5f0   :  { %v1056_v0 = vmul.f32 %v5746_v39, %v6479_v10  ;;  %v1569_v39 = vld [vmem:[%s7912_s2 + $0x68] sm:$0xff] }
 0x5f1   :  { %5233 = vmatpush3.msra.mxu0 %v1569_v39 }
 0x5f2   :  { %5166 = vmatmul.mubr.msk.f32.vlgmr.msra.gmra.mxu1 %vm399_vm5, %v1056_v0  ;;  %v1568_v0 = vld [vmem:[%s7912_s2 + $0x60] sm:$0xff]  ;;  %5234 = vmatprep.subr.mxu0 %v5922_v8 }
 0x5f3   :  { %5206 = vmatpush3.msra.mxu1 %v6487_v15  ;;  %5168 = vmatprep.mubr.msk.f32.mxu1 %vm5923_vm1, %v5922_v8 }
 0x5f4   :  { %5207 = vmatprep.subr.mxu1 %v5922_v8  ;;  %5235 = vmatpush3.msra.mxu0 %v1568_v0 }
 0x5f5   :  { %5208 = vmatpush3.msra.mxu1 %v1377_v31  ;;  %v1567_v31 = vld [vmem:[%s7912_s2 + $0x58] sm:$0xff]  ;;  %5236 = vmatprep.subr.mxu0 %v5922_v8 }
 0x5f6   :  { %5209 = vmatprep.subr.mxu1 %v5922_v8  ;;  %5237 = vmatpush3.msra.mxu0 %v1567_v31 }
 0x5f7   :  { %5210 = vmatpush3.msra.mxu1 %v1375_v47  ;;  %5276 = vmatprep.subr.mxu0 %v5922_v8 }
 0x5f8   :  { %5211 = vmatprep.subr.mxu1 %v5922_v8 }
 0x612   :  { %v1045_v51 = vpop.xlane.xlu1 %1044 }
 0x613   :  { %5747 = vrcp.f32 %v1045_v51 }
 0x616   :  { %v1048_v10 = vpop.xlane.xlu0 %1047 }
 0x617   :  { %5749 = vrcp.f32 %v1048_v10  ;;  %v1051_v35 = vpop.xlane.xlu1 %1050 }
 0x618   :  { %5751 = vrcp.f32 %v1051_v35 }
 0x61b   :  { %v1054_v15 = vpop.xlane.xlu1 %1053  ;;  %v1347_v48 = vpop.xlane.xlu0 %1346 }
 0x61c   :  { %5753 = vrcp.f32 %v1054_v15 }
 0x61d   :  { %5755 = vrcp.f32 %v1347_v48 }
 0x61f   :  { %v1350_v40 = vpop.xlane.xlu1 %1349  ;;  %v1353_v16 = vpop.xlane.xlu0 %1352 }
 0x620   :  { %v5748_v1 = vpop.eup %5747  ;;  %5757 = vrcp.f32 %v1350_v40 }
 0x621   :  { %v1058_v2 = vmul.f32 %v5748_v1, %v6500_v4  ;;  %5759 = vrcp.f32 %v1353_v16 }
 0x623   :  { %v1356_v9 = vpop.xlane.xlu1 %1355  ;;  %5169 = vmatmul.mubr.msk.f32.gmra.mxu1 %vm399_vm5, %v1058_v2 }
 0x624   :  { %v5750_v56 = vpop.eup %5749  ;;  %5171 = vmatprep.mubr.msk.f32.mxu1 %vm5923_vm1, %v5922_v8  ;;  %5761 = vrcp.f32 %v1356_v9 }
 0x625   :  { %v1060_v13 = vmul.f32 %v5750_v56, %v6504_v36  ;;  %v5752_v28 = vpop.eup %5751  ;;  %v1371_v36 = vpop.permute.xlu0 %1370 }
 0x626   :  { %v1062_v4 = vmul.f32 %v5752_v28, %v6506_v44 }
 0x627   :  { %v1359_v23 = vpop.xlane.xlu1 %1358  ;;  %5172 = vmatmul.mubr.msk.f32.gmra.mxu1 %vm399_vm5, %v1060_v13 }
 0x628   :  { %5174 = vmatprep.mubr.msk.f32.mxu1 %vm5923_vm1, %v5922_v8  ;;  %5763 = vrcp.f32 %v1359_v23 }
 0x629   :  { %v5754_v18 = vpop.eup %5753 }
 0x62a   :  { %v1064_v33 = vmul.f32 %v5754_v18, %v6512_v41  ;;  %v5756_v25 = vpop.eup %5755 }
 0x62b   :  { %v1373_v19 = vpop.permute.xlu1 %1372  ;;  %5175 = vmatmul.mubr.msk.f32.gmra.mxu1 %vm399_vm5, %v1062_v4  ;;  %v1361_v44 = vmul.f32 %v5756_v25, %v6514_v20 }
 0x62c   :  { %5212 = vmatpush3.msra.mxu1 %v1373_v19  ;;  %5177 = vmatprep.mubr.msk.f32.mxu1 %vm5923_vm1, %v5922_v8 }
 0x62d   :  { %5213 = vmatprep.subr.mxu1 %v5922_v8  ;;  %v5758_v62 = vpop.eup %5757 }
 0x62e   :  { %5214 = vmatpush3.msra.mxu1 %v1371_v36  ;;  %v1363_v41 = vmul.f32 %v5758_v62, %v6520_v5  ;;  %v5760_v54 = vpop.eup %5759 }
 0x62f   :  { %5178 = vmatmul.mubr.msk.f32.gmra.mxu1 %vm399_vm5, %v1064_v33  ;;  %5253 = vmatprep.subr.mxu1 %v5922_v8  ;;  %v1365_v50 = vmul.f32 %v5760_v54, %v6522_v24 }
 0x630   :  { %5215 = vmatprep.mubr.msk.f32.mxu1 %vm5923_vm1, %v5922_v8 }
 0x631   :  { %v5762_v53 = vpop.eup %5761 }
 0x632   :  { %v1367_v20 = vmul.f32 %v5762_v53, %v6528_v11 }
 0x633   :  { %5216 = vmatmul.mubr.msk.f32.vlgmr.msra.gmra.mxu1 %vm399_vm5, %v1361_v44 }
 0x634   :  { %5218 = vmatprep.mubr.msk.f32.mxu1 %vm5923_vm1, %v5922_v8 }
 0x635   :  { %v5764_v22 = vpop.eup %5763 }
 0x636   :  { %v1369_v5 = vmul.f32 %v5764_v22, %v6532_v59 }
 0x637   :  { %5219 = vmatmul.mubr.msk.f32.gmra.mxu1 %vm399_vm5, %v1363_v41 }
 0x638   :  { %5221 = vmatprep.mubr.msk.f32.mxu1 %vm5923_vm1, %v5922_v8 }
 0x63b   :  { %5222 = vmatmul.mubr.msk.f32.gmra.mxu1 %vm399_vm5, %v1365_v50 }
 0x63c   :  { %5224 = vmatprep.mubr.msk.f32.mxu1 %vm5923_vm1, %v5922_v8 }
 0x63f   :  { %5225 = vmatmul.mubr.msk.f32.gmra.mxu1 %vm399_vm5, %v1367_v20 }
 0x640   :  { %5227 = vmatprep.mubr.msk.f32.mxu1 %vm5923_vm1, %v5922_v8 }
 0x643   :  { %5228 = vmatmul.mubr.msk.f32.gmra.mxu1 %vm399_vm5, %v1369_v5 }
 0x644   :  { %5261 = vmatprep.mubr.msk.f32.mxu1 %vm5923_vm1, %v5922_v8 }
 0x68a   :  { %v6646_v24 = vpop.f32.mrf.mxu1 }
 0x68c   :  { %v5067_v52 = vpop.f32.mrf.mxu1 }
 0x68e   :  { %v6648_v32 = vpop.f32.mrf.mxu1 }
 0x690   :  { %v5070_v6 = vpop.f32.mrf.mxu1 }
 0x692   :  { %v6650_v11 = vpop.f32.mrf.mxu1 }
 0x694   :  { %v5073_v43 = vpop.f32.mrf.mxu1 }
 0x696   :  { %v6652_v26 = vpop.f32.mrf.mxu1 }
 0x698   :  { %v5076_v12 = vpop.f32.mrf.mxu1 }
 0x69a   :  { %v6654_v57 = vpop.f32.mrf.mxu1 }
 0x69c   :  { %v5079_v59 = vpop.f32.mrf.mxu1 }
 0x69e   :  { %v856_v61 = vpop.f32.mrf.mxu1 }
 0x69f   :  { %1495 = vrot.lane.b32.xlu1 %v856_v61, %s5936_s4 }
 0x6a0   :  { %v5117_v49 = vpop.f32.mrf.mxu1 }
 0x6a2   :  { %v861_v63 = vpop.f32.mrf.mxu1 }
 0x6a3   :  { %1497 = vrot.lane.b32.xlu0 %v861_v63, %s5936_s4 }
 0x6a4   :  { %v5120_v27 = vpop.f32.mrf.mxu1 }
 0x6a6   :  { %v866_v29 = vpop.f32.mrf.mxu1 }
 0x6a7   :  { %1499 = vrot.lane.b32.xlu1 %v866_v29, %s5936_s4 }
 0x6a8   :  { %v5123_v37 = vpop.f32.mrf.mxu1 }
 0x6aa   :  { %v871_v14 = vpop.f32.mrf.mxu1 }
 0x6ac   :  { %v5126_v58 = vpop.f32.mrf.mxu1 }
 0x6ae   :  { %v876_v55 = vpop.f32.mrf.mxu1 }
 0x6b0   :  { %v5129_v45 = vpop.f32.mrf.mxu1 }
 0x6b2   :  { %v1161_v21 = vpop.f32.mrf.mxu1 }
 0x6b3   :  { %1515 = vrot.lane.b32.xlu0 %v1161_v21, %s5937_s7 }
 0x6b4   :  { %v5167_v60 = vpop.f32.mrf.mxu1 }
 0x6e3   :  { %v1166_v47 = vpop.f32.mrf.mxu1 }
 0x6e4   :  { %1517 = vrot.lane.b32.xlu1 %v1166_v47, %s5937_s7 }
 0x6e5   :  { %v5170_v51 = vpop.f32.mrf.mxu1 }
 0x6e7   :  { %v1171_v10 = vpop.f32.mrf.mxu1 }
 0x6e8   :  { %1519 = vrot.lane.b32.xlu0 %v1171_v10, %s5937_s7 }
 0x6e9   :  { %v5173_v35 = vpop.f32.mrf.mxu1 }
 0x6eb   :  { %v1176_v15 = vpop.f32.mrf.mxu1 }
 0x6ed   :  { %v5176_v48 = vpop.f32.mrf.mxu1 }
 0x6ef   :  { %v1181_v40 = vpop.f32.mrf.mxu1 }
 0x6f1   :  { %v5179_v1 = vpop.f32.mrf.mxu1 }
 0x6f3   :  { %v1466_v2 = vpop.f32.mrf.mxu1 }
 0x6f4   :  { %1535 = vrot.lane.b32.xlu1 %v1466_v2, %s5938_s23 }
 0x6f5   :  { %v5217_v9 = vpop.f32.mrf.mxu1 }
 0x6f7   :  { %v1471_v56 = vpop.f32.mrf.mxu1 }
 0x6f8   :  { %1521 = vrot.lane.b32.xlu1 %v1176_v15, %s5937_s7  ;;  %1537 = vrot.lane.b32.xlu0 %v1471_v56, %s5938_s23 }
 0x6f9   :  { %v5220_v13 = vpop.f32.mrf.mxu1 }
 0x6fb   :  { %v1476_v28 = vpop.f32.mrf.mxu1 }
 0x6fc   :  { %1501 = vrot.lane.b32.xlu0 %v871_v14, %s5936_s4  ;;  %1539 = vrot.lane.b32.xlu1 %v1476_v28, %s5938_s23 }
 0x6fd   :  { %v5223_v16 = vpop.f32.mrf.mxu1 }
 0x6ff   :  { %v1481_v23 = vpop.f32.mrf.mxu1 }
 0x700   :  { %1503 = vrot.lane.b32.xlu1 %v876_v55, %s5936_s4  ;;  %1541 = vrot.lane.b32.xlu0 %v1481_v23, %s5938_s23  ;;  %v4601_v55 = vld [vmem:[%s7912_s2 + $0x78] ss:$0 sm:$0xff] }
 0x701   :  { %v5226_v4 = vpop.f32.mrf.mxu1 }
 0x703   :  { %v1486_v18 = vpop.f32.mrf.mxu1 }
 0x704   :  { %1523 = vrot.lane.b32.xlu0 %v1181_v40, %s5937_s7  ;;  %1543 = vrot.lane.b32.xlu1 %v1486_v18, %s5938_s23 }
 0x705   :  { %v5229_v19 = vpop.f32.mrf.mxu1 }
 0x711   :  { %v1496_v36 = vpop.permute.xlu1 %1495 }
 0x712   :  { %v1550_v41 = vsel %vm54_vm4, %v6646_v24, %v1496_v36 }
 0x715   :  { %v1498_v33 = vpop.permute.xlu0 %1497 }
 0x716   :  { %v1551_v22 = vsel %vm54_vm4, %v6648_v32, %v1498_v33 }
 0x719   :  { %v1500_v25 = vpop.permute.xlu1 %1499 }
 0x71a   :  { %v1552_v43 = vsel %vm54_vm4, %v6650_v11, %v1500_v25 }
 0x725   :  { %v1516_v44 = vpop.permute.xlu0 %1515 }
 0x726   :  { %v1556_v54 = vsel %vm1555_vm6, %v1550_v41, %v1516_v44 }
 0x756   :  { %v1518_v62 = vpop.permute.xlu1 %1517 }
 0x757   :  { %v1557_v5 = vsel %vm1555_vm6, %v1551_v22, %v1518_v62 }
 0x75a   :  { %v1520_v50 = vpop.permute.xlu0 %1519 }
 0x75b   :  { %v1558_v12 = vsel %vm1555_vm6, %v1552_v43, %v1520_v50 }
 0x766   :  { %v1536_v53 = vpop.permute.xlu1 %1535 }
 0x767   :  { %v1562_v20 = vsel %vm1561_vm7, %v1556_v54, %v1536_v53 }
 0x768   :  { %5239 = vmatmul.mubr.msk.f32.vlgmr.msra.gmra.mxu0 %vm16_vm0, %v1562_v20 }
 0x769   :  { %5241 = vmatprep.mubr.msk.f32.mxu0 %vm5923_vm1, %v5922_v8 }
 0x76a   :  { %v1538_v52 = vpop.permute.xlu0 %1537  ;;  %v1522_v6 = vpop.permute.xlu1 %1521 }
 0x76b   :  { %v1563_v24 = vsel %vm1561_vm7, %v1557_v5, %v1538_v52 }
 0x76c   :  { %5242 = vmatmul.mubr.msk.f32.gmra.mxu0 %vm16_vm0, %v1563_v24 }
 0x76d   :  { %5244 = vmatprep.mubr.msk.f32.mxu0 %vm5923_vm1, %v5922_v8 }
 0x76e   :  { %v1502_v32 = vpop.permute.xlu0 %1501  ;;  %v1540_v59 = vpop.permute.xlu1 %1539 }
 0x76f   :  { %v1553_v61 = vsel %vm54_vm4, %v6652_v26, %v1502_v32  ;;  %v1564_v49 = vsel %vm1561_vm7, %v1558_v12, %v1540_v59 }
 0x770   :  { %5245 = vmatmul.mubr.msk.f32.gmra.mxu0 %vm16_vm0, %v1564_v49  ;;  %v1559_v11 = vsel %vm1555_vm6, %v1553_v61, %v1522_v6  ;;  %v1774_v49 = vld [vmem:[%s7912_s2 + $0x98] sm:$0xff] }
 0x771   :  { %5247 = vmatprep.mubr.msk.f32.mxu0 %vm5923_vm1, %v5922_v8  ;;  %5254 = vmatpush3.msra.mxu1 %v1774_v49 }
 0x772   :  { %v1542_v63 = vpop.permute.xlu0 %1541  ;;  %v1504_v27 = vpop.permute.xlu1 %1503  ;;  %5255 = vmatprep.subr.mxu1 %v5922_v8 }
 0x773   :  { %v1565_v29 = vsel %vm1561_vm7, %v1559_v11, %v1542_v63  ;;  %v1554_v26 = vsel %vm54_vm4, %v6654_v57, %v1504_v27  ;;  %v1773_v63 = vld [vmem:[%s7912_s2 + $0x90] sm:$0xff]  ;;  %v1772_v11 = vld [vmem:[%s7912_s2 + $0x88] sm:$0xff]  ;;  %v1771_v27 = vld [vmem:[%s7912_s2 + $0x80] sm:$0xff] }
 0x774   :  { %5248 = vmatmul.mubr.msk.f32.gmra.mxu0 %vm16_vm0, %v1565_v29  ;;  %5256 = vmatpush3.msra.mxu1 %v1773_v63  ;;  %v1897_v29 = vld [vmem:[%s7912_s2 + $0xe0] sm:$0xff] }
 0x775   :  { %5250 = vmatprep.mubr.msk.f32.mxu0 %vm5923_vm1, %v5922_v8  ;;  %5257 = vmatprep.subr.mxu1 %v5922_v8 }
 0x776   :  { %v1524_v7 = vpop.permute.xlu0 %1523  ;;  %v1544_v37 = vpop.permute.xlu1 %1543  ;;  %5258 = vmatpush3.msra.mxu1 %v1772_v11  ;;  %5277 = vmatpush3.msra.mxu0 %v1897_v29 }
 0x777   :  { %v1560_v14 = vsel %vm1555_vm6, %v1554_v26, %v1524_v7  ;;  %5259 = vmatprep.subr.mxu1 %v5922_v8  ;;  %v1896_v26 = vld [vmem:[%s7912_s2 + $0xd8] sm:$0xff]  ;;  %5278 = vmatprep.subr.mxu0 %v5922_v8  ;;  %v1895_v7 = vld [vmem:[%s7912_s2 + $0xd0] sm:$0xff] }
 0x778   :  { %v1566_v58 = vsel %vm1561_vm7, %v1560_v14, %v1544_v37  ;;  %5260 = vmatpush3.msra.mxu1 %v1771_v27  ;;  %5279 = vmatpush3.msra.mxu0 %v1896_v26  ;;  %v1894_v37 = vld [vmem:[%s7912_s2 + $0xc8] sm:$0xff]  ;;  %v1893_v14 = vld [vmem:[%s7912_s2 + $0xc0] sm:$0xff] }
 0x779   :  { %5251 = vmatmul.mubr.msk.f32.gmra.mxu0 %vm16_vm0, %v1566_v58  ;;  %5307 = vmatprep.subr.mxu1 %v5922_v8 }
 0x77a   :  { %5292 = vmatprep.mubr.msk.f32.mxu0 %vm5923_vm1, %v5922_v8  ;;  %5280 = vmatprep.subr.mxu0 %v5922_v8 }
 0x77b   :  { %5281 = vmatpush3.msra.mxu0 %v1895_v7 }
 0x77c   :  { %5282 = vmatprep.subr.mxu0 %v5922_v8 }
 0x77d   :  { %5283 = vmatpush3.msra.mxu0 %v1894_v37 }
 0x77e   :  { %5284 = vmatprep.subr.mxu0 %v5922_v8 }
 0x77f   :  { %5285 = vmatpush3.msra.mxu0 %v1893_v14 }
 0x780   :  { %5286 = vmatprep.subr.mxu0 %v5922_v8 }
 0x828   :  { %v1657_v45 = vpop.f32.mrf.mxu0 }
 0x829   :  { %v1658_v21 = vadd.f32 %v4601_v55, %v1657_v45 }
 0x82a   :  { %v5240_v60 = vpop.f32.mrf.mxu0 }
 0x82b   :  { %v1681_v57 = vadd.f32 %v1658_v21, %v6018_v30 }
 0x82c   :  { %v1662_v39 = vpop.f32.mrf.mxu0 }
 0x82d   :  { %v1663_v0 = vadd.f32 %v4601_v55, %v1662_v39  ;;  %v1688_v31 = vsel %vm16_vm0, %v1681_v57, 0.0 }
 0x82e   :  { %1689 = vadd.xlane.f32.xlu0 %v1688_v31  ;;  %v5243_v47 = vpop.f32.mrf.mxu0 }
 0x82f   :  { %v1682_v51 = vadd.f32 %v1663_v0, %v6027_v34 }
 0x830   :  { %v1667_v10 = vpop.f32.mrf.mxu0 }
 0x831   :  { %v1668_v35 = vadd.f32 %v4601_v55, %v1667_v10  ;;  %v1691_v15 = vsel %vm16_vm0, %v1682_v51, 0.0 }
 0x832   :  { %1692 = vadd.xlane.f32.xlu1 %v1691_v15  ;;  %v5246_v48 = vpop.f32.mrf.mxu0 }
 0x833   :  { %v1683_v40 = vadd.f32 %v1668_v35, %v6036_v38  ;;  %v4607_v48 = vld [vmem:[%s7912_s2 + $0xf0] ss:$0 sm:$0xff] }
 0x834   :  { %v1672_v1 = vpop.f32.mrf.mxu0 }
 0x835   :  { %v1673_v2 = vadd.f32 %v4601_v55, %v1672_v1  ;;  %v1694_v30 = vsel %vm16_vm0, %v1683_v40, 0.0 }
 0x836   :  { %1695 = vadd.xlane.f32.xlu0 %v1694_v30  ;;  %v5249_v9 = vpop.f32.mrf.mxu0  ;;  %v4608_v30 = vld [vmem:[%s7912_s2 + $0xf8] ss:$0 sm:$0xff] }
 0x837   :  { %v1684_v56 = vadd.f32 %v1673_v2, %v6045_v42 }
 0x839   :  { %v1677_v13 = vpop.f32.mrf.mxu0  ;;  %v1697_v28 = vsel %vm16_vm0, %v1684_v56, 0.0 }
 0x83a   :  { %v1678_v34 = vadd.f32 %v4601_v55, %v1677_v13  ;;  %1698 = vadd.xlane.f32.xlu0 %v1697_v28 }
 0x83b   :  { %v5252_v16 = vpop.f32.mrf.mxu0 }
 0x83c   :  { %v1685_v23 = vadd.f32 %v1678_v34, %v6054_v46 }
 0x83e   :  { %v1700_v4 = vsel %vm16_vm0, %v1685_v23, 0.0 }
 0x83f   :  { %1701 = vadd.xlane.f32.xlu1 %v1700_v4 }
 0x8b7   :  { %v1690_v38 = vpop.xlane.xlu0 %1689 }
 0x8b8   :  { %v1703_v18 = vmul.f32 0.03125, %v1690_v38 }
 0x8ba   :  { %v6735_v19 = vsub.f32 %v1681_v57, %v1703_v18 }
 0x8bb   :  { %v1693_v36 = vpop.xlane.xlu1 %1692 }
 0x8bc   :  { %v1704_v33 = vmul.f32 0.03125, %v1693_v36  ;;  %v1713_v42 = vmul.f32 %v6735_v19, %v6735_v19 }
 0x8be   :  { %v6739_v25 = vsub.f32 %v1682_v51, %v1704_v33  ;;  %v1718_v44 = vsel %vm16_vm0, %v1713_v42, 0.0 }
 0x8bf   :  { %v1696_v62 = vpop.xlane.xlu0 %1695  ;;  %1719 = vadd.xlane.f32.xlu0 %v1718_v44 }
 0x8c0   :  { %v1705_v41 = vmul.f32 0.03125, %v1696_v62  ;;  %v1714_v46 = vmul.f32 %v6739_v25, %v6739_v25 }
 0x8c2   :  { %v6744_v54 = vsub.f32 %v1683_v40, %v1705_v41  ;;  %v1721_v50 = vsel %vm16_vm0, %v1714_v46, 0.0  ;;  %v1892_v46 = vld [vmem:[%s7912_s2 + $0xb8] sm:$0xff] }
 0x8c3   :  { %v1699_v53 = vpop.xlane.xlu0 %1698  ;;  %1722 = vadd.xlane.f32.xlu1 %v1721_v50  ;;  %5287 = vmatpush3.msra.mxu0 %v1892_v46  ;;  %v1890_v50 = vld [vmem:[%s7912_s2 + $0xa8] sm:$0xff] }
 0x8c4   :  { %v1706_v20 = vmul.f32 0.03125, %v1699_v53  ;;  %v1715_v22 = vmul.f32 %v6744_v54, %v6744_v54  ;;  %5288 = vmatprep.subr.mxu0 %v5922_v8  ;;  %v4609_v53 = vld [vmem:[%s7912_s2 + $0xa0] ss:$0 sm:$0xff] }
 0x8c6   :  { %v6749_v5 = vsub.f32 %v1684_v56, %v1706_v20  ;;  %v1724_v52 = vsel %vm16_vm0, %v1715_v22, 0.0 }
 0x8c7   :  { %1725 = vadd.xlane.f32.xlu0 %v1724_v52 }
 0x8c8   :  { %v1702_v6 = vpop.xlane.xlu1 %1701  ;;  %v1716_v24 = vmul.f32 %v6749_v5, %v6749_v5 }
 0x8c9   :  { %v1707_v43 = vmul.f32 0.03125, %v1702_v6 }
 0x8ca   :  { %v1727_v12 = vsel %vm16_vm0, %v1716_v24, 0.0 }
 0x8cb   :  { %v6755_v32 = vsub.f32 %v1685_v23, %v1707_v43  ;;  %1728 = vadd.xlane.f32.xlu1 %v1727_v12 }
 0x8cd   :  { %v1717_v59 = vmul.f32 %v6755_v32, %v6755_v32 }
 0x8cf   :  { %v1730_v61 = vsel %vm16_vm0, %v1717_v59, 0.0 }
 0x8d0   :  { %1731 = vadd.xlane.f32.xlu0 %v1730_v61 }
 0x948   :  { %v1720_v58 = vpop.xlane.xlu0 %1719 }
 0x949   :  { %v1733_v55 = vmul.f32 0.03125, %v1720_v58  ;;  %v4615_v58 = vld [vmem:[%s7912_s2 + $0xe8] ss:$0 sm:$0xff] }
 0x94b   :  { %v1738_v45 = vadd.f32 1e-05, %v1733_v55 }
 0x94c   :  { %v1723_v21 = vpop.xlane.xlu1 %1722 }
 0x94d   :  { %5765 = vrsqrt.f32 %v1738_v45  ;;  %v1734_v60 = vmul.f32 0.03125, %v1723_v21 }
 0x94f   :  { %v1739_v57 = vadd.f32 1e-05, %v1734_v60 }
 0x950   :  { %v1726_v39 = vpop.xlane.xlu0 %1725 }
 0x951   :  { %5767 = vrsqrt.f32 %v1739_v57  ;;  %v1735_v0 = vmul.f32 0.03125, %v1726_v39 }
 0x953   :  { %v1740_v31 = vadd.f32 1e-05, %v1735_v0 }
 0x954   :  { %v1729_v47 = vpop.xlane.xlu1 %1728 }
 0x955   :  { %5769 = vrsqrt.f32 %v1740_v31  ;;  %v1736_v51 = vmul.f32 0.03125, %v1729_v47 }
 0x957   :  { %v1741_v10 = vadd.f32 1e-05, %v1736_v51 }
 0x959   :  { %5771 = vrsqrt.f32 %v1741_v10  ;;  %v1732_v35 = vpop.xlane.xlu0 %1731 }
 0x95a   :  { %v5766_v15 = vpop.eup %5765  ;;  %v1737_v40 = vmul.f32 0.03125, %v1732_v35 }
 0x95b   :  { %v1748_v1 = vmul.f32 %v5766_v15, %v6735_v19 }
 0x95c   :  { %v1742_v2 = vadd.f32 1e-05, %v1737_v40 }
 0x95d   :  { %v1757_v9 = vmul.f32 %v4607_v48, %v1748_v1 }
 0x95e   :  { %v5768_v56 = vpop.eup %5767  ;;  %5773 = vrsqrt.f32 %v1742_v2 }
 0x95f   :  { %v6803_v13 = vadd.f32 %v4608_v30, %v1757_v9  ;;  %v1749_v28 = vmul.f32 %v5768_v56, %v6739_v25 }
 0x961   :  { %5262 = vmatmul.mubr.msk.f32.vlgmr.msra.gmra.mxu1 %vm16_vm0, %v6803_v13  ;;  %v1758_v34 = vmul.f32 %v4607_v48, %v1749_v28 }
 0x962   :  { %v5770_v16 = vpop.eup %5769  ;;  %5264 = vmatprep.mubr.msk.f32.mxu1 %vm5923_vm1, %v5922_v8 }
 0x963   :  { %v6810_v23 = vadd.f32 %v4608_v30, %v1758_v34  ;;  %v1750_v4 = vmul.f32 %v5770_v16, %v6744_v54  ;;  %v1891_v54 = vld [vmem:[%s7912_s2 + $0xb0] sm:$0xff] }
 0x964   :  { %5289 = vmatpush3.msra.mxu0 %v1891_v54 }
 0x965   :  { %5265 = vmatmul.mubr.msk.f32.gmra.mxu1 %vm16_vm0, %v6810_v23  ;;  %v1759_v38 = vmul.f32 %v4607_v48, %v1750_v4  ;;  %5290 = vmatprep.subr.mxu0 %v5922_v8 }
 0x966   :  { %v5772_v18 = vpop.eup %5771  ;;  %5267 = vmatprep.mubr.msk.f32.mxu1 %vm5923_vm1, %v5922_v8  ;;  %5291 = vmatpush3.msra.mxu0 %v1890_v50 }
 0x967   :  { %v6817_v19 = vadd.f32 %v4608_v30, %v1759_v38  ;;  %v1751_v36 = vmul.f32 %v5772_v18, %v6749_v5  ;;  %5330 = vmatprep.subr.mxu0 %v5922_v8 }
 0x969   :  { %5268 = vmatmul.mubr.msk.f32.gmra.mxu1 %vm16_vm0, %v6817_v19  ;;  %v1760_v33 = vmul.f32 %v4607_v48, %v1751_v36 }
 0x96a   :  { %5270 = vmatprep.mubr.msk.f32.mxu1 %vm5923_vm1, %v5922_v8 }
 0x96b   :  { %v5774_v42 = vpop.eup %5773  ;;  %v6824_v25 = vadd.f32 %v4608_v30, %v1760_v33 }
 0x96c   :  { %v1752_v44 = vmul.f32 %v5774_v42, %v6755_v32 }
 0x96d   :  { %5271 = vmatmul.mubr.msk.f32.gmra.mxu1 %vm16_vm0, %v6824_v25 }
 0x96e   :  { %5273 = vmatprep.mubr.msk.f32.mxu1 %vm5923_vm1, %v5922_v8  ;;  %v1761_v62 = vmul.f32 %v4607_v48, %v1752_v44 }
 0x970   :  { %v6831_v41 = vadd.f32 %v4608_v30, %v1761_v62 }
 0x972   :  { %5274 = vmatmul.mubr.msk.f32.gmra.mxu1 %vm16_vm0, %v6831_v41 }
 0x973   :  { %5315 = vmatprep.mubr.msk.f32.mxu1 %vm5923_vm1, %v5922_v8 }
 0xa21   :  { %v1861_v20 = vpop.f32.mrf.mxu1 }
 0xa22   :  { %v1862_v22 = vadd.f32 %v4609_v53, %v1861_v20 }
 0xa23   :  { %v5263_v5 = vpop.f32.mrf.mxu1 }
 0xa24   :  { %v1885_v52 = vmax.f32 %v1862_v22, 0.0 }
 0xa25   :  { %v1866_v6 = vpop.f32.mrf.mxu1 }
 0xa26   :  { %v1867_v24 = vadd.f32 %v4609_v53, %v1866_v6  ;;  %5293 = vmatmul.mubr.msk.f32.vlgmr.msra.gmra.mxu0 %vm1903_vm8, %v1885_v52 }
 0xa27   :  { %v5266_v43 = vpop.f32.mrf.mxu1  ;;  %5295 = vmatprep.mubr.msk.f32.mxu0 %vm5923_vm1, %v5922_v8 }
 0xa28   :  { %v1886_v12 = vmax.f32 %v1867_v24, 0.0 }
 0xa29   :  { %v1871_v32 = vpop.f32.mrf.mxu1 }
 0xa2a   :  { %v1872_v59 = vadd.f32 %v4609_v53, %v1871_v32  ;;  %5296 = vmatmul.mubr.msk.f32.gmra.mxu0 %vm1903_vm8, %v1886_v12 }
 0xa2b   :  { %v5269_v61 = vpop.f32.mrf.mxu1  ;;  %5298 = vmatprep.mubr.msk.f32.mxu0 %vm5923_vm1, %v5922_v8 }
 0xa2c   :  { %v1887_v49 = vmax.f32 %v1872_v59, 0.0  ;;  %v2102_v61 = vld [vmem:[%s7912_s2 + $0x128] sm:$0xff] }
 0xa2d   :  { %v1876_v63 = vpop.f32.mrf.mxu1  ;;  %5308 = vmatpush3.msra.mxu1 %v2102_v61 }
 0xa2e   :  { %v1877_v11 = vadd.f32 %v4609_v53, %v1876_v63  ;;  %5299 = vmatmul.mubr.msk.f32.gmra.mxu0 %vm1903_vm8, %v1887_v49  ;;  %5309 = vmatprep.subr.mxu1 %v5922_v8  ;;  %v2101_v49 = vld [vmem:[%s7912_s2 + $0x120] sm:$0xff]  ;;  %v2100_v63 = vld [vmem:[%s7912_s2 + $0x118] sm:$0xff] }
 0xa2f   :  { %v5272_v27 = vpop.f32.mrf.mxu1  ;;  %5301 = vmatprep.mubr.msk.f32.mxu0 %vm5923_vm1, %v5922_v8  ;;  %5310 = vmatpush3.msra.mxu1 %v2101_v49 }
 0xa30   :  { %v1888_v29 = vmax.f32 %v1877_v11, 0.0  ;;  %5311 = vmatprep.subr.mxu1 %v5922_v8  ;;  %v2099_v11 = vld [vmem:[%s7912_s2 + $0x110] sm:$0xff] }
 0xa31   :  { %5312 = vmatpush3.msra.mxu1 %v2100_v63 }
 0xa32   :  { %v1881_v26 = vpop.f32.mrf.mxu1  ;;  %5302 = vmatmul.mubr.msk.f32.gmra.mxu0 %vm1903_vm8, %v1888_v29  ;;  %5313 = vmatprep.subr.mxu1 %v5922_v8 }
 0xa33   :  { %v1882_v7 = vadd.f32 %v4609_v53, %v1881_v26  ;;  %5304 = vmatprep.mubr.msk.f32.mxu0 %vm5923_vm1, %v5922_v8  ;;  %5314 = vmatpush3.msra.mxu1 %v2099_v11 }
 0xa34   :  { %v5275_v37 = vpop.f32.mrf.mxu1  ;;  %5355 = vmatprep.subr.mxu1 %v5922_v8 }
 0xa35   :  { %v1889_v14 = vmax.f32 %v1882_v7, 0.0 }
 0xa37   :  { %5305 = vmatmul.mubr.msk.f32.gmra.mxu0 %vm1903_vm8, %v1889_v14 }
 0xa38   :  { %5340 = vmatprep.mubr.msk.f32.mxu0 %vm5923_vm1, %v5922_v8 }
 0xae6   :  { %v1985_v55 = vpop.f32.mrf.mxu0 }
 0xae7   :  { %v1986_v45 = vadd.f32 %v4615_v58, %v1985_v55 }
 0xae8   :  { %v5294_v21 = vpop.f32.mrf.mxu0 }
 0xae9   :  { %v2009_v60 = vadd.f32 %v1986_v45, %v6803_v13 }
 0xaea   :  { %v1990_v57 = vpop.f32.mrf.mxu0 }
 0xaeb   :  { %v1991_v39 = vadd.f32 %v4615_v58, %v1990_v57  ;;  %v2016_v0 = vsel %vm16_vm0, %v2009_v60, 0.0 }
 0xaec   :  { %2017 = vadd.xlane.f32.xlu1 %v2016_v0  ;;  %v5297_v31 = vpop.f32.mrf.mxu0 }
 0xaed   :  { %v2010_v47 = vadd.f32 %v1991_v39, %v6810_v23  ;;  %v4621_v31 = vld [vmem:[%s7912_s2 + $0x100] ss:$0 sm:$0xff] }
 0xaee   :  { %v1995_v51 = vpop.f32.mrf.mxu0 }
 0xaef   :  { %v1996_v10 = vadd.f32 %v4615_v58, %v1995_v51  ;;  %v2019_v35 = vsel %vm16_vm0, %v2010_v47, 0.0 }
 0xaf0   :  { %2020 = vadd.xlane.f32.xlu0 %v2019_v35  ;;  %v5300_v15 = vpop.f32.mrf.mxu0  ;;  %v4622_v35 = vld [vmem:[%s7912_s2 + $0x108] ss:$0 sm:$0xff] }
 0xaf1   :  { %v2011_v48 = vadd.f32 %v1996_v10, %v6817_v19 }
 0xaf2   :  { %v2000_v40 = vpop.f32.mrf.mxu0 }
 0xaf3   :  { %v2001_v1 = vadd.f32 %v4615_v58, %v2000_v40  ;;  %v2022_v2 = vsel %vm16_vm0, %v2011_v48, 0.0 }
 0xaf4   :  { %2023 = vadd.xlane.f32.xlu1 %v2022_v2  ;;  %v5303_v30 = vpop.f32.mrf.mxu0 }
 0xaf5   :  { %v2012_v9 = vadd.f32 %v2001_v1, %v6824_v25 }
 0xaf7   :  { %v2005_v56 = vpop.f32.mrf.mxu0  ;;  %v2025_v13 = vsel %vm16_vm0, %v2012_v9, 0.0 }
 0xaf8   :  { %v2006_v28 = vadd.f32 %v4615_v58, %v2005_v56  ;;  %2026 = vadd.xlane.f32.xlu0 %v2025_v13 }
 0xaf9   :  { %v5306_v34 = vpop.f32.mrf.mxu0 }
 0xafa   :  { %v2013_v16 = vadd.f32 %v2006_v28, %v6831_v41 }
 0xafc   :  { %v2028_v23 = vsel %vm16_vm0, %v2013_v16, 0.0 }
 0xafd   :  { %2029 = vadd.xlane.f32.xlu1 %v2028_v23 }
 0xb75   :  { %v2018_v4 = vpop.xlane.xlu1 %2017 }
 0xb76   :  { %v2031_v38 = vmul.f32 0.03125, %v2018_v4 }
 0xb78   :  { %v2036_v18 = vsub.f32 %v2009_v60, %v2031_v38 }
 0xb79   :  { %v2021_v19 = vpop.xlane.xlu0 %2020 }
 0xb7a   :  { %v2032_v36 = vmul.f32 0.03125, %v2021_v19  ;;  %v2041_v33 = vmul.f32 %v2036_v18, %v2036_v18 }
 0xb7c   :  { %v6880_v42 = vsub.f32 %v2010_v47, %v2032_v36  ;;  %v2046_v25 = vsel %vm16_vm0, %v2041_v33, 0.0 }
 0xb7d   :  { %v2024_v44 = vpop.xlane.xlu1 %2023  ;;  %2047 = vadd.xlane.f32.xlu0 %v2046_v25 }
 0xb7e   :  { %v2033_v62 = vmul.f32 0.03125, %v2024_v44  ;;  %v2042_v46 = vmul.f32 %v6880_v42, %v6880_v42 }
 0xb80   :  { %v6885_v41 = vsub.f32 %v2011_v48, %v2033_v62  ;;  %v2049_v54 = vsel %vm16_vm0, %v2042_v46, 0.0 }
 0xb81   :  { %v2027_v50 = vpop.xlane.xlu0 %2026  ;;  %2050 = vadd.xlane.f32.xlu1 %v2049_v54 }
 0xb82   :  { %v2034_v53 = vmul.f32 0.03125, %v2027_v50  ;;  %v2043_v20 = vmul.f32 %v6885_v41, %v6885_v41 }
 0xb84   :  { %v6890_v22 = vsub.f32 %v2012_v9, %v2034_v53  ;;  %v2052_v5 = vsel %vm16_vm0, %v2043_v20, 0.0 }
 0xb85   :  { %2053 = vadd.xlane.f32.xlu0 %v2052_v5 }
 0xb86   :  { %v2030_v52 = vpop.xlane.xlu1 %2029  ;;  %v2044_v6 = vmul.f32 %v6890_v22, %v6890_v22 }
 0xb87   :  { %v2035_v24 = vmul.f32 0.03125, %v2030_v52 }
 0xb88   :  { %v2055_v43 = vsel %vm16_vm0, %v2044_v6, 0.0 }
 0xb89   :  { %v2040_v12 = vsub.f32 %v2013_v16, %v2035_v24  ;;  %2056 = vadd.xlane.f32.xlu1 %v2055_v43 }
 0xb8b   :  { %v2045_v32 = vmul.f32 %v2040_v12, %v2040_v12 }
 0xb8d   :  { %v2058_v59 = vsel %vm16_vm0, %v2045_v32, 0.0 }
 0xb8e   :  { %2059 = vadd.xlane.f32.xlu0 %v2058_v59 }
 0xc06   :  { %v2048_v27 = vpop.xlane.xlu0 %2047 }
 0xc07   :  { %v2061_v29 = vmul.f32 0.03125, %v2048_v27 }
 0xc09   :  { %v2066_v26 = vadd.f32 1e-05, %v2061_v29 }
 0xc0a   :  { %v2051_v7 = vpop.xlane.xlu1 %2050 }
 0xc0b   :  { %5775 = vrsqrt.f32 %v2066_v26  ;;  %v2062_v37 = vmul.f32 0.03125, %v2051_v7 }
 0xc0d   :  { %v2067_v14 = vadd.f32 1e-05, %v2062_v37 }
 0xc0e   :  { %v2054_v58 = vpop.xlane.xlu0 %2053 }
 0xc0f   :  { %5777 = vrsqrt.f32 %v2067_v14  ;;  %v2063_v55 = vmul.f32 0.03125, %v2054_v58 }
 0xc11   :  { %v2068_v45 = vadd.f32 1e-05, %v2063_v55 }
 0xc12   :  { %v2057_v21 = vpop.xlane.xlu1 %2056 }
 0xc13   :  { %5779 = vrsqrt.f32 %v2068_v45  ;;  %v2064_v60 = vmul.f32 0.03125, %v2057_v21 }
 0xc15   :  { %v2069_v57 = vadd.f32 1e-05, %v2064_v60 }
 0xc17   :  { %5781 = vrsqrt.f32 %v2069_v57  ;;  %v2060_v39 = vpop.xlane.xlu0 %2059 }
 0xc18   :  { %v5776_v0 = vpop.eup %5775  ;;  %v2065_v47 = vmul.f32 0.03125, %v2060_v39 }
 0xc19   :  { %v2076_v51 = vmul.f32 %v5776_v0, %v2036_v18 }
 0xc1a   :  { %v2070_v10 = vadd.f32 1e-05, %v2065_v47 }
 0xc1b   :  { %v2085_v15 = vmul.f32 %v4621_v31, %v2076_v51 }
 0xc1c   :  { %v5778_v48 = vpop.eup %5777  ;;  %5783 = vrsqrt.f32 %v2070_v10 }
 0xc1d   :  { %v6919_v40 = vadd.f32 %v4622_v35, %v2085_v15  ;;  %v2077_v1 = vmul.f32 %v5778_v48, %v6880_v42 }
 0xc1f   :  { %5316 = vmatmul.mubr.msk.f32.vlgmr.msra.gmra.mxu1 %vm16_vm0, %v6919_v40  ;;  %v2086_v2 = vmul.f32 %v4621_v31, %v2077_v1 }
 0xc20   :  { %v5780_v30 = vpop.eup %5779  ;;  %5318 = vmatprep.mubr.msk.f32.mxu1 %vm5923_vm1, %v5922_v8 }
 0xc21   :  { %v6926_v9 = vadd.f32 %v4622_v35, %v2086_v2  ;;  %v2078_v56 = vmul.f32 %v5780_v30, %v6885_v41  ;;  %v4623_v41 = vld [vmem:[%s7912_s2 + $0x130] ss:$0 sm:$0xff] }
 0xc23   :  { %5319 = vmatmul.mubr.msk.f32.gmra.mxu1 %vm16_vm0, %v6926_v9  ;;  %v2087_v13 = vmul.f32 %v4621_v31, %v2078_v56 }
 0xc24   :  { %v5782_v28 = vpop.eup %5781  ;;  %5321 = vmatprep.mubr.msk.f32.mxu1 %vm5923_vm1, %v5922_v8 }
 0xc25   :  { %v6933_v34 = vadd.f32 %v4622_v35, %v2087_v13  ;;  %v2079_v16 = vmul.f32 %v5782_v28, %v6890_v22 }
 0xc27   :  { %5322 = vmatmul.mubr.msk.f32.gmra.mxu1 %vm16_vm0, %v6933_v34  ;;  %v2088_v23 = vmul.f32 %v4621_v31, %v2079_v16 }
 0xc28   :  { %5324 = vmatprep.mubr.msk.f32.mxu1 %vm5923_vm1, %v5922_v8 }
 0xc29   :  { %v5784_v4 = vpop.eup %5783  ;;  %v6940_v38 = vadd.f32 %v4622_v35, %v2088_v23 }
 0xc2a   :  { %v2080_v18 = vmul.f32 %v5784_v4, %v2040_v12 }
 0xc2b   :  { %5325 = vmatmul.mubr.msk.f32.gmra.mxu1 %vm16_vm0, %v6940_v38 }
 0xc2c   :  { %5327 = vmatprep.mubr.msk.f32.mxu1 %vm5923_vm1, %v5922_v8  ;;  %v2089_v19 = vmul.f32 %v4621_v31, %v2080_v18 }
 0xc2e   :  { %v6946_v36 = vadd.f32 %v4622_v35, %v2089_v19 }
 0xc30   :  { %5328 = vmatmul.mubr.msk.f32.gmra.mxu1 %vm16_vm0, %v6946_v36 }
 0xc31   :  { %5365 = vmatprep.mubr.msk.f32.mxu1 %vm5923_vm1, %v5922_v8 }
 0xcdf   :  { %v2189_v33 = vpop.f32.mrf.mxu1 }
 0xce0   :  { %v6959_v20 = vadd.f32 %v4623_v41, %v2189_v33 }
 0xce1   :  { %v5317_v42 = vpop.f32.mrf.mxu1 }
 0xce3   :  { %v2194_v25 = vpop.f32.mrf.mxu1 }
 0xce4   :  { %v6973_v24 = vadd.f32 %v4623_v41, %v2194_v25  ;;  %v7174_v25 = vld [vmem:[%s7911_s1] sm:$0xff] }
 0xce5   :  { %v5320_v44 = vpop.f32.mrf.mxu1 }
 0xce7   :  { %v2199_v62 = vpop.f32.mrf.mxu1 }
 0xce8   :  { %v6967_v6 = vadd.f32 %v4623_v41, %v2199_v62 }
 0xce9   :  { %v5323_v46 = vpop.f32.mrf.mxu1 }
 0xceb   :  { %v2204_v54 = vpop.f32.mrf.mxu1 }
 0xcec   :  { %v6955_v50 = vadd.f32 %v4623_v41, %v2204_v54  ;;  %v7184_v54 = vld [vmem:[%s7911_s1 + $0x8] sm:$0xff] }
 0xced   :  { %v5326_v53 = vpop.f32.mrf.mxu1 }
 0xcee   :  { %2224 = vrot.lane.b32.xlu0 %v6955_v50, %s5928_s11 }
 0xcf0   :  { %v2209_v22 = vpop.f32.mrf.mxu1 }
 0xcf1   :  { %v6961_v5 = vadd.f32 %v4623_v41, %v2209_v22 }
 0xcf2   :  { %2218 = vrot.lane.b32.xlu0 %v6959_v20, %s5928_s11  ;;  %v5329_v52 = vpop.f32.mrf.mxu1 }
 0xcf3   :  { %2226 = vrot.lane.b32.xlu1 %v6961_v5, %s5928_s11 }
 0xcf6   :  { %2529 = vrot.lane.b32.xlu0 %v6955_v50, %s5929_s12 }
 0xcf7   :  { %2222 = vrot.lane.b32.xlu1 %v6967_v6, %s5928_s11 }
 0xcfa   :  { %2525 = vrot.lane.b32.xlu0 %v6973_v24, %s5929_s12 }
 0xcfb   :  { %2220 = vrot.lane.b32.xlu1 %v6973_v24, %s5928_s11 }
 0xcfe   :  { %2513 = vrot.lane.b32.xlu0 %v6959_v20, %s5925_s17 }
 0xcff   :  { %2531 = vrot.lane.b32.xlu1 %v6961_v5, %s5929_s12 }
 0xd02   :  { %2515 = vrot.lane.b32.xlu0 %v6973_v24, %s5925_s17 }
 0xd03   :  { %2527 = vrot.lane.b32.xlu1 %v6967_v6, %s5929_s12 }
 0xd06   :  { %2517 = vrot.lane.b32.xlu0 %v6967_v6, %s5925_s17 }
 0xd07   :  { %2523 = vrot.lane.b32.xlu1 %v6959_v20, %s5929_s12 }
 0xd0a   :  { %2519 = vrot.lane.b32.xlu0 %v6955_v50, %s5925_s17 }
 0xd0b   :  { %2836 = vrot.lane.b32.xlu1 %v6961_v5, %s5931_s14 }
 0xd0e   :  { %2521 = vrot.lane.b32.xlu0 %v6961_v5, %s5925_s17 }
 0xd0f   :  { %2834 = vrot.lane.b32.xlu1 %v6955_v50, %s5931_s14 }
 0xd12   :  { %2818 = vrot.lane.b32.xlu0 %v6959_v20, %s5926_s20 }
 0xd13   :  { %2832 = vrot.lane.b32.xlu1 %v6967_v6, %s5931_s14 }
 0xd16   :  { %2820 = vrot.lane.b32.xlu0 %v6973_v24, %s5926_s20 }
 0xd17   :  { %2830 = vrot.lane.b32.xlu1 %v6973_v24, %s5931_s14 }
 0xd1a   :  { %2822 = vrot.lane.b32.xlu0 %v6967_v6, %s5926_s20 }
 0xd1b   :  { %2828 = vrot.lane.b32.xlu1 %v6959_v20, %s5931_s14 }
 0xd1e   :  { %2824 = vrot.lane.b32.xlu0 %v6955_v50, %s5926_s20 }
 0xd1f   :  { %3141 = vrot.lane.b32.xlu1 %v6961_v5, %s5934_s16 }
 0xd22   :  { %2826 = vrot.lane.b32.xlu0 %v6961_v5, %s5926_s20 }
 0xd23   :  { %3139 = vrot.lane.b32.xlu1 %v6955_v50, %s5934_s16 }
 0xd26   :  { %3123 = vrot.lane.b32.xlu0 %v6959_v20, %s5927_s21 }
 0xd27   :  { %3137 = vrot.lane.b32.xlu1 %v6967_v6, %s5934_s16 }
 0xd2a   :  { %3127 = vrot.lane.b32.xlu0 %v6967_v6, %s5927_s21 }
 0xd2b   :  { %3135 = vrot.lane.b32.xlu1 %v6973_v24, %s5934_s16 }
 0xd2e   :  { %3131 = vrot.lane.b32.xlu0 %v6961_v5, %s5927_s21 }
 0xd2f   :  { %3133 = vrot.lane.b32.xlu1 %v6959_v20, %s5934_s16 }
 0xd32   :  { %2399 = vrot.lane.b32.xlu0 %v6955_v50, %s5930_s13 }
 0xd33   :  { %3125 = vrot.lane.b32.xlu1 %v6973_v24, %s5927_s21 }
 0xd36   :  { %2395 = vrot.lane.b32.xlu0 %v6973_v24, %s5930_s13 }
 0xd37   :  { %3129 = vrot.lane.b32.xlu1 %v6955_v50, %s5927_s21 }
 0xd3a   :  { %2393 = vrot.lane.b32.xlu0 %v6959_v20, %s5930_s13 }
 0xd3b   :  { %2397 = vrot.lane.b32.xlu1 %v6967_v6, %s5930_s13 }
 0xd3e   :  { %2704 = vrot.lane.b32.xlu0 %v6955_v50, %s5932_s15 }
 0xd3f   :  { %2702 = vrot.lane.b32.xlu1 %v6967_v6, %s5932_s15 }
 0xd42   :  { %2700 = vrot.lane.b32.xlu0 %v6973_v24, %s5932_s15 }
 0xd43   :  { %2401 = vrot.lane.b32.xlu1 %v6961_v5, %s5930_s13 }
 0xd46   :  { %2698 = vrot.lane.b32.xlu0 %v6959_v20, %s5932_s15 }
 0xd47   :  { %2706 = vrot.lane.b32.xlu1 %v6961_v5, %s5932_s15 }
 0xd4a   :  { %3009 = vrot.lane.b32.xlu0 %v6955_v50, %s5933_s0 }
 0xd4b   :  { %3011 = vrot.lane.b32.xlu1 %v6961_v5, %s5933_s0 }
 0xd60   :  { %v2225_v43 = vpop.permute.xlu0 %2224 }
 0xd64   :  { %v2219_v12 = vpop.permute.xlu0 %2218 }
 0xd65   :  { %v2227_v32 = vpop.permute.xlu1 %2226 }
 0xd66   :  { %5331 = vmatpush3.xpose.msk.msra.mxu0 %vm54_vm4, %v2227_v32 }
 0xd67   :  { %5332 = vmatprep.subr.mxu0 %v5922_v8 }
 0xd68   :  { %v2530_v59 = vpop.permute.xlu0 %2529 }
 0xd69   :  { %v2223_v61 = vpop.permute.xlu1 %2222 }
 0xd6a   :  { %5333 = vmatpush3.xpose.msk.msra.mxu0 %vm54_vm4, %v2225_v43 }
 0xd6b   :  { %5334 = vmatprep.subr.mxu0 %v5922_v8 }
 0xd6c   :  { %v2526_v49 = vpop.permute.xlu0 %2525 }
 0xd6d   :  { %v2221_v63 = vpop.permute.xlu1 %2220 }
 0xd6e   :  { %5335 = vmatpush3.xpose.msk.msra.mxu0 %vm54_vm4, %v2223_v61 }
 0xd6f   :  { %5336 = vmatprep.subr.mxu0 %v5922_v8 }
 0xd70   :  { %v2514_v11 = vpop.permute.xlu0 %2513 }
 0xd71   :  { %v2532_v27 = vpop.permute.xlu1 %2531 }
 0xd72   :  { %5337 = vmatpush3.xpose.msk.msra.mxu0 %vm54_vm4, %v2221_v63 }
 0xd73   :  { %5338 = vmatprep.subr.mxu0 %v5922_v8 }
 0xd74   :  { %v2516_v29 = vpop.permute.xlu0 %2515 }
 0xd75   :  { %v2528_v26 = vpop.permute.xlu1 %2527 }
 0xd76   :  { %5339 = vmatpush3.xpose.msk.msra.mxu0 %vm54_vm4, %v2219_v12  ;;  %v7194_v12 = vld [vmem:[%s7911_s1 + $0x10] sm:$0xff] }
 0xd77   :  { %5380 = vmatprep.subr.mxu0 %v5922_v8 }
 0xd78   :  { %v2518_v7 = vpop.permute.xlu0 %2517 }
 0xd79   :  { %5341 = vmatmul.mubr.msk.f32.vlgmr.msra.gmra.mxu0 %vm54_vm4, %v6959_v20  ;;  %v2524_v37 = vpop.permute.xlu1 %2523 }
 0xd7a   :  { %5381 = vmatpush3.xpose.msk.msra.mxu0 %vm54_vm4, %v2532_v27  ;;  %5343 = vmatprep.mubr.msk.f32.mxu0 %vm5923_vm1, %v5922_v8  ;;  %v7204_v27 = vld [vmem:[%s7911_s1 + $0x20] sm:$0xff] }
 0xd7b   :  { %5382 = vmatprep.subr.mxu0 %v5922_v8 }
 0xd7c   :  { %v2520_v14 = vpop.permute.xlu0 %2519 }
 0xd7d   :  { %5344 = vmatmul.mubr.msk.f32.gmra.mxu0 %vm54_vm4, %v6973_v24  ;;  %v2837_v58 = vpop.permute.xlu1 %2836 }
 0xd7e   :  { %5383 = vmatpush3.xpose.msk.msra.mxu0 %vm54_vm4, %v2530_v59  ;;  %5346 = vmatprep.mubr.msk.f32.mxu0 %vm5923_vm1, %v5922_v8 }
 0xd7f   :  { %5384 = vmatprep.subr.mxu0 %v5922_v8 }
 0xd80   :  { %v2522_v55 = vpop.permute.xlu0 %2521 }
 0xd81   :  { %5347 = vmatmul.mubr.msk.f32.gmra.mxu0 %vm54_vm4, %v6967_v6  ;;  %v2835_v45 = vpop.permute.xlu1 %2834 }
 0xd82   :  { %5385 = vmatpush3.xpose.msk.msra.mxu0 %vm54_vm4, %v2528_v26  ;;  %5349 = vmatprep.mubr.msk.f32.mxu0 %vm5923_vm1, %v5922_v8 }
 0xd83   :  { %5386 = vmatprep.subr.mxu0 %v5922_v8 }
 0xd84   :  { %v2819_v21 = vpop.permute.xlu0 %2818 }
 0xd85   :  { %5350 = vmatmul.mubr.msk.f32.gmra.mxu0 %vm54_vm4, %v6955_v50  ;;  %v2833_v60 = vpop.permute.xlu1 %2832 }
 0xd86   :  { %5387 = vmatpush3.xpose.msk.msra.mxu0 %vm54_vm4, %v2526_v49  ;;  %5352 = vmatprep.mubr.msk.f32.mxu0 %vm5923_vm1, %v5922_v8 }
 0xd87   :  { %5388 = vmatprep.subr.mxu0 %v5922_v8 }
 0xd88   :  { %v2821_v57 = vpop.permute.xlu0 %2820 }
 0xd89   :  { %5353 = vmatmul.mubr.msk.f32.gmra.mxu0 %vm54_vm4, %v6961_v5  ;;  %v2831_v39 = vpop.permute.xlu1 %2830 }
 0xd8a   :  { %5389 = vmatpush3.xpose.msk.msra.mxu0 %vm54_vm4, %v2524_v37  ;;  %5390 = vmatprep.mubr.msk.f32.mxu0 %vm5923_vm1, %v5922_v8 }
 0xd8b   :  { %5430 = vmatprep.subr.mxu0 %v5922_v8 }
 0xd8c   :  { %v2823_v0 = vpop.permute.xlu0 %2822 }
 0xd8d   :  { %5391 = vmatmul.mubr.msk.f32.vlgmr.msra.gmra.mxu0 %vm54_vm4, %v2514_v11  ;;  %v2829_v31 = vpop.permute.xlu1 %2828 }
 0xd8e   :  { %5431 = vmatpush3.xpose.msk.msra.mxu0 %vm54_vm4, %v2837_v58  ;;  %5393 = vmatprep.mubr.msk.f32.mxu0 %vm5923_vm1, %v5922_v8 }
 0xd8f   :  { %5432 = vmatprep.subr.mxu0 %v5922_v8 }
 0xd90   :  { %v2825_v51 = vpop.permute.xlu0 %2824 }
 0xd91   :  { %5394 = vmatmul.mubr.msk.f32.gmra.mxu0 %vm54_vm4, %v2516_v29  ;;  %v3142_v47 = vpop.permute.xlu1 %3141 }
 0xd92   :  { %5433 = vmatpush3.xpose.msk.msra.mxu0 %vm54_vm4, %v2835_v45  ;;  %5396 = vmatprep.mubr.msk.f32.mxu0 %vm5923_vm1, %v5922_v8 }
 0xd93   :  { %5434 = vmatprep.subr.mxu0 %v5922_v8 }
 0xd94   :  { %v2827_v35 = vpop.permute.xlu0 %2826 }
 0xd95   :  { %5397 = vmatmul.mubr.msk.f32.gmra.mxu0 %vm54_vm4, %v2518_v7  ;;  %v3140_v10 = vpop.permute.xlu1 %3139 }
 0xd96   :  { %5435 = vmatpush3.xpose.msk.msra.mxu0 %vm54_vm4, %v2833_v60  ;;  %5399 = vmatprep.mubr.msk.f32.mxu0 %vm5923_vm1, %v5922_v8 }
 0xd97   :  { %5436 = vmatprep.subr.mxu0 %v5922_v8 }
 0xd98   :  { %v3124_v1 = vpop.permute.xlu0 %3123 }
 0xd99   :  { %5400 = vmatmul.mubr.msk.f32.gmra.mxu0 %vm54_vm4, %v2520_v14  ;;  %v3138_v15 = vpop.permute.xlu1 %3137 }
 0xd9a   :  { %5437 = vmatpush3.xpose.msk.msra.mxu0 %vm54_vm4, %v2831_v39  ;;  %5402 = vmatprep.mubr.msk.f32.mxu0 %vm5923_vm1, %v5922_v8 }
 0xd9b   :  { %5438 = vmatprep.subr.mxu0 %v5922_v8 }
 0xd9c   :  { %v3128_v30 = vpop.permute.xlu0 %3127 }
 0xd9d   :  { %5403 = vmatmul.mubr.msk.f32.gmra.mxu0 %vm54_vm4, %v2522_v55  ;;  %v3136_v48 = vpop.permute.xlu1 %3135 }
 0xd9e   :  { %5439 = vmatpush3.xpose.msk.msra.mxu0 %vm54_vm4, %v2829_v31  ;;  %5440 = vmatprep.mubr.msk.f32.mxu0 %vm5923_vm1, %v5922_v8 }
 0xd9f   :  { %5480 = vmatprep.subr.mxu0 %v5922_v8 }
 0xda0   :  { %v3132_v28 = vpop.permute.xlu0 %3131 }
 0xda1   :  { %5441 = vmatmul.mubr.msk.f32.vlgmr.msra.gmra.mxu0 %vm54_vm4, %v2819_v21  ;;  %v3134_v2 = vpop.permute.xlu1 %3133 }
 0xda2   :  { %5481 = vmatpush3.xpose.msk.msra.mxu0 %vm54_vm4, %v3142_v47  ;;  %5443 = vmatprep.mubr.msk.f32.mxu0 %vm5923_vm1, %v5922_v8 }
 0xda3   :  { %5482 = vmatprep.subr.mxu0 %v5922_v8 }
 0xda4   :  { %v2400_v23 = vpop.permute.xlu0 %2399 }
 0xda5   :  { %5444 = vmatmul.mubr.msk.f32.gmra.mxu0 %vm54_vm4, %v2821_v57  ;;  %v3126_v56 = vpop.permute.xlu1 %3125 }
 0xda6   :  { %5483 = vmatpush3.xpose.msk.msra.mxu0 %vm54_vm4, %v3140_v10  ;;  %5446 = vmatprep.mubr.msk.f32.mxu0 %vm5923_vm1, %v5922_v8 }
 0xda7   :  { %5484 = vmatprep.subr.mxu0 %v5922_v8 }
 0xda8   :  { %v2396_v19 = vpop.permute.xlu0 %2395 }
 0xda9   :  { %5447 = vmatmul.mubr.msk.f32.gmra.mxu0 %vm54_vm4, %v2823_v0  ;;  %v3130_v13 = vpop.permute.xlu1 %3129 }
 0xdaa   :  { %5485 = vmatpush3.xpose.msk.msra.mxu0 %vm54_vm4, %v3138_v15  ;;  %5449 = vmatprep.mubr.msk.f32.mxu0 %vm5923_vm1, %v5922_v8 }
 0xdab   :  { %5486 = vmatprep.subr.mxu0 %v5922_v8 }
 0xdac   :  { %v2394_v33 = vpop.permute.xlu0 %2393 }
 0xdad   :  { %5450 = vmatmul.mubr.msk.f32.gmra.mxu0 %vm54_vm4, %v2825_v51  ;;  %v2398_v16 = vpop.permute.xlu1 %2397 }
 0xdae   :  { %5487 = vmatpush3.xpose.msk.msra.mxu0 %vm54_vm4, %v3136_v48  ;;  %5452 = vmatprep.mubr.msk.f32.mxu0 %vm5923_vm1, %v5922_v8 }
 0xdaf   :  { %5488 = vmatprep.subr.mxu0 %v5922_v8 }
 0xdb1   :  { %5453 = vmatmul.mubr.msk.f32.gmra.mxu0 %vm54_vm4, %v2827_v35  ;;  %v7145_v4 = vpop.permute.xlu1 %2702 }
 0xdb2   :  { %5489 = vmatpush3.xpose.msk.msra.mxu0 %vm54_vm4, %v3134_v2  ;;  %5490 = vmatprep.mubr.msk.f32.mxu0 %vm5923_vm1, %v5922_v8  ;;  %v5899_v2 = vld [vmem:[%s7911_s1 + $0x18] sm:$0xff] }
 0xdb3   :  { %5530 = vmatprep.subr.mxu0 %v5922_v8 }
 0xdb5   :  { %5491 = vmatmul.mubr.msk.f32.vlgmr.msra.gmra.mxu0 %vm54_vm4, %v3124_v1  ;;  %v2402_v18 = vpop.permute.xlu1 %2401 }
 0xdb6   :  { %5356 = vmatpush3.msra.mxu1 %v2402_v18  ;;  %5493 = vmatprep.mubr.msk.f32.mxu0 %vm5923_vm1, %v5922_v8 }
 0xdb7   :  { %5357 = vmatprep.subr.mxu1 %v5922_v8 }
 0xdb8   :  { %5358 = vmatpush3.msra.mxu1 %v2400_v23 }
 0xdb9   :  { %5359 = vmatprep.subr.mxu1 %v5922_v8  ;;  %5494 = vmatmul.mubr.msk.f32.gmra.mxu0 %vm54_vm4, %v3126_v56 }
 0xdba   :  { %5360 = vmatpush3.msra.mxu1 %v2398_v16  ;;  %5496 = vmatprep.mubr.msk.f32.mxu0 %vm5923_vm1, %v5922_v8 }
 0xdbb   :  { %5361 = vmatprep.subr.mxu1 %v5922_v8 }
 0xdbc   :  { %5362 = vmatpush3.msra.mxu1 %v2396_v19 }
 0xdbd   :  { %5363 = vmatprep.subr.mxu1 %v5922_v8  ;;  %5497 = vmatmul.mubr.msk.f32.gmra.mxu0 %vm54_vm4, %v3128_v30 }
 0xdbe   :  { %5364 = vmatpush3.msra.mxu1 %v2394_v33  ;;  %5499 = vmatprep.mubr.msk.f32.mxu0 %vm5923_vm1, %v5922_v8 }
 0xdbf   :  { %5405 = vmatprep.subr.mxu1 %v5922_v8 }
 0xdc1   :  { %5500 = vmatmul.mubr.msk.f32.gmra.mxu0 %vm54_vm4, %v3130_v13 }
 0xdc2   :  { %5502 = vmatprep.mubr.msk.f32.mxu0 %vm5923_vm1, %v5922_v8 }
 0xdc5   :  { %5503 = vmatmul.mubr.msk.f32.gmra.mxu0 %vm54_vm4, %v3132_v28 }
 0xdc6   :  { %5538 = vmatprep.mubr.msk.f32.mxu0 %vm5923_vm1, %v5922_v8 }
 0xe39   :  { %v2314_v42 = vpop.f32.mrf.mxu0 }
 0xe3a   :  { %v7177_v44 = vadd.f32 %v7174_v25, %v2314_v42 }
 0xe3b   :  { %v5342_v62 = vpop.f32.mrf.mxu0 }
 0xe3c   :  { %v2338_v46 = vsel %vm399_vm5, %v7177_v44, -inf }
 0xe3d   :  { %2339 = vmax.xlane.f32.xlu1 %v2338_v46  ;;  %v2319_v41 = vpop.f32.mrf.mxu0 }
 0xe3e   :  { %v7187_v53 = vadd.f32 %v7184_v54, %v2319_v41 }
 0xe3f   :  { %v5345_v22 = vpop.f32.mrf.mxu0 }
 0xe40   :  { %v2341_v52 = vsel %vm399_vm5, %v7187_v53, -inf }
 0xe41   :  { %2342 = vmax.xlane.f32.xlu0 %v2341_v52  ;;  %v2324_v43 = vpop.f32.mrf.mxu0 }
 0xe42   :  { %v7197_v32 = vadd.f32 %v7194_v12, %v2324_v43 }
 0xe43   :  { %v5348_v59 = vpop.f32.mrf.mxu0 }
 0xe44   :  { %v2344_v61 = vsel %vm399_vm5, %v7197_v32, -inf }
 0xe45   :  { %2345 = vmax.xlane.f32.xlu0 %v2344_v61  ;;  %v2329_v49 = vpop.f32.mrf.mxu0 }
 0xe46   :  { %v7223_v30 = vadd.f32 %v5899_v2, %v2329_v49 }
 0xe47   :  { %v5351_v63 = vpop.f32.mrf.mxu0 }
 0xe48   :  { %v2347_v23 = vsel %vm399_vm5, %v7223_v30, -inf }
 0xe49   :  { %v2334_v11 = vpop.f32.mrf.mxu0 }
 0xe4a   :  { %v7207_v29 = vadd.f32 %v7204_v27, %v2334_v11 }
 0xe4b   :  { %v5354_v26 = vpop.f32.mrf.mxu0 }
 0xe4c   :  { %v2350_v7 = vsel %vm399_vm5, %v7207_v29, -inf }
 0xe4d   :  { %2351 = vmax.xlane.f32.xlu0 %v2350_v7  ;;  %v2619_v37 = vpop.f32.mrf.mxu0 }
 0xe4e   :  { %3007 = vrot.lane.b32.xlu1 %v6967_v6, %s5933_s0  ;;  %v7226_v28 = vadd.f32 %v7174_v25, %v2619_v37 }
 0xe4f   :  { %v5392_v14 = vpop.f32.mrf.mxu0 }
 0xe50   :  { %v2643_v42 = vsel %vm399_vm5, %v7226_v28, -inf }
 0xe51   :  { %v2624_v58 = vpop.f32.mrf.mxu0 }
 0xe52   :  { %v7214_v55 = vadd.f32 %v7184_v54, %v2624_v58 }
 0xe53   :  { %v5395_v45 = vpop.f32.mrf.mxu0 }
 0xe54   :  { %v2646_v21 = vsel %vm399_vm5, %v7214_v55, -inf }
 0xe55   :  { %2647 = vmax.xlane.f32.xlu0 %v2646_v21  ;;  %v2629_v60 = vpop.f32.mrf.mxu0 }
 0xe56   :  { %v7231_v19 = vadd.f32 %v7194_v12, %v2629_v60 }
 0xe57   :  { %v5398_v57 = vpop.f32.mrf.mxu0 }
 0xe58   :  { %v2649_v22 = vsel %vm399_vm5, %v7231_v19, -inf }
 0xe59   :  { %v2634_v39 = vpop.f32.mrf.mxu0 }
 0xe5a   :  { %v7249_v37 = vadd.f32 %v5899_v2, %v2634_v39 }
 0xe5b   :  { %v5401_v0 = vpop.f32.mrf.mxu0 }
 0xe5c   :  { %v2652_v0 = vsel %vm399_vm5, %v7249_v37, -inf }
 0xe5d   :  { %v2639_v31 = vpop.f32.mrf.mxu0 }
 0xe5e   :  { %v7236_v46 = vadd.f32 %v7204_v27, %v2639_v31 }
 0xe5f   :  { %v5404_v47 = vpop.f32.mrf.mxu0 }
 0xe60   :  { %v2655_v61 = vsel %vm399_vm5, %v7236_v46, -inf }
 0xe61   :  { %v2924_v51 = vpop.f32.mrf.mxu0 }
 0xe62   :  { %v7257_v60 = vadd.f32 %v7174_v25, %v2924_v51 }
 0xe63   :  { %v5442_v10 = vpop.f32.mrf.mxu0 }
 0xe65   :  { %v2929_v35 = vpop.f32.mrf.mxu0 }
 0xe66   :  { %v7241_v43 = vadd.f32 %v7184_v54, %v2929_v35 }
 0xe67   :  { %v5445_v15 = vpop.f32.mrf.mxu0 }
 0xe68   :  { %v2951_v26 = vsel %vm399_vm5, %v7241_v43, -inf }
 0xe69   :  { %v2934_v48 = vpop.f32.mrf.mxu0 }
 0xe6a   :  { %v7267_v31 = vadd.f32 %v7194_v12, %v2934_v48 }
 0xe6b   :  { %3005 = vrot.lane.b32.xlu0 %v6973_v24, %s5933_s0  ;;  %v5448_v1 = vpop.f32.mrf.mxu0 }
 0xe6c   :  { %v2954_v35 = vsel %vm399_vm5, %v7267_v31, -inf }
 0xe6d   :  { %v2939_v56 = vpop.f32.mrf.mxu0 }
 0xe6e   :  { %v7245_v63 = vadd.f32 %v5899_v2, %v2939_v56 }
 0xe6f   :  { %v5451_v13 = vpop.f32.mrf.mxu0 }
 0xe70   :  { %v2957_v45 = vsel %vm399_vm5, %v7245_v63, -inf  ;;  %v7294_v13 = vpop.permute.xlu0 %2704 }
 0xe71   :  { %v2944_v16 = vpop.f32.mrf.mxu0 }
 0xe72   :  { %2348 = vmax.xlane.f32.xlu1 %v2347_v23  ;;  %v7277_v10 = vadd.f32 %v7204_v27, %v2944_v16 }
 0xe73   :  { %v5454_v18 = vpop.f32.mrf.mxu0 }
 0xe74   :  { %v2960_v48 = vsel %vm399_vm5, %v7277_v10, -inf  ;;  %v7296_v16 = vpop.permute.xlu0 %2700 }
 0xe75   :  { %v3229_v33 = vpop.f32.mrf.mxu0 }
 0xe76   :  { %2644 = vmax.xlane.f32.xlu1 %v2643_v42  ;;  %v7252_v14 = vadd.f32 %v7174_v25, %v3229_v33  ;;  %v2948_v25 = vsel %vm399_vm5, %v7257_v60, -inf }
 0xe77   :  { %v5492_v62 = vpop.f32.mrf.mxu0 }
 0xe78   :  { %v3253_v39 = vsel %vm399_vm5, %v7252_v14, -inf  ;;  %v7300_v23 = vpop.permute.xlu0 %2698 }
 0xe79   :  { %v3234_v41 = vpop.f32.mrf.mxu0 }
 0xe7a   :  { %2650 = vmax.xlane.f32.xlu1 %v2649_v22  ;;  %v7284_v15 = vadd.f32 %v7184_v54, %v3234_v41  ;;  %v7298_v54 = vpop.permute.xlu1 %2706 }
 0xe7b   :  { %v5495_v52 = vpop.f32.mrf.mxu0 }
 0xe7d   :  { %v3239_v59 = vpop.f32.mrf.mxu0 }
 0xe7e   :  { %2656 = vmax.xlane.f32.xlu1 %v2655_v61  ;;  %v7260_v57 = vadd.f32 %v7194_v12, %v3239_v59  ;;  %v7302_v18 = vpop.permute.xlu1 %3011 }
 0xe7f   :  { %v5498_v49 = vpop.f32.mrf.mxu0 }
 0xe80   :  { %v3259_v51 = vsel %vm399_vm5, %v7260_v57, -inf }
 0xe81   :  { %v3244_v11 = vpop.f32.mrf.mxu0 }
 0xe82   :  { %2952 = vmax.xlane.f32.xlu1 %v2951_v26  ;;  %v7288_v1 = vadd.f32 %v5899_v2, %v3244_v11  ;;  %v7304_v2 = vpop.permute.xlu0 %3009 }
 0xe83   :  { %v5501_v7 = vpop.f32.mrf.mxu0 }
 0xe84   :  { %v3262_v56 = vsel %vm399_vm5, %v7288_v1, -inf }
 0xe85   :  { %v3249_v58 = vpop.f32.mrf.mxu0 }
 0xe86   :  { %2958 = vmax.xlane.f32.xlu1 %v2957_v45  ;;  %v7270_v47 = vadd.f32 %v7204_v27, %v3249_v58  ;;  %v3256_v27 = vsel %vm399_vm5, %v7284_v15, -inf }
 0xe87   :  { %v5504_v21 = vpop.f32.mrf.mxu0 }
 0xe88   :  { %v3265_v12 = vsel %vm399_vm5, %v7270_v47, -inf }
 0xe8a   :  { %2653 = vmax.xlane.f32.xlu0 %v2652_v0  ;;  %3254 = vmax.xlane.f32.xlu1 %v3253_v39 }
 0xe8e   :  { %2949 = vmax.xlane.f32.xlu0 %v2948_v25  ;;  %3260 = vmax.xlane.f32.xlu1 %v3259_v51 }
 0xe92   :  { %2955 = vmax.xlane.f32.xlu0 %v2954_v35  ;;  %3266 = vmax.xlane.f32.xlu1 %v3265_v12 }
 0xe96   :  { %2961 = vmax.xlane.f32.xlu0 %v2960_v48 }
 0xe9a   :  { %3257 = vmax.xlane.f32.xlu0 %v3256_v27 }
 0xe9e   :  { %3263 = vmax.xlane.f32.xlu0 %v3262_v56 }
 0xec6   :  { %v2340_v33 = vpop.xlane.xlu1 %2339 }
 0xec7   :  { %v2353_v42 = vsub.f32 %v7177_v44, %v2340_v33 }
 0xec9   :  { %v2358_v62 = vmul.f32 1.442695, %v2353_v42 }
 0xeca   :  { %v2343_v41 = vpop.xlane.xlu0 %2342  ;;  %v7326_v39 = vpop.permute.xlu1 %3007 }
 0xecb   :  { %5785 = vpow2.f32 %v2358_v62  ;;  %v2354_v22 = vsub.f32 %v7187_v53, %v2343_v41 }
 0xecd   :  { %v2360_v52 = vmul.f32 1.442695, %v2354_v22 }
 0xece   :  { %v2346_v59 = vpop.xlane.xlu0 %2345 }
 0xecf   :  { %5787 = vpow2.f32 %v2360_v52  ;;  %v2355_v61 = vsub.f32 %v7197_v32, %v2346_v59 }
 0xed1   :  { %v2362_v49 = vmul.f32 1.442695, %v2355_v61 }
 0xed3   :  { %5789 = vpow2.f32 %v2362_v49 }
 0xed6   :  { %v2352_v11 = vpop.xlane.xlu0 %2351 }
 0xed7   :  { %v2357_v26 = vsub.f32 %v7207_v29, %v2352_v11 }
 0xed8   :  { %v7310_v7 = vpop.eup %5785 }
 0xed9   :  { %v2366_v58 = vmul.f32 1.442695, %v2357_v26  ;;  %v2368_v44 = vsel %vm399_vm5, %v7310_v7, 0.0 }
 0xeda   :  { %2369 = vadd.xlane.f32.xlu0 %v2368_v44 }
 0xedb   :  { %5791 = vpow2.f32 %v2366_v58 }
 0xedc   :  { %v7314_v45 = vpop.eup %5787 }
 0xedd   :  { %v2371_v53 = vsel %vm399_vm5, %v7314_v45, 0.0 }
 0xede   :  { %2372 = vadd.xlane.f32.xlu1 %v2371_v53  ;;  %v2648_v25 = vpop.xlane.xlu0 %2647 }
 0xedf   :  { %v2659_v51 = vsub.f32 %v7214_v55, %v2648_v25 }
 0xee0   :  { %v7318_v32 = vpop.eup %5789 }
 0xee1   :  { %v2374_v21 = vsel %vm399_vm5, %v7318_v32, 0.0  ;;  %v2665_v48 = vmul.f32 1.442695, %v2659_v51 }
 0xee2   :  { %2375 = vadd.xlane.f32.xlu0 %v2374_v21  ;;  %v7348_v26 = vpop.permute.xlu0 %3005 }
 0xee8   :  { %v7322_v29 = vpop.eup %5791 }
 0xee9   :  { %v2380_v0 = vsel %vm399_vm5, %v7322_v29, 0.0 }
 0xeea   :  { %2381 = vadd.xlane.f32.xlu0 %v2380_v0 }
 0xefb   :  { %v2349_v35 = vpop.xlane.xlu1 %2348 }
 0xefc   :  { %v2356_v12 = vsub.f32 %v7223_v30, %v2349_v35 }
 0xefe   :  { %v2364_v27 = vmul.f32 1.442695, %v2356_v12 }
 0xeff   :  { %v2645_v56 = vpop.xlane.xlu1 %2644 }
 0xf00   :  { %5793 = vpow2.f32 %v2364_v27  ;;  %v2658_v33 = vsub.f32 %v7226_v28, %v2645_v56 }
 0xf01   :  { %5795 = vpow2.f32 %v2665_v48 }
 0xf02   :  { %v2663_v42 = vmul.f32 1.442695, %v2658_v33 }
 0xf03   :  { %v2651_v62 = vpop.xlane.xlu1 %2650 }
 0xf04   :  { %5797 = vpow2.f32 %v2663_v42  ;;  %v2660_v41 = vsub.f32 %v7231_v19, %v2651_v62 }
 0xf06   :  { %v2667_v22 = vmul.f32 1.442695, %v2660_v41 }
 0xf07   :  { %v2657_v11 = vpop.xlane.xlu1 %2656 }
 0xf08   :  { %5799 = vpow2.f32 %v2667_v22  ;;  %v2662_v25 = vsub.f32 %v7236_v46, %v2657_v11 }
 0xf0a   :  { %v2671_v27 = vmul.f32 1.442695, %v2662_v25 }
 0xf0b   :  { %v2953_v44 = vpop.xlane.xlu1 %2952 }
 0xf0c   :  { %v2964_v56 = vsub.f32 %v7241_v43, %v2953_v44 }
 0xf0d   :  { %v7332_v52 = vpop.eup %5793 }
 0xf0e   :  { %v2377_v55 = vsel %vm399_vm5, %v7332_v52, 0.0  ;;  %v7336_v30 = vpop.eup %5795  ;;  %v2970_v41 = vmul.f32 1.442695, %v2964_v56 }
 0xf0f   :  { %2378 = vadd.xlane.f32.xlu1 %v2377_v55  ;;  %v2676_v61 = vsel %vm399_vm5, %v7336_v30, 0.0  ;;  %v2959_v21 = vpop.xlane.xlu1 %2958 }
 0xf11   :  { %v7338_v59 = vpop.eup %5797 }
 0xf12   :  { %v2673_v28 = vsel %vm399_vm5, %v7338_v59, 0.0 }
 0xf13   :  { %2674 = vadd.xlane.f32.xlu0 %v2673_v28  ;;  %2677 = vadd.xlane.f32.xlu1 %v2676_v61  ;;  %v2654_v58 = vpop.xlane.xlu0 %2653  ;;  %v3255_v12 = vpop.xlane.xlu1 %3254 }
 0xf14   :  { %v2661_v0 = vsub.f32 %v7249_v37, %v2654_v58  ;;  %v2966_v37 = vsub.f32 %v7245_v63, %v2959_v21  ;;  %v3268_v46 = vsub.f32 %v7252_v14, %v3255_v12 }
 0xf15   :  { %v7344_v19 = vpop.eup %5799 }
 0xf16   :  { %v2679_v49 = vsel %vm399_vm5, %v7344_v19, 0.0  ;;  %v2669_v35 = vmul.f32 1.442695, %v2661_v0  ;;  %v2974_v55 = vmul.f32 1.442695, %v2966_v37 }
 0xf17   :  { %2680 = vadd.xlane.f32.xlu0 %v2679_v49  ;;  %v2950_v53 = vpop.xlane.xlu0 %2949  ;;  %v3261_v62 = vpop.xlane.xlu1 %3260  ;;  %v3273_v43 = vmul.f32 1.442695, %v3268_v46 }
 0xf18   :  { %v2963_v48 = vsub.f32 %v7257_v60, %v2950_v53  ;;  %5801 = vpow2.f32 %v2669_v35  ;;  %v3270_v60 = vsub.f32 %v7260_v57, %v3261_v62 }
 0xf19   :  { %5803 = vpow2.f32 %v2671_v27 }
 0xf1a   :  { %v3277_v49 = vmul.f32 1.442695, %v3270_v60 }
 0xf1b   :  { %v2956_v51 = vpop.xlane.xlu0 %2955  ;;  %v3267_v61 = vpop.xlane.xlu1 %3266 }
 0xf1c   :  { %v2965_v33 = vsub.f32 %v7267_v31, %v2956_v51  ;;  %v3272_v11 = vsub.f32 %v7270_v47, %v3267_v61 }
 0xf1e   :  { %v2972_v22 = vmul.f32 1.442695, %v2965_v33  ;;  %v3281_v53 = vmul.f32 1.442695, %v3272_v11 }
 0xf1f   :  { %v2962_v42 = vpop.xlane.xlu0 %2961 }
 0xf20   :  { %v2967_v31 = vsub.f32 %v7277_v10, %v2962_v42 }
 0xf22   :  { %v2976_v63 = vmul.f32 1.442695, %v2967_v31 }
 0xf23   :  { %v3258_v28 = vpop.xlane.xlu0 %3257 }
 0xf24   :  { %3316 = vrot.lane.b32.xlu1 %v6961_v5, %s5935_s30  ;;  %v2968_v5 = vmul.f32 1.442695, %v2963_v48  ;;  %v3269_v14 = vsub.f32 %v7284_v15, %v3258_v28 }
 0xf25   :  { %v7365_v58 = vpop.eup %5801 }
 0xf26   :  { %5805 = vpow2.f32 %v2968_v5  ;;  %v7367_v57 = vpop.eup %5803  ;;  %v3275_v21 = vmul.f32 1.442695, %v3269_v14  ;;  %v2682_v10 = vsel %vm399_vm5, %v7365_v58, 0.0 }
 0xf27   :  { %5807 = vpow2.f32 %v2970_v41  ;;  %v3264_v44 = vpop.xlane.xlu0 %3263  ;;  %v2685_v35 = vsel %vm399_vm5, %v7367_v57, 0.0 }
 0xf28   :  { %5809 = vpow2.f32 %v2972_v22  ;;  %v3271_v0 = vsub.f32 %v7288_v1, %v3264_v44 }
 0xf29   :  { %5811 = vpow2.f32 %v2974_v55 }
 0xf2a   :  { %5813 = vpow2.f32 %v3273_v43  ;;  %v3279_v15 = vmul.f32 1.442695, %v3271_v0 }
 0xf2b   :  { %5815 = vpow2.f32 %v3277_v49 }
 0xf2c   :  { %5817 = vpow2.f32 %v2976_v63 }
 0xf2d   :  { %3003 = vrot.lane.b32.xlu0 %v6959_v20, %s5933_s0  ;;  %5819 = vpow2.f32 %v3281_v53 }
 0xf2e   :  { %5821 = vpow2.f32 %v3275_v21 }
 0xf2f   :  { %5823 = vpow2.f32 %v3279_v15 }
 0xf33   :  { %v7372_v25 = vpop.eup %5805 }
 0xf34   :  { %v7374_v47 = vpop.eup %5807  ;;  %v2978_v51 = vsel %vm399_vm5, %v7372_v25, 0.0 }
 0xf35   :  { %v7380_v12 = vpop.eup %5809  ;;  %v2981_v27 = vsel %vm399_vm5, %v7374_v47, 0.0 }
 0xf36   :  { %v7382_v1 = vpop.eup %5811  ;;  %v2984_v48 = vsel %vm399_vm5, %v7380_v12, 0.0 }
 0xf37   :  { %v7388_v56 = vpop.eup %5813  ;;  %v2987_v42 = vsel %vm399_vm5, %v7382_v1, 0.0 }
 0xf38   :  { %v7390_v5 = vpop.eup %5815  ;;  %v3283_v33 = vsel %vm399_vm5, %v7388_v56, 0.0 }
 0xf39   :  { %v7396_v62 = vpop.eup %5817  ;;  %v3289_v37 = vsel %vm399_vm5, %v7390_v5, 0.0 }
 0xf3a   :  { %v7398_v41 = vpop.eup %5819  ;;  %v2990_v46 = vsel %vm399_vm5, %v7396_v62, 0.0 }
 0xf3b   :  { %v7404_v22 = vpop.eup %5821  ;;  %v3295_v60 = vsel %vm399_vm5, %v7398_v41, 0.0 }
 0xf3c   :  { %v3286_v55 = vsel %vm399_vm5, %v7404_v22, 0.0  ;;  %v7410_v28 = vpop.eup %5823 }
 0xf3d   :  { %v3292_v43 = vsel %vm399_vm5, %v7410_v28, 0.0 }
 0xf48   :  { %2683 = vadd.xlane.f32.xlu1 %v2682_v10 }
 0xf4c   :  { %2979 = vadd.xlane.f32.xlu0 %v2978_v51  ;;  %2686 = vadd.xlane.f32.xlu1 %v2685_v35 }
 0xf50   :  { %2985 = vadd.xlane.f32.xlu0 %v2984_v48  ;;  %2982 = vadd.xlane.f32.xlu1 %v2981_v27 }
 0xf54   :  { %3284 = vadd.xlane.f32.xlu0 %v3283_v33  ;;  %2988 = vadd.xlane.f32.xlu1 %v2987_v42 }
 0xf58   :  { %3290 = vadd.xlane.f32.xlu0 %v3289_v37  ;;  %2991 = vadd.xlane.f32.xlu1 %v2990_v46 }
 0xf5c   :  { %3287 = vadd.xlane.f32.xlu1 %v3286_v55  ;;  %3296 = vadd.xlane.f32.xlu0 %v3295_v60 }
 0xf60   :  { %3293 = vadd.xlane.f32.xlu1 %v3292_v43 }
 0xf63   :  { %v2370_v61 = vpop.xlane.xlu0 %2369 }
 0xf64   :  { %5825 = vrcp.f32 %v2370_v61 }
 0xf67   :  { %v2373_v31 = vpop.xlane.xlu1 %2372 }
 0xf68   :  { %5827 = vrcp.f32 %v2373_v31 }
 0xf6b   :  { %v2376_v49 = vpop.xlane.xlu0 %2375 }
 0xf6c   :  { %5829 = vrcp.f32 %v2376_v49 }
 0xf71   :  { %v5826_v11 = vpop.eup %5825  ;;  %3312 = vrot.lane.b32.xlu1 %v6967_v6, %s5935_s30 }
 0xf72   :  { %v2384_v63 = vmul.f32 %v5826_v11, %v7310_v7  ;;  %3314 = vrot.lane.b32.xlu0 %v6955_v50, %s5935_s30 }
 0xf74   :  { %5366 = vmatmul.mubr.msk.f32.vlgmr.msra.gmra.mxu1 %vm399_vm5, %v2384_v63 }
 0xf75   :  { %v5828_v14 = vpop.eup %5827  ;;  %5406 = vmatpush3.msra.mxu1 %v7298_v54  ;;  %3310 = vrot.lane.b32.xlu1 %v6973_v24, %s5935_s30 }
 0xf76   :  { %5407 = vmatprep.subr.mxu1 %v5922_v8  ;;  %5368 = vmatprep.mubr.msk.f32.mxu1 %vm5923_vm1, %v5922_v8  ;;  %v2386_v6 = vmul.f32 %v5828_v14, %v7314_v45 }
 0xf77   :  { %5408 = vmatpush3.msra.mxu1 %v7294_v13 }
 0xf78   :  { %5409 = vmatprep.subr.mxu1 %v5922_v8  ;;  %5369 = vmatmul.mubr.msk.f32.gmra.mxu1 %vm399_vm5, %v2386_v6 }
 0xf79   :  { %v5830_v50 = vpop.eup %5829  ;;  %5410 = vmatpush3.msra.mxu1 %v7145_v4  ;;  %3308 = vrot.lane.b32.xlu1 %v6959_v20, %s5935_s30  ;;  %v2382_v20 = vpop.xlane.xlu0 %2381 }
 0xf7a   :  { %5411 = vmatprep.subr.mxu1 %v5922_v8  ;;  %5371 = vmatprep.mubr.msk.f32.mxu1 %vm5923_vm1, %v5922_v8  ;;  %v2388_v24 = vmul.f32 %v5830_v50, %v7318_v32 }
 0xf7b   :  { %5412 = vmatpush3.msra.mxu1 %v7296_v16 }
 0xf7c   :  { %5413 = vmatprep.subr.mxu1 %v5922_v8  ;;  %5372 = vmatmul.mubr.msk.f32.gmra.mxu1 %vm399_vm5, %v2388_v24 }
 0xf7d   :  { %5414 = vmatpush3.msra.mxu1 %v7300_v23  ;;  %5374 = vmatprep.mubr.msk.f32.mxu1 %vm5923_vm1, %v5922_v8 }
 0xf7e   :  { %5455 = vmatprep.subr.mxu1 %v5922_v8 }
 0xf98   :  { %v2379_v4 = vpop.xlane.xlu1 %2378 }
 0xf99   :  { %5831 = vrcp.f32 %v2379_v4 }
 0xf9a   :  { %5833 = vrcp.f32 %v2382_v20 }
 0xf9c   :  { %v2675_v13 = vpop.xlane.xlu0 %2674  ;;  %v2678_v54 = vpop.xlane.xlu1 %2677 }
 0xf9d   :  { %5835 = vrcp.f32 %v2675_v13 }
 0xf9e   :  { %5837 = vrcp.f32 %v2678_v54 }
 0xfa0   :  { %v2681_v16 = vpop.xlane.xlu0 %2680 }
 0xfa1   :  { %5839 = vrcp.f32 %v2681_v16 }
 0xfa6   :  { %v5832_v7 = vpop.eup %5831 }
 0xfa7   :  { %v2390_v45 = vmul.f32 %v5832_v7, %v7332_v52  ;;  %v5834_v32 = vpop.eup %5833 }
 0xfa8   :  { %v2392_v23 = vmul.f32 %v5834_v32, %v7322_v29 }
 0xfa9   :  { %5375 = vmatmul.mubr.msk.f32.gmra.mxu1 %vm399_vm5, %v2390_v45 }
 0xfaa   :  { %5377 = vmatprep.mubr.msk.f32.mxu1 %vm5923_vm1, %v5922_v8  ;;  %v5836_v44 = vpop.eup %5835 }
 0xfab   :  { %v2689_v53 = vmul.f32 %v5836_v44, %v7338_v59  ;;  %v5838_v21 = vpop.eup %5837  ;;  %v3004_v59 = vpop.permute.xlu0 %3003 }
 0xfac   :  { %v2691_v29 = vmul.f32 %v5838_v21, %v7336_v30 }
 0xfad   :  { %5378 = vmatmul.mubr.msk.f32.gmra.mxu1 %vm399_vm5, %v2392_v23 }
 0xfae   :  { %5415 = vmatprep.mubr.msk.f32.mxu1 %vm5923_vm1, %v5922_v8  ;;  %v5840_v52 = vpop.eup %5839 }
 0xfb1   :  { %5416 = vmatmul.mubr.msk.f32.vlgmr.msra.gmra.mxu1 %vm399_vm5, %v2689_v53 }
 0xfb2   :  { %5456 = vmatpush3.msra.mxu1 %v7302_v18  ;;  %5418 = vmatprep.mubr.msk.f32.mxu1 %vm5923_vm1, %v5922_v8  ;;  %v2693_v18 = vmul.f32 %v5840_v52, %v7344_v19 }
 0xfb3   :  { %5457 = vmatprep.subr.mxu1 %v5922_v8 }
 0xfb4   :  { %5458 = vmatpush3.msra.mxu1 %v7304_v2  ;;  %v3317_v2 = vpop.permute.xlu1 %3316 }
 0xfb5   :  { %5459 = vmatprep.subr.mxu1 %v5922_v8  ;;  %5419 = vmatmul.mubr.msk.f32.gmra.mxu1 %vm399_vm5, %v2691_v29 }
 0xfb6   :  { %5460 = vmatpush3.msra.mxu1 %v7326_v39  ;;  %5421 = vmatprep.mubr.msk.f32.mxu1 %vm5923_vm1, %v5922_v8 }
 0xfb7   :  { %5461 = vmatprep.subr.mxu1 %v5922_v8 }
 0xfb8   :  { %5462 = vmatpush3.msra.mxu1 %v7348_v26 }
 0xfb9   :  { %5463 = vmatprep.subr.mxu1 %v5922_v8  ;;  %5422 = vmatmul.mubr.msk.f32.gmra.mxu1 %vm399_vm5, %v2693_v18 }
 0xfba   :  { %5464 = vmatpush3.msra.mxu1 %v3004_v59  ;;  %5424 = vmatprep.mubr.msk.f32.mxu1 %vm5923_vm1, %v5922_v8 }
 0xfbb   :  { %5505 = vmatprep.subr.mxu1 %v5922_v8 }
 0xfd1   :  { %v2684_v39 = vpop.xlane.xlu1 %2683 }
 0xfd2   :  { %5841 = vrcp.f32 %v2684_v39 }
 0xfd5   :  { %v2980_v30 = vpop.xlane.xlu0 %2979  ;;  %v2687_v0 = vpop.xlane.xlu1 %2686 }
 0xfd6   :  { %5843 = vrcp.f32 %v2687_v0  ;;  %v3505_v0 = vld [vmem:[%s7912_s2 + $0x148] sm:$0xff] }
 0xfd7   :  { %5845 = vrcp.f32 %v2980_v30  ;;  %v3506_v30 = vld [vmem:[%s7912_s2 + $0x150] sm:$0xff] }
 0xfd8   :  { %5531 = vmatpush3.msra.mxu0 %v3506_v30 }
 0xfd9   :  { %v2986_v19 = vpop.xlane.xlu0 %2985  ;;  %v2983_v26 = vpop.xlane.xlu1 %2982  ;;  %5532 = vmatprep.subr.mxu0 %v5922_v8 }
 0xfda   :  { %5847 = vrcp.f32 %v2983_v26  ;;  %v3504_v26 = vld [vmem:[%s7912_s2 + $0x140] sm:$0xff]  ;;  %5533 = vmatpush3.msra.mxu0 %v3505_v0 }
 0xfdb   :  { %5849 = vrcp.f32 %v2986_v19  ;;  %5534 = vmatprep.subr.mxu0 %v5922_v8 }
 0xfdc   :  { %5535 = vmatpush3.msra.mxu0 %v3504_v26 }
 0xfdd   :  { %v3285_v10 = vpop.xlane.xlu0 %3284  ;;  %v2989_v15 = vpop.xlane.xlu1 %2988  ;;  %5536 = vmatprep.subr.mxu0 %v5922_v8 }
 0xfde   :  { %5851 = vrcp.f32 %v2989_v15 }
 0xfdf   :  { %v5842_v51 = vpop.eup %5841 }
 0xfe0   :  { %v2695_v35 = vmul.f32 %v5842_v51, %v7365_v58 }
 0xfe1   :  { %v3291_v48 = vpop.xlane.xlu0 %3290  ;;  %v2992_v27 = vpop.xlane.xlu1 %2991 }
 0xfe2   :  { %5425 = vmatmul.mubr.msk.f32.gmra.mxu1 %vm399_vm5, %v2695_v35  ;;  %5853 = vrcp.f32 %v2992_v27 }
 0xfe3   :  { %5427 = vmatprep.mubr.msk.f32.mxu1 %vm5923_vm1, %v5922_v8  ;;  %v5844_v33 = vpop.eup %5843  ;;  %5855 = vrcp.f32 %v3285_v10 }
 0xfe4   :  { %v2697_v37 = vmul.f32 %v5844_v33, %v7367_v57  ;;  %v5846_v46 = vpop.eup %5845 }
 0xfe5   :  { %v3288_v42 = vpop.xlane.xlu1 %3287  ;;  %v3297_v55 = vpop.xlane.xlu0 %3296  ;;  %v2994_v58 = vmul.f32 %v5846_v46, %v7372_v25 }
 0xfe6   :  { %5428 = vmatmul.mubr.msk.f32.gmra.mxu1 %vm399_vm5, %v2697_v37  ;;  %5857 = vrcp.f32 %v3288_v42  ;;  %v3503_v42 = vld [vmem:[%s7912_s2 + $0x138] sm:$0xff] }
 0xfe7   :  { %5465 = vmatprep.mubr.msk.f32.mxu1 %vm5923_vm1, %v5922_v8  ;;  %v5848_v43 = vpop.eup %5847  ;;  %5859 = vrcp.f32 %v3291_v48  ;;  %5537 = vmatpush3.msra.mxu0 %v3503_v42 }
 0xfe8   :  { %v2996_v31 = vmul.f32 %v5848_v43, %v7374_v47  ;;  %v5850_v49 = vpop.eup %5849  ;;  %5576 = vmatprep.subr.mxu0 %v5922_v8 }
 0xfe9   :  { %v3294_v60 = vpop.xlane.xlu1 %3293  ;;  %v3315_v57 = vpop.permute.xlu0 %3314  ;;  %v2998_v11 = vmul.f32 %v5850_v49, %v7380_v12 }
 0xfea   :  { %5466 = vmatmul.mubr.msk.f32.vlgmr.msra.gmra.mxu1 %vm399_vm5, %v2994_v58  ;;  %5861 = vrcp.f32 %v3294_v60 }
 0xfeb   :  { %5506 = vmatpush3.msra.mxu1 %v3317_v2  ;;  %5468 = vmatprep.mubr.msk.f32.mxu1 %vm5923_vm1, %v5922_v8  ;;  %v5852_v63 = vpop.eup %5851  ;;  %5863 = vrcp.f32 %v3297_v55 }
 0xfec   :  { %5507 = vmatprep.subr.mxu1 %v5922_v8  ;;  %v3000_v14 = vmul.f32 %v5852_v63, %v7382_v1 }
 0xfed   :  { %v3313_v61 = vpop.permute.xlu1 %3312  ;;  %5508 = vmatpush3.msra.mxu1 %v3315_v57 }
 0xfee   :  { %5509 = vmatprep.subr.mxu1 %v5922_v8  ;;  %5469 = vmatmul.mubr.msk.f32.gmra.mxu1 %vm399_vm5, %v2996_v31 }
 0xfef   :  { %5510 = vmatpush3.msra.mxu1 %v3313_v61  ;;  %5471 = vmatprep.mubr.msk.f32.mxu1 %vm5923_vm1, %v5922_v8  ;;  %v5854_v6 = vpop.eup %5853 }
 0xff0   :  { %5511 = vmatprep.subr.mxu1 %v5922_v8  ;;  %v3002_v12 = vmul.f32 %v5854_v6, %v7396_v62  ;;  %v5856_v50 = vpop.eup %5855 }
 0xff1   :  { %v3311_v25 = vpop.permute.xlu1 %3310  ;;  %v3299_v1 = vmul.f32 %v5856_v50, %v7388_v56 }
 0xff2   :  { %5512 = vmatpush3.msra.mxu1 %v3311_v25 }
 0xff3   :  { %5472 = vmatmul.mubr.msk.f32.gmra.mxu1 %vm399_vm5, %v2998_v11  ;;  %5513 = vmatprep.subr.mxu1 %v5922_v8  ;;  %v5858_v24 = vpop.eup %5857 }
 0xff4   :  { %5474 = vmatprep.mubr.msk.f32.mxu1 %vm5923_vm1, %v5922_v8  ;;  %v3301_v20 = vmul.f32 %v5858_v24, %v7404_v22  ;;  %v5860_v4 = vpop.eup %5859 }
 0xff5   :  { %v3309_v47 = vpop.permute.xlu1 %3308  ;;  %v3303_v62 = vmul.f32 %v5860_v4, %v7390_v5 }
 0xff6   :  { %5514 = vmatpush3.msra.mxu1 %v3309_v47 }
 0xff7   :  { %5475 = vmatmul.mubr.msk.f32.gmra.mxu1 %vm399_vm5, %v3000_v14  ;;  %5553 = vmatprep.subr.mxu1 %v5922_v8  ;;  %v5862_v13 = vpop.eup %5861 }
 0xff8   :  { %5477 = vmatprep.mubr.msk.f32.mxu1 %vm5923_vm1, %v5922_v8  ;;  %v3305_v56 = vmul.f32 %v5862_v13, %v7410_v28  ;;  %v5864_v54 = vpop.eup %5863 }
 0xff9   :  { %v3307_v22 = vmul.f32 %v5864_v54, %v7398_v41 }
 0xffb   :  { %5478 = vmatmul.mubr.msk.f32.gmra.mxu1 %vm399_vm5, %v3002_v12 }
 0xffc   :  { %5515 = vmatprep.mubr.msk.f32.mxu1 %vm5923_vm1, %v5922_v8 }
 0xfff   :  { %5516 = vmatmul.mubr.msk.f32.vlgmr.msra.gmra.mxu1 %vm399_vm5, %v3299_v1 }
0x1000   :  { %5518 = vmatprep.mubr.msk.f32.mxu1 %vm5923_vm1, %v5922_v8 }
0x1003   :  { %5519 = vmatmul.mubr.msk.f32.gmra.mxu1 %vm399_vm5, %v3301_v20 }
0x1004   :  { %5521 = vmatprep.mubr.msk.f32.mxu1 %vm5923_vm1, %v5922_v8 }
0x1007   :  { %5522 = vmatmul.mubr.msk.f32.gmra.mxu1 %vm399_vm5, %v3303_v62 }
0x1008   :  { %5524 = vmatprep.mubr.msk.f32.mxu1 %vm5923_vm1, %v5922_v8 }
0x100b   :  { %5525 = vmatmul.mubr.msk.f32.gmra.mxu1 %vm399_vm5, %v3305_v56 }
0x100c   :  { %5527 = vmatprep.mubr.msk.f32.mxu1 %vm5923_vm1, %v5922_v8 }
0x100f   :  { %5528 = vmatmul.mubr.msk.f32.gmra.mxu1 %vm399_vm5, %v3307_v22 }
0x1010   :  { %5561 = vmatprep.mubr.msk.f32.mxu1 %vm5923_vm1, %v5922_v8 }
0x1034   :  { %v7526_v5 = vpop.f32.mrf.mxu1 }
0x1036   :  { %v5367_v16 = vpop.f32.mrf.mxu1 }
0x1038   :  { %v7528_v7 = vpop.f32.mrf.mxu1 }
0x103a   :  { %v5370_v45 = vpop.f32.mrf.mxu1 }
0x103c   :  { %v7530_v28 = vpop.f32.mrf.mxu1 }
0x103e   :  { %v5373_v32 = vpop.f32.mrf.mxu1 }
0x1069   :  { %v7532_v23 = vpop.f32.mrf.mxu1 }
0x106b   :  { %v5376_v44 = vpop.f32.mrf.mxu1 }
0x106d   :  { %v7534_v53 = vpop.f32.mrf.mxu1 }
0x106f   :  { %v5379_v41 = vpop.f32.mrf.mxu1 }
0x1071   :  { %v2794_v21 = vpop.f32.mrf.mxu1 }
0x1072   :  { %3433 = vrot.lane.b32.xlu1 %v2794_v21, %s5936_s4 }
0x1073   :  { %v5417_v29 = vpop.f32.mrf.mxu1 }
0x1075   :  { %v2799_v52 = vpop.f32.mrf.mxu1 }
0x1077   :  { %v5420_v18 = vpop.f32.mrf.mxu1 }
0x1079   :  { %v2804_v59 = vpop.f32.mrf.mxu1 }
0x107b   :  { %v5423_v2 = vpop.f32.mrf.mxu1 }
0x10a2   :  { %v2809_v39 = vpop.f32.mrf.mxu1 }
0x10a4   :  { %v5426_v19 = vpop.f32.mrf.mxu1 }
0x10a5   :  { %v4689_v19 = vld [vmem:[%s7912_s2 + $0x158] ss:$0 sm:$0xff] }
0x10a6   :  { %v2814_v10 = vpop.f32.mrf.mxu1 }
0x10a8   :  { %v5429_v15 = vpop.f32.mrf.mxu1 }
0x10aa   :  { %v3099_v51 = vpop.f32.mrf.mxu1 }
0x10ab   :  { %3453 = vrot.lane.b32.xlu0 %v3099_v51, %s5937_s7 }
0x10ac   :  { %v5467_v35 = vpop.f32.mrf.mxu1 }
0x10ae   :  { %v3104_v48 = vpop.f32.mrf.mxu1 }
0x10af   :  { %3435 = vrot.lane.b32.xlu0 %v2799_v52, %s5936_s4 }
0x10b0   :  { %v5470_v27 = vpop.f32.mrf.mxu1 }
0x10b3   :  { %v3109_v33 = vpop.f32.mrf.mxu1 }
0x10b5   :  { %v5473_v37 = vpop.f32.mrf.mxu1 }
0x10b7   :  { %v3114_v46 = vpop.f32.mrf.mxu1 }
0x10b9   :  { %v5476_v55 = vpop.f32.mrf.mxu1 }
0x10bb   :  { %v3119_v58 = vpop.f32.mrf.mxu1 }
0x10bd   :  { %v5479_v60 = vpop.f32.mrf.mxu1 }
0x10bf   :  { %v3404_v43 = vpop.f32.mrf.mxu1 }
0x10c0   :  { %3473 = vrot.lane.b32.xlu1 %v3404_v43, %s5938_s23 }
0x10c1   :  { %v5517_v57 = vpop.f32.mrf.mxu1 }
0x10c3   :  { %v3409_v61 = vpop.f32.mrf.mxu1 }
0x10c4   :  { %3455 = vrot.lane.b32.xlu1 %v3104_v48, %s5937_s7  ;;  %3475 = vrot.lane.b32.xlu0 %v3409_v61, %s5938_s23 }
0x10c5   :  { %v5520_v31 = vpop.f32.mrf.mxu1 }
0x10c7   :  { %v3414_v49 = vpop.f32.mrf.mxu1 }
0x10c8   :  { %3437 = vrot.lane.b32.xlu1 %v2804_v59, %s5936_s4  ;;  %3457 = vrot.lane.b32.xlu0 %v3109_v33, %s5937_s7 }
0x10c9   :  { %v5523_v25 = vpop.f32.mrf.mxu1 }
0x10cb   :  { %v3419_v11 = vpop.f32.mrf.mxu1 }
0x10cc   :  { %3459 = vrot.lane.b32.xlu1 %v3114_v46, %s5937_s7  ;;  %3439 = vrot.lane.b32.xlu0 %v2809_v39, %s5936_s4 }
0x10cd   :  { %v5526_v63 = vpop.f32.mrf.mxu1 }
0x10cf   :  { %v3424_v47 = vpop.f32.mrf.mxu1 }
0x10d0   :  { %3477 = vrot.lane.b32.xlu1 %v3414_v49, %s5938_s23  ;;  %3479 = vrot.lane.b32.xlu0 %v3419_v11, %s5938_s23 }
0x10d1   :  { %v5529_v14 = vpop.f32.mrf.mxu1 }
0x10d4   :  { %3441 = vrot.lane.b32.xlu1 %v2814_v10, %s5936_s4  ;;  %3461 = vrot.lane.b32.xlu0 %v3119_v58, %s5937_s7 }
0x10d8   :  { %3481 = vrot.lane.b32.xlu1 %v3424_v47, %s5938_s23 }
0x10e4   :  { %v3434_v12 = vpop.permute.xlu1 %3433 }
0x10e5   :  { %v3488_v50 = vsel %vm54_vm4, %v7526_v5, %v3434_v12 }
0x111d   :  { %v3454_v6 = vpop.permute.xlu0 %3453 }
0x111e   :  { %v3493_v1 = vsel %vm1555_vm6, %v3488_v50, %v3454_v6 }
0x1121   :  { %v3436_v24 = vpop.permute.xlu0 %3435 }
0x1122   :  { %v3489_v62 = vsel %vm54_vm4, %v7528_v7, %v3436_v24 }
0x1132   :  { %v3474_v20 = vpop.permute.xlu1 %3473 }
0x1133   :  { %v3498_v4 = vsel %vm1561_vm7, %v3493_v1, %v3474_v20 }
0x1134   :  { %5539 = vmatmul.mubr.msk.f32.vlgmr.msra.gmra.mxu0 %vm16_vm0, %v3498_v4 }
0x1135   :  { %5541 = vmatprep.mubr.msk.f32.mxu0 %vm5923_vm1, %v5922_v8 }
0x1136   :  { %v3476_v13 = vpop.permute.xlu0 %3475  ;;  %v3456_v56 = vpop.permute.xlu1 %3455 }
0x1137   :  { %v3494_v54 = vsel %vm1555_vm6, %v3489_v62, %v3456_v56 }
0x1138   :  { %v3499_v22 = vsel %vm1561_vm7, %v3494_v54, %v3476_v13 }
0x1139   :  { %5542 = vmatmul.mubr.msk.f32.gmra.mxu0 %vm16_vm0, %v3499_v22 }
0x113a   :  { %v3458_v5 = vpop.permute.xlu0 %3457  ;;  %v3438_v16 = vpop.permute.xlu1 %3437  ;;  %5544 = vmatprep.mubr.msk.f32.mxu0 %vm5923_vm1, %v5922_v8 }
0x113b   :  { %v3490_v44 = vsel %vm54_vm4, %v7530_v28, %v3438_v16 }
0x113c   :  { %v3495_v7 = vsel %vm1555_vm6, %v3490_v44, %v3458_v5 }
0x113e   :  { %v3440_v45 = vpop.permute.xlu0 %3439  ;;  %v3460_v32 = vpop.permute.xlu1 %3459 }
0x113f   :  { %v3491_v29 = vsel %vm54_vm4, %v7532_v23, %v3440_v45 }
0x1140   :  { %v3496_v18 = vsel %vm1555_vm6, %v3491_v29, %v3460_v32  ;;  %v3710_v29 = vld [vmem:[%s7912_s2 + $0x178] sm:$0xff] }
0x1141   :  { %5554 = vmatpush3.msra.mxu1 %v3710_v29 }
0x1142   :  { %v3480_v41 = vpop.permute.xlu0 %3479  ;;  %v3478_v21 = vpop.permute.xlu1 %3477  ;;  %5555 = vmatprep.subr.mxu1 %v5922_v8 }
0x1143   :  { %v3500_v52 = vsel %vm1561_vm7, %v3495_v7, %v3478_v21  ;;  %v3501_v2 = vsel %vm1561_vm7, %v3496_v18, %v3480_v41  ;;  %v3708_v18 = vld [vmem:[%s7912_s2 + $0x168] sm:$0xff] }
0x1144   :  { %5545 = vmatmul.mubr.msk.f32.gmra.mxu0 %vm16_vm0, %v3500_v52  ;;  %v3709_v52 = vld [vmem:[%s7912_s2 + $0x170] sm:$0xff] }
0x1145   :  { %5547 = vmatprep.mubr.msk.f32.mxu0 %vm5923_vm1, %v5922_v8  ;;  %5556 = vmatpush3.msra.mxu1 %v3709_v52 }
0x1146   :  { %v3442_v59 = vpop.permute.xlu1 %3441  ;;  %v3462_v28 = vpop.permute.xlu0 %3461  ;;  %5557 = vmatprep.subr.mxu1 %v5922_v8 }
0x1147   :  { %v3492_v39 = vsel %vm54_vm4, %v7534_v53, %v3442_v59  ;;  %5558 = vmatpush3.msra.mxu1 %v3708_v18  ;;  %v3707_v59 = vld [vmem:[%s7912_s2 + $0x160] sm:$0xff] }
0x1148   :  { %5548 = vmatmul.mubr.msk.f32.gmra.mxu0 %vm16_vm0, %v3501_v2  ;;  %v3497_v23 = vsel %vm1555_vm6, %v3492_v39, %v3462_v28  ;;  %5559 = vmatprep.subr.mxu1 %v5922_v8  ;;  %v3833_v2 = vld [vmem:[%s7912_s2 + $0x1c0] sm:$0xff]  ;;  %v3832_v28 = vld [vmem:[%s7912_s2 + $0x1b8] sm:$0xff]  ;;  %v3831_v39 = vld [vmem:[%s7912_s2 + $0x1b0] sm:$0xff] }
0x1149   :  { %5550 = vmatprep.mubr.msk.f32.mxu0 %vm5923_vm1, %v5922_v8  ;;  %5560 = vmatpush3.msra.mxu1 %v3707_v59 }
0x114a   :  { %v3482_v30 = vpop.permute.xlu1 %3481  ;;  %5607 = vmatprep.subr.mxu1 %v5922_v8  ;;  %5577 = vmatpush3.msra.mxu0 %v3833_v2 }
0x114b   :  { %v3502_v0 = vsel %vm1561_vm7, %v3497_v23, %v3482_v30  ;;  %5578 = vmatprep.subr.mxu0 %v5922_v8  ;;  %v3830_v23 = vld [vmem:[%s7912_s2 + $0x1a8] sm:$0xff]  ;;  %v3829_v30 = vld [vmem:[%s7912_s2 + $0x1a0] sm:$0xff] }
0x114c   :  { %5551 = vmatmul.mubr.msk.f32.gmra.mxu0 %vm16_vm0, %v3502_v0 }
0x114d   :  { %5592 = vmatprep.mubr.msk.f32.mxu0 %vm5923_vm1, %v5922_v8  ;;  %5579 = vmatpush3.msra.mxu0 %v3832_v28 }
0x114e   :  { %5580 = vmatprep.subr.mxu0 %v5922_v8 }
0x114f   :  { %5581 = vmatpush3.msra.mxu0 %v3831_v39 }
0x1150   :  { %5582 = vmatprep.subr.mxu0 %v5922_v8 }
0x1151   :  { %5583 = vmatpush3.msra.mxu0 %v3830_v23 }
0x1152   :  { %5584 = vmatprep.subr.mxu0 %v5922_v8 }
0x1153   :  { %5585 = vmatpush3.msra.mxu0 %v3829_v30 }
0x1154   :  { %5586 = vmatprep.subr.mxu0 %v5922_v8 }
0x11f4   :  { %v3593_v53 = vpop.f32.mrf.mxu0 }
0x11f5   :  { %v3594_v26 = vadd.f32 %v4689_v19, %v3593_v53 }
0x11f6   :  { %v5540_v10 = vpop.f32.mrf.mxu0 }
0x11f7   :  { %v3617_v15 = vadd.f32 %v3594_v26, %v6919_v40 }
0x11f9   :  { %v3598_v51 = vpop.f32.mrf.mxu0  ;;  %v3624_v35 = vsel %vm16_vm0, %v3617_v15, 0.0 }
0x11fa   :  { %v3599_v48 = vadd.f32 %v4689_v19, %v3598_v51  ;;  %3625 = vadd.xlane.f32.xlu0 %v3624_v35 }
0x11fb   :  { %v5543_v27 = vpop.f32.mrf.mxu0 }
0x11fc   :  { %v3618_v33 = vadd.f32 %v3599_v48, %v6926_v9  ;;  %v4695_v27 = vld [vmem:[%s7912_s2 + $0x1d0] ss:$0 sm:$0xff] }
0x11fe   :  { %v3627_v42 = vsel %vm16_vm0, %v3618_v33, 0.0 }
0x11ff   :  { %3628 = vadd.xlane.f32.xlu1 %v3627_v42 }
0x1204   :  { %v3603_v37 = vpop.f32.mrf.mxu0 }
0x1205   :  { %v3604_v46 = vadd.f32 %v4689_v19, %v3603_v37 }
0x1206   :  { %v5546_v55 = vpop.f32.mrf.mxu0 }
0x1207   :  { %v3619_v58 = vadd.f32 %v3604_v46, %v6933_v34  ;;  %v4696_v46 = vld [vmem:[%s7912_s2 + $0x1d8] ss:$0 sm:$0xff] }
0x1208   :  { %v3608_v60 = vpop.f32.mrf.mxu0 }
0x1209   :  { %v3609_v43 = vadd.f32 %v4689_v19, %v3608_v60  ;;  %v3630_v40 = vsel %vm16_vm0, %v3619_v58, 0.0 }
0x120a   :  { %3631 = vadd.xlane.f32.xlu0 %v3630_v40  ;;  %v5549_v57 = vpop.f32.mrf.mxu0 }
0x120b   :  { %v3620_v61 = vadd.f32 %v3609_v43, %v6940_v38 }
0x120c   :  { %v3613_v31 = vpop.f32.mrf.mxu0 }
0x120d   :  { %v3614_v49 = vadd.f32 %v4689_v19, %v3613_v31  ;;  %v3633_v9 = vsel %vm16_vm0, %v3620_v61, 0.0 }
0x120e   :  { %3634 = vadd.xlane.f32.xlu0 %v3633_v9  ;;  %v5552_v25 = vpop.f32.mrf.mxu0 }
0x120f   :  { %v3621_v11 = vadd.f32 %v3614_v49, %v6946_v36 }
0x1211   :  { %v3636_v63 = vsel %vm16_vm0, %v3621_v11, 0.0 }
0x1212   :  { %3637 = vadd.xlane.f32.xlu1 %v3636_v63 }
0x1283   :  { %v3626_v34 = vpop.xlane.xlu0 %3625 }
0x1284   :  { %v3639_v47 = vmul.f32 0.03125, %v3626_v34 }
0x1286   :  { %v7615_v14 = vsub.f32 %v3617_v15, %v3639_v47 }
0x1288   :  { %v3629_v6 = vpop.xlane.xlu1 %3628  ;;  %v3649_v12 = vmul.f32 %v7615_v14, %v7615_v14 }
0x1289   :  { %v3640_v38 = vmul.f32 0.03125, %v3629_v6 }
0x128a   :  { %v3654_v50 = vsel %vm16_vm0, %v3649_v12, 0.0 }
0x128b   :  { %v7620_v1 = vsub.f32 %v3618_v33, %v3640_v38  ;;  %3655 = vadd.xlane.f32.xlu0 %v3654_v50 }
0x128d   :  { %v3650_v36 = vmul.f32 %v7620_v1, %v7620_v1 }
0x128f   :  { %v3657_v24 = vsel %vm16_vm0, %v3650_v36, 0.0 }
0x1290   :  { %3658 = vadd.xlane.f32.xlu1 %v3657_v24 }
0x1293   :  { %v3632_v20 = vpop.xlane.xlu0 %3631 }
0x1294   :  { %v3641_v4 = vmul.f32 0.03125, %v3632_v20  ;;  %v3828_v20 = vld [vmem:[%s7912_s2 + $0x198] sm:$0xff] }
0x1295   :  { %5587 = vmatpush3.msra.mxu0 %v3828_v20 }
0x1296   :  { %v7625_v62 = vsub.f32 %v3619_v58, %v3641_v4  ;;  %5588 = vmatprep.subr.mxu0 %v5922_v8  ;;  %v3827_v4 = vld [vmem:[%s7912_s2 + $0x190] sm:$0xff] }
0x1297   :  { %v3635_v13 = vpop.xlane.xlu0 %3634  ;;  %5589 = vmatpush3.msra.mxu0 %v3827_v4 }
0x1298   :  { %v3642_v56 = vmul.f32 0.03125, %v3635_v13  ;;  %v3651_v54 = vmul.f32 %v7625_v62, %v7625_v62  ;;  %5590 = vmatprep.subr.mxu0 %v5922_v8  ;;  %v4697_v13 = vld [vmem:[%s7912_s2 + $0x180] ss:$0 sm:$0xff] }
0x129a   :  { %v7629_v22 = vsub.f32 %v3620_v61, %v3642_v56  ;;  %v3660_v5 = vsel %vm16_vm0, %v3651_v54, 0.0 }
0x129b   :  { %3661 = vadd.xlane.f32.xlu0 %v3660_v5  ;;  %v3638_v16 = vpop.xlane.xlu1 %3637 }
0x129c   :  { %v3643_v45 = vmul.f32 0.03125, %v3638_v16  ;;  %v3652_v32 = vmul.f32 %v7629_v22, %v7629_v22 }
0x129e   :  { %v7634_v44 = vsub.f32 %v3621_v11, %v3643_v45  ;;  %v3663_v41 = vsel %vm16_vm0, %v3652_v32, 0.0 }
0x129f   :  { %3664 = vadd.xlane.f32.xlu1 %v3663_v41 }
0x12a0   :  { %v3653_v7 = vmul.f32 %v7634_v44, %v7634_v44 }
0x12a2   :  { %v3666_v21 = vsel %vm16_vm0, %v3653_v7, 0.0 }
0x12a3   :  { %3667 = vadd.xlane.f32.xlu0 %v3666_v21 }
0x1314   :  { %v3656_v0 = vpop.xlane.xlu0 %3655 }
0x1315   :  { %v3669_v19 = vmul.f32 0.03125, %v3656_v0  ;;  %v4703_v0 = vld [vmem:[%s7912_s2 + $0x1c8] ss:$0 sm:$0xff] }
0x1317   :  { %v3674_v53 = vadd.f32 1e-05, %v3669_v19 }
0x1319   :  { %5865 = vrsqrt.f32 %v3674_v53  ;;  %v3659_v26 = vpop.xlane.xlu1 %3658 }
0x131a   :  { %v3670_v10 = vmul.f32 0.03125, %v3659_v26 }
0x131c   :  { %v3675_v15 = vadd.f32 1e-05, %v3670_v10 }
0x131e   :  { %5867 = vrsqrt.f32 %v3675_v15 }
0x1324   :  { %v3662_v51 = vpop.xlane.xlu0 %3661 }
0x1325   :  { %v3671_v35 = vmul.f32 0.03125, %v3662_v51 }
0x1326   :  { %v5866_v48 = vpop.eup %5865 }
0x1327   :  { %v3684_v33 = vmul.f32 %v5866_v48, %v7615_v14  ;;  %v3676_v42 = vadd.f32 1e-05, %v3671_v35 }
0x1328   :  { %v3665_v37 = vpop.xlane.xlu1 %3664 }
0x1329   :  { %v3693_v55 = vmul.f32 %v4695_v27, %v3684_v33  ;;  %5869 = vrsqrt.f32 %v3676_v42  ;;  %v3672_v58 = vmul.f32 0.03125, %v3665_v37 }
0x132b   :  { %v5868_v60 = vpop.eup %5867  ;;  %v3677_v43 = vadd.f32 1e-05, %v3672_v58  ;;  %v7683_v40 = vadd.f32 %v4696_v46, %v3693_v55 }
0x132c   :  { %v3685_v57 = vmul.f32 %v5868_v60, %v7620_v1  ;;  %v3668_v61 = vpop.xlane.xlu0 %3667 }
0x132d   :  { %5871 = vrsqrt.f32 %v3677_v43  ;;  %v3673_v31 = vmul.f32 0.03125, %v3668_v61  ;;  %5562 = vmatmul.mubr.msk.f32.vlgmr.msra.gmra.mxu1 %vm16_vm0, %v7683_v40 }
0x132e   :  { %5564 = vmatprep.mubr.msk.f32.mxu1 %vm5923_vm1, %v5922_v8  ;;  %v3694_v49 = vmul.f32 %v4695_v27, %v3685_v57 }
0x132f   :  { %v3678_v9 = vadd.f32 1e-05, %v3673_v31 }
0x1330   :  { %v7690_v25 = vadd.f32 %v4696_v46, %v3694_v49 }
0x1331   :  { %5873 = vrsqrt.f32 %v3678_v9 }
0x1332   :  { %5565 = vmatmul.mubr.msk.f32.gmra.mxu1 %vm16_vm0, %v7690_v25 }
0x1333   :  { %5567 = vmatprep.mubr.msk.f32.mxu1 %vm5923_vm1, %v5922_v8 }
0x1336   :  { %v5870_v11 = vpop.eup %5869 }
0x1337   :  { %v3686_v63 = vmul.f32 %v5870_v11, %v7625_v62  ;;  %v3826_v62 = vld [vmem:[%s7912_s2 + $0x188] sm:$0xff] }
0x1338   :  { %5591 = vmatpush3.msra.mxu0 %v3826_v62 }
0x1339   :  { %v3695_v34 = vmul.f32 %v4695_v27, %v3686_v63  ;;  %5629 = vmatprep.subr.mxu0 %v5922_v8 }
0x133a   :  { %v5872_v47 = vpop.eup %5871 }
0x133b   :  { %v3687_v14 = vmul.f32 %v5872_v47, %v7629_v22  ;;  %v7698_v6 = vadd.f32 %v4696_v46, %v3695_v34 }
0x133d   :  { %5568 = vmatmul.mubr.msk.f32.gmra.mxu1 %vm16_vm0, %v7698_v6  ;;  %v3696_v12 = vmul.f32 %v4695_v27, %v3687_v14 }
0x133e   :  { %v5874_v38 = vpop.eup %5873  ;;  %5570 = vmatprep.mubr.msk.f32.mxu1 %vm5923_vm1, %v5922_v8 }
0x133f   :  { %v3688_v50 = vmul.f32 %v5874_v38, %v7634_v44  ;;  %v7705_v1 = vadd.f32 %v4696_v46, %v3696_v12 }
0x1341   :  { %5571 = vmatmul.mubr.msk.f32.gmra.mxu1 %vm16_vm0, %v7705_v1  ;;  %v3697_v36 = vmul.f32 %v4695_v27, %v3688_v50 }
0x1342   :  { %5573 = vmatprep.mubr.msk.f32.mxu1 %vm5923_vm1, %v5922_v8 }
0x1343   :  { %v7711_v24 = vadd.f32 %v4696_v46, %v3697_v36 }
0x1345   :  { %5574 = vmatmul.mubr.msk.f32.gmra.mxu1 %vm16_vm0, %v7711_v24 }
0x1346   :  { %5615 = vmatprep.mubr.msk.f32.mxu1 %vm5923_vm1, %v5922_v8 }
0x13ed   :  { %v3797_v56 = vpop.f32.mrf.mxu1 }
0x13ee   :  { %v3798_v54 = vadd.f32 %v4697_v13, %v3797_v56 }
0x13ef   :  { %v5563_v22 = vpop.f32.mrf.mxu1 }
0x13f0   :  { %v3821_v5 = vmax.f32 %v3798_v54, 0.0 }
0x13f2   :  { %v3802_v16 = vpop.f32.mrf.mxu1  ;;  %5593 = vmatmul.mubr.msk.f32.vlgmr.msra.gmra.mxu0 %vm1903_vm8, %v3821_v5 }
0x13f3   :  { %v3803_v45 = vadd.f32 %v4697_v13, %v3802_v16  ;;  %5595 = vmatprep.mubr.msk.f32.mxu0 %vm5923_vm1, %v5922_v8 }
0x13f4   :  { %v5566_v32 = vpop.f32.mrf.mxu1 }
0x13f5   :  { %v3822_v44 = vmax.f32 %v3803_v45, 0.0 }
0x13f7   :  { %5596 = vmatmul.mubr.msk.f32.gmra.mxu0 %vm1903_vm8, %v3822_v44 }
0x13f8   :  { %5598 = vmatprep.mubr.msk.f32.mxu0 %vm5923_vm1, %v5922_v8 }
0x13fd   :  { %v3807_v41 = vpop.f32.mrf.mxu1 }
0x13fe   :  { %v3808_v7 = vadd.f32 %v4697_v13, %v3807_v41 }
0x13ff   :  { %v5569_v21 = vpop.f32.mrf.mxu1 }
0x1400   :  { %v3823_v29 = vmax.f32 %v3808_v7, 0.0 }
0x1401   :  { %v3812_v52 = vpop.f32.mrf.mxu1 }
0x1402   :  { %v3813_v18 = vadd.f32 %v4697_v13, %v3812_v52  ;;  %5599 = vmatmul.mubr.msk.f32.gmra.mxu0 %vm1903_vm8, %v3823_v29 }
0x1403   :  { %v5572_v59 = vpop.f32.mrf.mxu1  ;;  %5601 = vmatprep.mubr.msk.f32.mxu0 %vm5923_vm1, %v5922_v8 }
0x1404   :  { %v3824_v2 = vmax.f32 %v3813_v18, 0.0 }
0x1405   :  { %v3817_v28 = vpop.f32.mrf.mxu1 }
0x1406   :  { %v3818_v39 = vadd.f32 %v4697_v13, %v3817_v28  ;;  %5602 = vmatmul.mubr.msk.f32.gmra.mxu0 %vm1903_vm8, %v3824_v2 }
0x1407   :  { %v5575_v23 = vpop.f32.mrf.mxu1  ;;  %5604 = vmatprep.mubr.msk.f32.mxu0 %vm5923_vm1, %v5922_v8 }
0x1408   :  { %v3825_v30 = vmax.f32 %v3818_v39, 0.0 }
0x140a   :  { %5605 = vmatmul.mubr.msk.f32.gmra.mxu0 %vm1903_vm8, %v3825_v30  ;;  %v4709_v30 = vld [vmem:[%s7912_s2 + $0x1e0] ss:$0 sm:$0xff] }
0x140b   :  { %5637 = vmatprep.mubr.msk.f32.mxu0 %vm5923_vm1, %v5922_v8 }
0x14b2   :  { %v3920_v19 = vpop.f32.mrf.mxu0 }
0x14b3   :  { %v3921_v53 = vadd.f32 %v4703_v0, %v3920_v19 }
0x14b4   :  { %v5594_v26 = vpop.f32.mrf.mxu0 }
0x14b5   :  { %v3944_v10 = vadd.f32 %v3921_v53, %v7683_v40  ;;  %v4710_v26 = vld [vmem:[%s7912_s2 + $0x1e8] ss:$0 sm:$0xff] }
0x14b7   :  { %v3925_v15 = vpop.f32.mrf.mxu0  ;;  %v3951_v51 = vsel %vm16_vm0, %v3944_v10, 0.0 }
0x14b8   :  { %v3926_v35 = vadd.f32 %v4703_v0, %v3925_v15  ;;  %3952 = vadd.xlane.f32.xlu0 %v3951_v51 }
0x14b9   :  { %v5597_v48 = vpop.f32.mrf.mxu0 }
0x14ba   :  { %v3945_v27 = vadd.f32 %v3926_v35, %v7690_v25 }
0x14bc   :  { %v3954_v33 = vsel %vm16_vm0, %v3945_v27, 0.0 }
0x14bd   :  { %3955 = vadd.xlane.f32.xlu1 %v3954_v33 }
0x14c2   :  { %v3930_v42 = vpop.f32.mrf.mxu0 }
0x14c3   :  { %v3931_v37 = vadd.f32 %v4703_v0, %v3930_v42 }
0x14c4   :  { %v5600_v46 = vpop.f32.mrf.mxu0 }
0x14c5   :  { %v3946_v55 = vadd.f32 %v3931_v37, %v7698_v6 }
0x14c6   :  { %v3935_v58 = vpop.f32.mrf.mxu0 }
0x14c7   :  { %v3936_v60 = vadd.f32 %v4703_v0, %v3935_v58  ;;  %v3957_v43 = vsel %vm16_vm0, %v3946_v55, 0.0 }
0x14c8   :  { %3958 = vadd.xlane.f32.xlu1 %v3957_v43  ;;  %v5603_v40 = vpop.f32.mrf.mxu0 }
0x14c9   :  { %v3947_v57 = vadd.f32 %v3936_v60, %v7705_v1 }
0x14ca   :  { %v3940_v61 = vpop.f32.mrf.mxu0 }
0x14cb   :  { %v3941_v31 = vadd.f32 %v4703_v0, %v3940_v61  ;;  %v3960_v49 = vsel %vm16_vm0, %v3947_v57, 0.0 }
0x14cc   :  { %3961 = vadd.xlane.f32.xlu0 %v3960_v49  ;;  %v5606_v9 = vpop.f32.mrf.mxu0 }
0x14cd   :  { %v3948_v25 = vadd.f32 %v3941_v31, %v7711_v24 }
0x14cf   :  { %v3963_v11 = vsel %vm16_vm0, %v3948_v25, 0.0 }
0x14d0   :  { %3964 = vadd.xlane.f32.xlu1 %v3963_v11 }
0x1541   :  { %v3953_v63 = vpop.xlane.xlu0 %3952 }
0x1542   :  { %v3966_v34 = vmul.f32 0.03125, %v3953_v63 }
0x1544   :  { %v3971_v47 = vsub.f32 %v3944_v10, %v3966_v34 }
0x1546   :  { %v3956_v14 = vpop.xlane.xlu1 %3955  ;;  %v3976_v6 = vmul.f32 %v3971_v47, %v3971_v47 }
0x1547   :  { %v3967_v12 = vmul.f32 0.03125, %v3956_v14 }
0x1548   :  { %v3981_v38 = vsel %vm16_vm0, %v3976_v6, 0.0 }
0x1549   :  { %v3972_v50 = vsub.f32 %v3945_v27, %v3967_v12  ;;  %3982 = vadd.xlane.f32.xlu1 %v3981_v38 }
0x154b   :  { %v3977_v1 = vmul.f32 %v3972_v50, %v3972_v50 }
0x154d   :  { %v3984_v36 = vsel %vm16_vm0, %v3977_v1, 0.0 }
0x154e   :  { %3985 = vadd.xlane.f32.xlu0 %v3984_v36 }
0x1551   :  { %v3959_v20 = vpop.xlane.xlu1 %3958 }
0x1552   :  { %v3968_v4 = vmul.f32 0.03125, %v3959_v20 }
0x1554   :  { %v3973_v24 = vsub.f32 %v3946_v55, %v3968_v4 }
0x1555   :  { %v3962_v62 = vpop.xlane.xlu0 %3961 }
0x1556   :  { %v3969_v13 = vmul.f32 0.03125, %v3962_v62  ;;  %v3978_v56 = vmul.f32 %v3973_v24, %v3973_v24 }
0x1558   :  { %v3974_v54 = vsub.f32 %v3947_v57, %v3969_v13  ;;  %v3987_v22 = vsel %vm16_vm0, %v3978_v56, 0.0 }
0x1559   :  { %3988 = vadd.xlane.f32.xlu0 %v3987_v22  ;;  %v3965_v5 = vpop.xlane.xlu1 %3964 }
0x155a   :  { %v3970_v16 = vmul.f32 0.03125, %v3965_v5  ;;  %v3979_v45 = vmul.f32 %v3974_v54, %v3974_v54 }
0x155c   :  { %v3975_v32 = vsub.f32 %v3948_v25, %v3970_v16  ;;  %v3990_v44 = vsel %vm16_vm0, %v3979_v45, 0.0 }
0x155d   :  { %3991 = vadd.xlane.f32.xlu1 %v3990_v44 }
0x155e   :  { %v3980_v41 = vmul.f32 %v3975_v32, %v3975_v32 }
0x1560   :  { %v3993_v7 = vsel %vm16_vm0, %v3980_v41, 0.0 }
0x1561   :  { %3994 = vadd.xlane.f32.xlu0 %v3993_v7 }
0x15d2   :  { %v3983_v21 = vpop.xlane.xlu1 %3982 }
0x15d3   :  { %v3996_v29 = vmul.f32 0.03125, %v3983_v21 }
0x15d5   :  { %v4001_v52 = vadd.f32 1e-05, %v3996_v29 }
0x15d7   :  { %5875 = vrsqrt.f32 %v4001_v52  ;;  %v3986_v18 = vpop.xlane.xlu0 %3985 }
0x15d8   :  { %v3997_v59 = vmul.f32 0.03125, %v3986_v18 }
0x15da   :  { %v4002_v2 = vadd.f32 1e-05, %v3997_v59 }
0x15dc   :  { %5877 = vrsqrt.f32 %v4002_v2 }
0x15e2   :  { %v3989_v28 = vpop.xlane.xlu0 %3988 }
0x15e3   :  { %v3998_v39 = vmul.f32 0.03125, %v3989_v28  ;;  %v4126_v28 = vld [vmem:[%s7912_s2 + $0x238] sm:$0xff] }
0x15e4   :  { %v5876_v23 = vpop.eup %5875  ;;  %5608 = vmatpush3.msra.mxu1 %v4126_v28 }
0x15e5   :  { %v4003_v0 = vadd.f32 1e-05, %v3998_v39  ;;  %v4011_v19 = vmul.f32 %v5876_v23, %v3971_v47  ;;  %5609 = vmatprep.subr.mxu1 %v5922_v8  ;;  %v4125_v39 = vld [vmem:[%s7912_s2 + $0x230] sm:$0xff]  ;;  %v4124_v23 = vld [vmem:[%s7912_s2 + $0x228] sm:$0xff] }
0x15e6   :  { %v3992_v53 = vpop.xlane.xlu1 %3991  ;;  %5610 = vmatpush3.msra.mxu1 %v4125_v39 }
0x15e7   :  { %5879 = vrsqrt.f32 %v4003_v0  ;;  %v3999_v10 = vmul.f32 0.03125, %v3992_v53  ;;  %v4020_v15 = vmul.f32 %v4709_v30, %v4011_v19  ;;  %5611 = vmatprep.subr.mxu1 %v5922_v8  ;;  %v4276_v0 = vld [vmem:[%s7912_s2 + $0x258] sm:$0xff]  ;;  %v4275_v19 = vld [vmem:[%s7912_s2 + $0x250] sm:$0xff]  ;;  %v4274_v53 = vld [vmem:[%s7912_s2 + $0x248] sm:$0xff] }
0x15e8   :  { %5612 = vmatpush3.msra.mxu1 %v4124_v23  ;;  %5630 = vmatpush3.msra.mxu0 %v4276_v0 }
0x15e9   :  { %v5878_v51 = vpop.eup %5877  ;;  %v4004_v35 = vadd.f32 1e-05, %v3999_v10  ;;  %v4029_v48 = vadd.f32 %v4710_v26, %v4020_v15  ;;  %5613 = vmatprep.subr.mxu1 %v5922_v8  ;;  %5631 = vmatprep.subr.mxu0 %v5922_v8 }
0x15ea   :  { %v3995_v27 = vpop.xlane.xlu0 %3994  ;;  %v4012_v33 = vmul.f32 %v5878_v51, %v3972_v50  ;;  %5632 = vmatpush3.msra.mxu0 %v4275_v19 }
0x15eb   :  { %5881 = vrsqrt.f32 %v4004_v35  ;;  %v4000_v42 = vmul.f32 0.03125, %v3995_v27  ;;  %v4036_v37 = vsel %vm16_vm0, %v4029_v48, 0.0  ;;  %5633 = vmatprep.subr.mxu0 %v5922_v8 }
0x15ec   :  { %4037 = vadd.xlane.f32.xlu0 %v4036_v37  ;;  %v4021_v46 = vmul.f32 %v4709_v30, %v4012_v33  ;;  %5634 = vmatpush3.msra.mxu0 %v4274_v53 }
0x15ed   :  { %v4005_v55 = vadd.f32 1e-05, %v4000_v42  ;;  %5635 = vmatprep.subr.mxu0 %v5922_v8 }
0x15ee   :  { %v4030_v58 = vadd.f32 %v4710_v26, %v4021_v46 }
0x15ef   :  { %5883 = vrsqrt.f32 %v4005_v55 }
0x15f0   :  { %v4039_v60 = vsel %vm16_vm0, %v4030_v58, 0.0 }
0x15f1   :  { %4040 = vadd.xlane.f32.xlu1 %v4039_v60 }
0x15f4   :  { %v5880_v43 = vpop.eup %5879 }
0x15f5   :  { %v4013_v40 = vmul.f32 %v5880_v43, %v3973_v24 }
0x15f7   :  { %v4022_v57 = vmul.f32 %v4709_v30, %v4013_v40 }
0x15f8   :  { %v5882_v61 = vpop.eup %5881 }
0x15f9   :  { %v4031_v31 = vadd.f32 %v4710_v26, %v4022_v57  ;;  %v4014_v49 = vmul.f32 %v5882_v61, %v3974_v54  ;;  %v4711_v61 = vld [vmem:[%s7912_s2 + $0x1f0] ss:$0 sm:$0xff] }
0x15fb   :  { %v4042_v9 = vsel %vm16_vm0, %v4031_v31, 0.0  ;;  %v4023_v25 = vmul.f32 %v4709_v30, %v4014_v49 }
0x15fc   :  { %v5884_v11 = vpop.eup %5883  ;;  %4043 = vadd.xlane.f32.xlu1 %v4042_v9  ;;  %v4712_v9 = vld [vmem:[%s7912_s2 + $0x1f8] ss:$0 sm:$0xff] }
0x15fd   :  { %v4032_v63 = vadd.f32 %v4710_v26, %v4023_v25  ;;  %v4015_v34 = vmul.f32 %v5884_v11, %v3975_v32 }
0x15ff   :  { %v4045_v47 = vsel %vm16_vm0, %v4032_v63, 0.0  ;;  %v4024_v14 = vmul.f32 %v4709_v30, %v4015_v34  ;;  %v4123_v30 = vld [vmem:[%s7912_s2 + $0x220] sm:$0xff]  ;;  %v4122_v34 = vld [vmem:[%s7912_s2 + $0x218] sm:$0xff] }
0x1600   :  { %4046 = vadd.xlane.f32.xlu0 %v4045_v47  ;;  %5614 = vmatpush3.msra.mxu1 %v4123_v30  ;;  %v4121_v47 = vld [vmem:[%s7912_s2 + $0x210] sm:$0xff] }
0x1601   :  { %v4033_v6 = vadd.f32 %v4710_v26, %v4024_v14  ;;  %5618 = vmatprep.subr.mxu1 %v5922_v8  ;;  %v4273_v26 = vld [vmem:[%s7912_s2 + $0x240] sm:$0xff] }
0x1602   :  { %5636 = vmatpush3.msra.mxu0 %v4273_v26 }
0x1603   :  { %v4048_v12 = vsel %vm16_vm0, %v4033_v6, 0.0  ;;  %5651 = vmatprep.subr.mxu0 %v5922_v8 }
0x1604   :  { %4049 = vadd.xlane.f32.xlu1 %v4048_v12 }
0x1675   :  { %v4038_v38 = vpop.xlane.xlu0 %4037 }
0x1676   :  { %v4051_v50 = vmul.f32 0.03125, %v4038_v38  ;;  %v4119_v38 = vld [vmem:[%s7912_s2 + $0x200] sm:$0xff] }
0x1678   :  { %v7776_v1 = vsub.f32 %v4029_v48, %v4051_v50 }
0x167a   :  { %v4041_v36 = vpop.xlane.xlu1 %4040  ;;  %v4061_v20 = vmul.f32 %v7776_v1, %v7776_v1 }
0x167b   :  { %v4052_v4 = vmul.f32 0.03125, %v4041_v36  ;;  %v4354_v36 = vld [vmem:[%s7912_s2 + $0x278] sm:$0xff] }
0x167c   :  { %v4066_v24 = vsel %vm16_vm0, %v4061_v20, 0.0 }
0x167d   :  { %v7781_v62 = vsub.f32 %v4030_v58, %v4052_v4  ;;  %4067 = vadd.xlane.f32.xlu1 %v4066_v24  ;;  %v4353_v24 = vld [vmem:[%s7912_s2 + $0x270] sm:$0xff] }
0x167f   :  { %v4062_v13 = vmul.f32 %v7781_v62, %v7781_v62 }
0x1681   :  { %v4069_v56 = vsel %vm16_vm0, %v4062_v13, 0.0 }
0x1682   :  { %4070 = vadd.xlane.f32.xlu0 %v4069_v56  ;;  %v4432_v56 = vld [vmem:[%s7912_s2 + $0x298] sm:$0xff] }
0x1685   :  { %v4044_v54 = vpop.xlane.xlu1 %4043 }
0x1686   :  { %v4053_v22 = vmul.f32 0.03125, %v4044_v54  ;;  %v4352_v54 = vld [vmem:[%s7912_s2 + $0x268] sm:$0xff] }
0x1688   :  { %v7786_v5 = vsub.f32 %v4031_v31, %v4053_v22 }
0x1689   :  { %v4047_v16 = vpop.xlane.xlu0 %4046 }
0x168a   :  { %v4054_v45 = vmul.f32 0.03125, %v4047_v16  ;;  %v4063_v32 = vmul.f32 %v7786_v5, %v7786_v5 }
0x168c   :  { %v7790_v44 = vsub.f32 %v4032_v63, %v4054_v45  ;;  %v4072_v41 = vsel %vm16_vm0, %v4063_v32, 0.0  ;;  %v4351_v45 = vld [vmem:[%s7912_s2 + $0x260] sm:$0xff] }
0x168d   :  { %4073 = vadd.xlane.f32.xlu0 %v4072_v41  ;;  %v4050_v7 = vpop.xlane.xlu1 %4049  ;;  %v4430_v41 = vld [vmem:[%s7912_s2 + $0x288] sm:$0xff] }
0x168e   :  { %v4055_v21 = vmul.f32 0.03125, %v4050_v7  ;;  %v4064_v29 = vmul.f32 %v7790_v44, %v7790_v44 }
0x1690   :  { %v7795_v52 = vsub.f32 %v4033_v6, %v4055_v21  ;;  %v4075_v18 = vsel %vm16_vm0, %v4064_v29, 0.0  ;;  %v4120_v6 = vld [vmem:[%s7912_s2 + $0x208] sm:$0xff]  ;;  %v4429_v21 = vld [vmem:[%s7912_s2 + $0x280] sm:$0xff] }
0x1691   :  { %4076 = vadd.xlane.f32.xlu1 %v4075_v18 }
0x1692   :  { %v4065_v59 = vmul.f32 %v7795_v52, %v7795_v52 }
0x1694   :  { %v4078_v2 = vsel %vm16_vm0, %v4065_v59, 0.0 }
0x1695   :  { %4079 = vadd.xlane.f32.xlu0 %v4078_v2 }
0x1706   :  { %v4068_v10 = vpop.xlane.xlu1 %4067 }
0x1707   :  { %v4081_v15 = vmul.f32 0.03125, %v4068_v10 }
0x1709   :  { %v4086_v48 = vadd.f32 1e-05, %v4081_v15 }
0x170b   :  { %v4071_v51 = vpop.xlane.xlu0 %4070 }
0x170c   :  { %v4082_v35 = vmul.f32 0.03125, %v4071_v51 }
0x170e   :  { %v4087_v27 = vadd.f32 1e-05, %v4082_v35 }
0x1710   :  { %5885 = vrsqrt.f32 %v4087_v27 }
0x1711   :  { %5887 = vrsqrt.f32 %v4086_v48 }
0x1716   :  { %v4074_v33 = vpop.xlane.xlu0 %4073 }
0x1717   :  { %v4083_v42 = vmul.f32 0.03125, %v4074_v33 }
0x1719   :  { %v4088_v37 = vadd.f32 1e-05, %v4083_v42 }
0x171a   :  { %v4077_v46 = vpop.xlane.xlu1 %4076 }
0x171b   :  { %5889 = vrsqrt.f32 %v4088_v37  ;;  %v4084_v55 = vmul.f32 0.03125, %v4077_v46 }
0x171d   :  { %v5886_v58 = vpop.eup %5885  ;;  %v4089_v60 = vadd.f32 1e-05, %v4084_v55 }
0x171e   :  { %v4097_v43 = vmul.f32 %v5886_v58, %v7781_v62  ;;  %v4080_v40 = vpop.xlane.xlu0 %4079  ;;  %v5888_v57 = vpop.eup %5887 }
0x171f   :  { %5891 = vrsqrt.f32 %v4089_v60  ;;  %v4085_v31 = vmul.f32 0.03125, %v4080_v40  ;;  %v4096_v11 = vmul.f32 %v5888_v57, %v7776_v1 }
0x1720   :  { %v4106_v49 = vmul.f32 %v4711_v61, %v4097_v43 }
0x1721   :  { %v4090_v25 = vadd.f32 1e-05, %v4085_v31  ;;  %v4105_v14 = vmul.f32 %v4711_v61, %v4096_v11 }
0x1722   :  { %v4115_v63 = vadd.f32 %v4712_v9, %v4106_v49 }
0x1723   :  { %5893 = vrsqrt.f32 %v4090_v25  ;;  %v4114_v1 = vadd.f32 %v4712_v9, %v4105_v14 }
0x1724   :  { %5616 = vmatmul.mubr.msk.f32.vlgmr.msra.gmra.mxu1 %vm16_vm0, %v4115_v63 }
0x1725   :  { %5619 = vmatpush3.msra.mxu1 %v4122_v34  ;;  %5626 = vmatprep.mubr.msk.f32.mxu1 %vm5923_vm1, %v5922_v8 }
0x1726   :  { %5620 = vmatprep.subr.mxu1 %v5922_v8 }
0x1727   :  { %5621 = vmatpush3.msra.mxu1 %v4121_v47 }
0x1728   :  { %v5890_v12 = vpop.eup %5889  ;;  %5622 = vmatprep.subr.mxu1 %v5922_v8 }
0x1729   :  { %v4098_v50 = vmul.f32 %v5890_v12, %v7786_v5  ;;  %5623 = vmatpush3.msra.mxu1 %v4120_v6  ;;  %v4431_v5 = vld [vmem:[%s7912_s2 + $0x290] sm:$0xff] }
0x172a   :  { %5624 = vmatprep.subr.mxu1 %v5922_v8 }
0x172b   :  { %v4107_v20 = vmul.f32 %v4711_v61, %v4098_v50  ;;  %5625 = vmatpush3.msra.mxu1 %v4119_v38 }
0x172c   :  { %v5892_v4 = vpop.eup %5891  ;;  %5627 = vmatmul.mubr.msk.f32.vlgmr.msra.gmra.mxu1 %vm16_vm0, %v4114_v1  ;;  %5640 = vmatprep.subr.mxu1 %v5922_v8 }
0x172d   :  { %v4116_v62 = vadd.f32 %v4712_v9, %v4107_v20  ;;  %v4099_v13 = vmul.f32 %v5892_v4, %v7790_v44  ;;  %5641 = vmatpush3.msra.mxu1 %v4354_v36  ;;  %5648 = vmatprep.mubr.msk.f32.mxu1 %vm5923_vm1, %v5922_v8 }
0x172e   :  { %5642 = vmatprep.subr.mxu1 %v5922_v8 }
0x172f   :  { %v4108_v22 = vmul.f32 %v4711_v61, %v4099_v13  ;;  %5643 = vmatpush3.msra.mxu1 %v4353_v24  ;;  %5638 = vmatmul.mubr.msk.f32.vlgmr.msra.gmra.mxu0 %vm16_vm0, %v4116_v62 }
0x1730   :  { %v5894_v16 = vpop.eup %5893  ;;  %5644 = vmatprep.subr.mxu1 %v5922_v8  ;;  %5652 = vmatpush3.msra.mxu0 %v4432_v56 }
0x1731   :  { %v4100_v32 = vmul.f32 %v5894_v16, %v7795_v52  ;;  %5645 = vmatpush3.msra.mxu1 %v4352_v54  ;;  %5653 = vmatprep.subr.mxu0 %v5922_v8  ;;  %v4117_v44 = vadd.f32 %v4712_v9, %v4108_v22 }
0x1732   :  { %5646 = vmatprep.subr.mxu1 %v5922_v8  ;;  %5654 = vmatpush3.msra.mxu0 %v4431_v5 }
0x1733   :  { %v4109_v7 = vmul.f32 %v4711_v61, %v4100_v32  ;;  %5647 = vmatpush3.msra.mxu1 %v4351_v45  ;;  %5655 = vmatprep.subr.mxu0 %v5922_v8 }
0x1734   :  { %5649 = vmatmul.mubr.msk.f32.vlgmr.msra.gmra.mxu1 %vm16_vm0, %v4117_v44  ;;  %5656 = vmatpush3.msra.mxu0 %v4430_v41 }
0x1735   :  { %5657 = vmatprep.subr.mxu0 %v5922_v8  ;;  %5659 = vmatprep.mubr.msk.f32.mxu0 %vm5923_vm1, %v5922_v8  ;;  %v4118_v29 = vadd.f32 %v4712_v9, %v4109_v7  ;;  %v4718_v8 = vld [vmem:[%s7912_s2 + $0x2a0] ss:$0 sm:$0xff] }
0x1736   :  { %5658 = vmatpush3.msra.mxu0 %v4429_v21 }
0x1737   :  { %5660 = vmatmul.mubr.msk.f32.vlgmr.msra.gmra.mxu0 %vm16_vm0, %v4118_v29 }
0x17e4   :  { %v4196_v52 = vpop.f32.mrf.mxu1 }
0x17e6   :  { %v5617_v18 = vpop.f32.mrf.mxu1 }
0x17ec   :  { %v4269_v59 = vpop.f32.mrf.mxu1 }
0x17ed   :  { %v4270_v23 = vadd.f32 %v4269_v59, %v4196_v52 }
0x17ee   :  { %v5628_v2 = vpop.f32.mrf.mxu1 }
0x17ef   :  { %v4346_v28 = vpop.f32.mrf.mxu0 }
0x17f0   :  { %v4350_v30 = vadd.f32 %v4346_v28, %v4270_v23 }
0x17f1   :  { %v5639_v39 = vpop.f32.mrf.mxu0 }
0x17f4   :  { %v4424_v0 = vpop.f32.mrf.mxu1 }
0x17f5   :  { %v4428_v19 = vadd.f32 %v4424_v0, %v4350_v30 }
0x17f6   :  { %v5650_v53 = vpop.f32.mrf.mxu1 }
0x17f7   :  { %v4502_v26 = vpop.f32.mrf.mxu0 }
0x17f8   :  { %v4506_v10 = vadd.f32 %v4502_v26, %v4428_v19 }
0x17f9   :  { %v5661_v15 = vpop.f32.mrf.mxu0 }
0x17fa   :  { %v4512_v51 = vadd.f32 %v4718_v8, %v4506_v10 }
0x17fc   :  { %v4513_v35 = vmul.f32 %v4512_v51, %v5978_v17 }
0x17fe   :  { %v4514_v48 = vadd.f32 %v4513_v35, %v5964_v3 }
0x1800   :  { %4515 = vst.msk [vmem:[#allocation2] sm:$0xff] %vm54_vm4, %v4514_v48 }
0x1801   :  { %5911 = shalt.err (!%p5908_p4)
}
0x1802   :  { %4525 = dma.vmem_to_hbm [thread:$0]  %s4523_s10, 128, %s7913_s3, [#allocation3]  }
0x1803   :  { %5920 = dma.done.wait [#allocation3], 128  }
0x1804   :  { %5921 = vsyncadd [#allocation3], 4294967168 }
0x1805   :  { %4529 = vsyncpa [#allocation3], 1 }

</bundles_post_ra>
